<compile_context>
chip_gen: v6e
topology: v6e:2x2x1
jax: 0.10.0
libtpu: 0.0.40
codegen_flags: <defaults>
</compile_context>

<pallas_src>
import functools

import jax
import jax.numpy as jnp
import numpy as np
from jax.experimental import pallas as pl
from jax.experimental.pallas import tpu as pltpu

_BN_EPS = 1e-5
_BF16 = jnp.bfloat16
_LANE = 128


# ------------------------------ small helpers -------------------------------

def _pad_lane(c):
    """Round a channel count up to a lane multiple (128)."""
    return ((c + _LANE - 1) // _LANE) * _LANE


def _pad_to_shape(a, shape):
    pads = [(0, t - s) for s, t in zip(a.shape, shape)]
    return jnp.pad(a, pads) if any(p for _, p in pads) else a


@functools.lru_cache(maxsize=None)
def _vmem_limit_bytes():
    """~80% of physical VMEM (≈102 MiB on v5e/v6e, ≈51 MiB on v7x)."""
    try:
        cap = int(pltpu.get_tpu_info().vmem_capacity_bytes)
        return max(32 << 20, min(int(cap * 0.8), cap - (8 << 20)))
    except Exception:
        return 48 << 20  # conservative: fits every generation (v7x has 64 MiB)


# ------------------------------ kernel helpers -------------------------------

def _relu_affine(x, s_ref, b_ref):
    """Folded eval-mode BatchNorm (per-channel affine) + ReLU, in f32."""
    return jnp.maximum(x * s_ref[...] + b_ref[...], 0.0)


def _mxu_dot(a_f32, w_ref):
    """MXU matmul: bf16 operands, f32 accumulation."""
    return jnp.dot(a_f32.astype(_BF16), w_ref[...],
                   preferred_element_type=jnp.float32)


def _make_block_kernel(H, W, resize):
    """Fused FishBlock kernel (stride=1, dilation=1); one image per grid step."""
    HW = H * W

    def edge_masks():
        # (HW, 1) f32 validity masks for the zero-padded 3x3 stencil,
        # regenerated in-kernel (VPU filler; saves a lane-padded operand).
        idx = jax.lax.broadcasted_iota(jnp.int32, (HW, 1), 0)
        col = idx % W
        f32 = jnp.float32
        m_dy = {-1: (idx >= W).astype(f32),
                0: None,
                1: (idx < (H - 1) * W).astype(f32)}
        m_dx = {-1: (col >= 1).astype(f32),
                0: None,
                1: (col < (W - 1)).astype(f32)}
        return m_dy, m_dx

    def conv3x3(a2, w2_ref):
        # im2col over the 9 taps of the zero-padded 3x3 stencil: row-roll (XLU)
        # + f32 boundary-mask multiply, immediate bf16 cast per tap (low peak
        # VMEM), lane-aligned bf16 concat, single MXU matmul with K = 9*mid_p.
        m_dy, m_dx = edge_masks()
        taps = []
        for dy in (-1, 0, 1):
            for dx in (-1, 0, 1):
                if dy == 0 and dx == 0:
                    taps.append(a2.astype(_BF16))
                    continue
                t = pltpu.roll(a2, shift=(-(dy * W + dx)) % HW, axis=0)
                if dy == 0:
                    m = m_dx[dx]
                elif dx == 0:
                    m = m_dy[dy]
                else:
                    m = m_dy[dy] * m_dx[dx]
                taps.append((t * m).astype(_BF16))
        cols = jnp.concatenate(taps, axis=-1)            # (HW, 9*mid_p) bf16
        return jnp.dot(cols, w2_ref[...], preferred_element_type=jnp.float32)

    def bottleneck(x, s1, b1, w1, s2, b2, w2, s3, b3):
        a1 = _relu_affine(x, s1, b1)             # (HW, Cin_p)
        y1 = _mxu_dot(a1, w1)                    # (HW, mid_p)
        a2 = _relu_affine(y1, s2, b2)
        y2 = conv3x3(a2, w2)                     # (HW, mid_p)
        return _relu_affine(y2, s3, b3)

    if resize:
        def kernel(x_ref, s1, b1, w1, s2, b2, w2, s3, b3, w3,
                   sid, bid, wid, o_ref):
            x = x_ref[0]
            a3 = bottleneck(x, s1, b1, w1, s2, b2, w2, s3, b3)
            ident = _mxu_dot(_relu_affine(x, sid, bid), wid)
            o_ref[0] = _mxu_dot(a3, w3) + ident
    else:
        def kernel(x_ref, s1, b1, w1, s2, b2, w2, s3, b3, w3, o_ref):
            x = x_ref[0]
            a3 = bottleneck(x, s1, b1, w1, s2, b2, w2, s3, b3)
            o_ref[0] = _mxu_dot(a3, w3) + x      # identity (Cin_p == Cout_p)
    return kernel


# --------------------------- fused FishBlock call ----------------------------

def _block_pallas_call(x, p):
    """One fused FishBlock on lane-padded activations.

    x: (N, H, W, Cin_pad) f32 with zero padded channels.
    Returns (N, H, W, Cout_pad) f32 with zero padded channels.
    """
    N, H, W, cin_pad = x.shape
    HW = H * W
    cin, mid = p['w1'].shape
    cout = p['w3'].shape[1]
    resize = p['w_id'] is not None
    cin_p, mid_p, cout_p = _pad_lane(cin), _pad_lane(mid), _pad_lane(cout)
    assert cin_pad == cin_p, (cin_pad, cin_p)

    def vec(v, c):  # per-channel BN scale/bias -> (1, c) f32, zero padded
        return _pad_to_shape(v, (c,))[None, :]

    w1 = _pad_to_shape(p['w1'], (cin_p, mid_p))
    w2 = _pad_to_shape(p['w2'].reshape(9, mid, mid),
                       (9, mid_p, mid_p)).reshape(9 * mid_p, mid_p)  # im2col
    w3 = _pad_to_shape(p['w3'], (mid_p, cout_p))

    args = [x.reshape(N, HW, cin_p),
            vec(p['bn1_s'], cin_p), vec(p['bn1_b'], cin_p), w1,
            vec(p['bn2_s'], mid_p), vec(p['bn2_b'], mid_p), w2,
            vec(p['bn3_s'], mid_p), vec(p['bn3_b'], mid_p), w3]

    def const(a):  # grid-invariant operand, full block, constant index map
        zeros = (0,) * a.ndim
        return pl.BlockSpec(a.shape, lambda n: zeros)

    in_specs = [pl.BlockSpec((1, HW, cin_p), lambda n: (n, 0, 0))]
    in_specs += [const(a) for a in args[1:]]

    if resize:
        wid = _pad_to_shape(p['w_id'], (cin_p, cout_p))
        extra = [vec(p['bnid_s'], cin_p), vec(p['bnid_b'], cin_p), wid]
        args += extra
        in_specs += [const(a) for a in extra]

    flops = 2 * N * HW * (cin_p * mid_p + 9 * mid_p * mid_p + mid_p * cout_p
                          + (cin_p * cout_p if resize else 0))
    bytes_acc = (4 * N * HW * cout_p
                 + sum(int(np.prod(a.shape)) * a.dtype.itemsize for a in args))

    out = pl.pallas_call(
        _make_block_kernel(H, W, resize),
        out_shape=jax.ShapeDtypeStruct((N, HW, cout_p), jnp.float32),
        grid_spec=pltpu.PrefetchScalarGridSpec(
            num_scalar_prefetch=0,
            grid=(N,),
            in_specs=in_specs,
            out_specs=pl.BlockSpec((1, HW, cout_p), lambda n: (n, 0, 0))),
        compiler_params=pltpu.CompilerParams(
            dimension_semantics=("parallel",),
            vmem_limit_bytes=_vmem_limit_bytes()),
        cost_estimate=pl.CostEstimate(flops=int(flops), transcendentals=0,
                                      bytes_accessed=int(bytes_acc)),
    )(*args)
    return out.reshape(N, H, W, cout_p)


def fish_block_forward(x, p):
    """x: (N,H,W,C) f32 with C == Cin or lane-padded Cin -> (N,H,W,Cout_pad)."""
    cin_p = _pad_lane(p['w1'].shape[0])
    if x.shape[-1] != cin_p:
        x = _pad_to_shape(x, x.shape[:-1] + (cin_p,))
    return _block_pallas_call(x, p)


def skip_unit_forward(x, blocks_params):
    """SkipUnit forward: sequential FishBlocks. The lane-padded activation is
    carried between blocks (padded channels stay exactly zero) and sliced to
    the logical channel count once at the end."""
    for p in blocks_params:
        x = fish_block_forward(x, p)
    return x[..., :blocks_params[-1]['w3'].shape[1]]


# --------------------------- parameter construction --------------------------

def _bn_affine(key, c):
    # Deterministic synthetic eval-mode BN: fold (gamma, beta, mean, var).
    k1, k2, k3, k4 = jax.random.split(key, 4)
    gamma = jax.random.uniform(k1, (c,), jnp.float32, 0.5, 1.5)
    beta = jax.random.uniform(k2, (c,), jnp.float32, -0.2, 0.2)
    mean = jax.random.uniform(k3, (c,), jnp.float32, -0.5, 0.5)
    var = jax.random.uniform(k4, (c,), jnp.float32, 0.5, 1.5)
    scale = gamma / jnp.sqrt(var + _BN_EPS)
    bias = beta - mean * scale
    return scale, bias


def _conv_w(key, shape, fan_in):
    w = jax.random.normal(key, shape, jnp.float32) * (1.0 / np.sqrt(fan_in))
    return w.astype(_BF16)  # weights stored / fed to the MXU in bf16


def make_block_params(key, in_ch, out_ch):
    """FishBlock(in_ch, out_ch, stride=1, dilation=1, squeeze=False)."""
    mid = out_ch // 4
    k = jax.random.split(key, 8)
    bn1_s, bn1_b = _bn_affine(k[0], in_ch)
    w1 = _conv_w(k[1], (in_ch, mid), in_ch)            # 1x1, (Cin, Cout)
    bn2_s, bn2_b = _bn_affine(k[2], mid)
    w2 = _conv_w(k[3], (3, 3, mid, mid), 9 * mid)      # 3x3, HWIO
    bn3_s, bn3_b = _bn_affine(k[4], mid)
    w3 = _conv_w(k[5], (mid, out_ch), mid)             # 1x1, (Cin, Cout)
    p = dict(bn1_s=bn1_s, bn1_b=bn1_b, w1=w1,
             bn2_s=bn2_s, bn2_b=bn2_b, w2=w2,
             bn3_s=bn3_s, bn3_b=bn3_b, w3=w3,
             bnid_s=None, bnid_b=None, w_id=None)
    if in_ch != out_ch:  # resize_identity (stride is always 1 in SkipUnit)
        bnid_s, bnid_b = _bn_affine(k[6], in_ch)
        w_id = _conv_w(k[7], (in_ch, out_ch), in_ch)
        p.update(bnid_s=bnid_s, bnid_b=bnid_b, w_id=w_id)
    return p


# ------------------------------ pure-JAX reference ----------------------------

def _ref_preact(x, s, b):
    return jnp.maximum(x * s + b, 0.0)


def _ref_conv(x, w_hwio, pad):
    return jax.lax.conv_general_dilated(
        x, w_hwio, window_strides=(1, 1), padding=pad,
        dimension_numbers=('NHWC', 'HWIO', 'NHWC'),
        precision=jax.lax.Precision.HIGHEST)


def ref_block(x, p):
    w1 = p['w1'].astype(jnp.float32)
    w2 = p['w2'].astype(jnp.float32)
    w3 = p['w3'].astype(jnp.float32)
    y = _ref_conv(_ref_preact(x, p['bn1_s'], p['bn1_b']),
                  w1.reshape(1, 1, *w1.shape), 'VALID')
    y = _ref_conv(_ref_preact(y, p['bn2_s'], p['bn2_b']), w2, ((1, 1), (1, 1)))
    if p['w_id'] is not None:
        wid = p['w_id'].astype(jnp.float32)
        iden = _ref_conv(_ref_preact(x, p['bnid_s'], p['bnid_b']),
                         wid.reshape(1, 1, *wid.shape), 'VALID')
    else:
        iden = x
    return _ref_conv(_ref_preact(y, p['bn3_s'], p['bn3_b']),
                     w3.reshape(1, 1, *w3.shape), 'VALID') + iden


# ------------------------------------ main ------------------------------------

if __name__ == "__main__":
    key = jax.random.PRNGKey(0)
    N, H, W = 2, 16, 16
    in_channels = 16
    out_channels_list = [32, 32]

    k_x, k_p = jax.random.split(key)
    # PyTorch-style NCHW input; convert once to NHWC for the kernels.
    x_nchw = jax.random.normal(k_x, (N, in_channels, H, W), jnp.float32)
    x = jnp.transpose(x_nchw, (0, 2, 3, 1))

    blocks = []
    ic = in_channels
    for bk, oc in zip(jax.random.split(k_p, len(out_channels_list)),
                      out_channels_list):
        blocks.append(make_block_params(bk, ic, oc))
        ic = oc

    out = skip_unit_forward(x, blocks)
    out = jax.block_until_ready(out)

    ref = x
    for p in blocks:
        ref = ref_block(ref, p)
    ref = jax.block_until_ready(ref)

    assert out.shape == (N, H, W, out_channels_list[-1])
    # bf16 MXU operands vs f32 HIGHEST reference; error compounds over the two
    # chained blocks, so allow a few percent.
    np.testing.assert_allclose(np.asarray(out), np.asarray(ref),
                               rtol=4e-2, atol=4e-2)
    print("KERNEL_OK")
</pallas_src>

<mosaic_0001>
module attributes {stable_mosaic.version = 11 : i64} {
  func.func @kernel(%arg0: i32, %arg1: memref<1x256x128xf32, #tpu.memory_space<vmem>>, %arg2: memref<1x128xf32, #tpu.memory_space<vmem>>, %arg3: memref<1x128xf32, #tpu.memory_space<vmem>>, %arg4: memref<128x128xbf16, #tpu.memory_space<vmem>>, %arg5: memref<1x128xf32, #tpu.memory_space<vmem>>, %arg6: memref<1x128xf32, #tpu.memory_space<vmem>>, %arg7: memref<1152x128xbf16, #tpu.memory_space<vmem>>, %arg8: memref<1x128xf32, #tpu.memory_space<vmem>>, %arg9: memref<1x128xf32, #tpu.memory_space<vmem>>, %arg10: memref<128x128xbf16, #tpu.memory_space<vmem>>, %arg11: memref<1x128xf32, #tpu.memory_space<vmem>>, %arg12: memref<1x128xf32, #tpu.memory_space<vmem>>, %arg13: memref<128x128xbf16, #tpu.memory_space<vmem>>, %arg14: memref<1x256x128xf32, #tpu.memory_space<vmem>>) attributes {dimension_semantics = [#tpu.dimension_semantics<parallel>], iteration_bounds = array<i64: 2>, scalar_prefetch = 0 : i64, scratch_operands = 0 : i64, tpu.core_type = #tpu.core_type<tc>, window_params = [{transform_indices = @transform_0, window_bounds = array<i64: 1, 256, 128>}, {pipeline_mode = #tpu.pipeline_mode<synchronous>, transform_indices = @transform_1, window_bounds = array<i64: 1, 128>}, {pipeline_mode = #tpu.pipeline_mode<synchronous>, transform_indices = @transform_2, window_bounds = array<i64: 1, 128>}, {pipeline_mode = #tpu.pipeline_mode<synchronous>, transform_indices = @transform_3, window_bounds = array<i64: 128, 128>}, {pipeline_mode = #tpu.pipeline_mode<synchronous>, transform_indices = @transform_4, window_bounds = array<i64: 1, 128>}, {pipeline_mode = #tpu.pipeline_mode<synchronous>, transform_indices = @transform_5, window_bounds = array<i64: 1, 128>}, {pipeline_mode = #tpu.pipeline_mode<synchronous>, transform_indices = @transform_6, window_bounds = array<i64: 1152, 128>}, {pipeline_mode = #tpu.pipeline_mode<synchronous>, transform_indices = @transform_7, window_bounds = array<i64: 1, 128>}, {pipeline_mode = #tpu.pipeline_mode<synchronous>, transform_indices = @transform_8, window_bounds = array<i64: 1, 128>}, {pipeline_mode = #tpu.pipeline_mode<synchronous>, transform_indices = @transform_9, window_bounds = array<i64: 128, 128>}, {pipeline_mode = #tpu.pipeline_mode<synchronous>, transform_indices = @transform_10, window_bounds = array<i64: 1, 128>}, {pipeline_mode = #tpu.pipeline_mode<synchronous>, transform_indices = @transform_11, window_bounds = array<i64: 1, 128>}, {pipeline_mode = #tpu.pipeline_mode<synchronous>, transform_indices = @transform_12, window_bounds = array<i64: 128, 128>}, {transform_indices = @transform_13, window_bounds = array<i64: 1, 256, 128>}]} {
    %c0 = arith.constant 0 : index
    %c0_0 = arith.constant 0 : index
    %c0_1 = arith.constant 0 : index
    %0 = vector.load %arg1[%c0, %c0_0, %c0_1] : memref<1x256x128xf32, #tpu.memory_space<vmem>>, vector<1x256x128xf32>
    %1 = vector.shape_cast %0 : vector<1x256x128xf32> to vector<256x128xf32>
    %c0_2 = arith.constant 0 : index
    %c0_3 = arith.constant 0 : index
    %2 = vector.load %arg2[%c0_2, %c0_3] : memref<1x128xf32, #tpu.memory_space<vmem>>, vector<1x128xf32>
    %3 = vector.broadcast %2 : vector<1x128xf32> to vector<256x128xf32>
    %4 = arith.mulf %1, %3 : vector<256x128xf32>
    %c0_4 = arith.constant 0 : index
    %c0_5 = arith.constant 0 : index
    %5 = vector.load %arg3[%c0_4, %c0_5] : memref<1x128xf32, #tpu.memory_space<vmem>>, vector<1x128xf32>
    %6 = vector.broadcast %5 : vector<1x128xf32> to vector<256x128xf32>
    %7 = arith.addf %4, %6 : vector<256x128xf32>
    %cst = arith.constant 0.000000e+00 : f32
    %8 = vector.broadcast %cst : f32 to vector<256x128xf32>
    %9 = arith.maximumf %7, %8 : vector<256x128xf32>
    %10 = arith.truncf %9 : vector<256x128xf32> to vector<256x128xbf16>
    %c0_6 = arith.constant 0 : index
    %c0_7 = arith.constant 0 : index
    %11 = vector.load %arg4[%c0_6, %c0_7] : memref<128x128xbf16, #tpu.memory_space<vmem>>, vector<128x128xbf16>
    %cst_8 = arith.constant dense<0.000000e+00> : vector<256x128xf32>
    %12 = tpu.matmul %10, %11, %cst_8 {dimension_numbers = #tpu.dot_dimension_numbers<[1], [0], [0], [1], [0, 0, 1, 1], [], []>} : vector<256x128xbf16>, vector<128x128xbf16>, vector<256x128xf32> -> vector<256x128xf32>
    %c0_9 = arith.constant 0 : index
    %c0_10 = arith.constant 0 : index
    %13 = vector.load %arg5[%c0_9, %c0_10] : memref<1x128xf32, #tpu.memory_space<vmem>>, vector<1x128xf32>
    %14 = vector.broadcast %13 : vector<1x128xf32> to vector<256x128xf32>
    %15 = arith.mulf %12, %14 : vector<256x128xf32>
    %c0_11 = arith.constant 0 : index
    %c0_12 = arith.constant 0 : index
    %16 = vector.load %arg6[%c0_11, %c0_12] : memref<1x128xf32, #tpu.memory_space<vmem>>, vector<1x128xf32>
    %17 = vector.broadcast %16 : vector<1x128xf32> to vector<256x128xf32>
    %18 = arith.addf %15, %17 : vector<256x128xf32>
    %cst_13 = arith.constant 0.000000e+00 : f32
    %19 = vector.broadcast %cst_13 : f32 to vector<256x128xf32>
    %20 = arith.maximumf %18, %19 : vector<256x128xf32>
    %21 = tpu.iota {dimensions = array<i32: 0>} : vector<256x1xi32>
    %c16_i32 = arith.constant 16 : i32
    %c0_i32 = arith.constant 0 : i32
    %22 = arith.cmpi eq, %c16_i32, %c0_i32 : i32
    %c1_i32 = arith.constant 1 : i32
    %23 = arith.select %22, %c1_i32, %c16_i32 : i32
    %24 = vector.broadcast %23 : i32 to vector<256x1xi32>
    %25 = arith.remsi %21, %24 : vector<256x1xi32>
    %c0_i32_14 = arith.constant 0 : i32
    %26 = vector.broadcast %c0_i32_14 : i32 to vector<256x1xi32>
    %27 = arith.cmpi ne, %25, %26 : vector<256x1xi32>
    %c0_i32_15 = arith.constant 0 : i32
    %28 = vector.broadcast %c0_i32_15 : i32 to vector<256x1xi32>
    %29 = arith.cmpi slt, %25, %28 : vector<256x1xi32>
    %c0_i32_16 = arith.constant 0 : i32
    %30 = arith.cmpi slt, %23, %c0_i32_16 : i32
    %31 = vector.broadcast %30 : i1 to vector<256x1xi1>
    %32 = vector.broadcast %31 : vector<256x1xi1> to vector<256x1xi1>
    %33 = arith.xori %29, %32 : vector<256x1xi1>
    %34 = arith.andi %33, %27 : vector<256x1xi1>
    %35 = vector.broadcast %23 : i32 to vector<256x1xi32>
    %36 = arith.addi %25, %35 : vector<256x1xi32>
    %37 = arith.select %34, %36, %25 : vector<256x1xi1>, vector<256x1xi32>
    %c16_i32_17 = arith.constant 16 : i32
    %38 = vector.broadcast %c16_i32_17 : i32 to vector<256x1xi32>
    %39 = arith.cmpi sge, %21, %38 : vector<256x1xi32>
    %40 = arith.extui %39 : vector<256x1xi1> to vector<256x1xi32>
    %41 = arith.sitofp %40 : vector<256x1xi32> to vector<256x1xf32>
    %c240_i32 = arith.constant 240 : i32
    %42 = vector.broadcast %c240_i32 : i32 to vector<256x1xi32>
    %43 = arith.cmpi slt, %21, %42 : vector<256x1xi32>
    %44 = arith.extui %43 : vector<256x1xi1> to vector<256x1xi32>
    %45 = arith.sitofp %44 : vector<256x1xi32> to vector<256x1xf32>
    %c1_i32_18 = arith.constant 1 : i32
    %46 = vector.broadcast %c1_i32_18 : i32 to vector<256x1xi32>
    %47 = arith.cmpi sge, %37, %46 : vector<256x1xi32>
    %48 = arith.extui %47 : vector<256x1xi1> to vector<256x1xi32>
    %49 = arith.sitofp %48 : vector<256x1xi32> to vector<256x1xf32>
    %c15_i32 = arith.constant 15 : i32
    %50 = vector.broadcast %c15_i32 : i32 to vector<256x1xi32>
    %51 = arith.cmpi slt, %37, %50 : vector<256x1xi32>
    %52 = arith.extui %51 : vector<256x1xi1> to vector<256x1xi32>
    %53 = arith.sitofp %52 : vector<256x1xi32> to vector<256x1xf32>
    %c17_i32 = arith.constant 17 : i32
    %54 = tpu.dynamic_rotate %20 by %c17_i32 dim 0 : vector<256x128xf32>, i32 -> vector<256x128xf32>
    %55 = arith.mulf %41, %49 : vector<256x1xf32>
    %56 = vector.broadcast %55 : vector<256x1xf32> to vector<256x128xf32>
    %57 = arith.mulf %54, %56 : vector<256x128xf32>
    %58 = arith.truncf %57 : vector<256x128xf32> to vector<256x128xbf16>
    %c16_i32_19 = arith.constant 16 : i32
    %59 = tpu.dynamic_rotate %20 by %c16_i32_19 dim 0 : vector<256x128xf32>, i32 -> vector<256x128xf32>
    %60 = vector.broadcast %41 : vector<256x1xf32> to vector<256x128xf32>
    %61 = arith.mulf %59, %60 : vector<256x128xf32>
    %62 = arith.truncf %61 : vector<256x128xf32> to vector<256x128xbf16>
    %c15_i32_20 = arith.constant 15 : i32
    %63 = tpu.dynamic_rotate %20 by %c15_i32_20 dim 0 : vector<256x128xf32>, i32 -> vector<256x128xf32>
    %64 = arith.mulf %41, %53 : vector<256x1xf32>
    %65 = vector.broadcast %64 : vector<256x1xf32> to vector<256x128xf32>
    %66 = arith.mulf %63, %65 : vector<256x128xf32>
    %67 = arith.truncf %66 : vector<256x128xf32> to vector<256x128xbf16>
    %c1_i32_21 = arith.constant 1 : i32
    %68 = tpu.dynamic_rotate %20 by %c1_i32_21 dim 0 : vector<256x128xf32>, i32 -> vector<256x128xf32>
    %69 = vector.broadcast %49 : vector<256x1xf32> to vector<256x128xf32>
    %70 = arith.mulf %68, %69 : vector<256x128xf32>
    %71 = arith.truncf %70 : vector<256x128xf32> to vector<256x128xbf16>
    %72 = arith.truncf %20 : vector<256x128xf32> to vector<256x128xbf16>
    %c255_i32 = arith.constant 255 : i32
    %73 = tpu.dynamic_rotate %20 by %c255_i32 dim 0 : vector<256x128xf32>, i32 -> vector<256x128xf32>
    %74 = vector.broadcast %53 : vector<256x1xf32> to vector<256x128xf32>
    %75 = arith.mulf %73, %74 : vector<256x128xf32>
    %76 = arith.truncf %75 : vector<256x128xf32> to vector<256x128xbf16>
    %c241_i32 = arith.constant 241 : i32
    %77 = tpu.dynamic_rotate %20 by %c241_i32 dim 0 : vector<256x128xf32>, i32 -> vector<256x128xf32>
    %78 = arith.mulf %45, %49 : vector<256x1xf32>
    %79 = vector.broadcast %78 : vector<256x1xf32> to vector<256x128xf32>
    %80 = arith.mulf %77, %79 : vector<256x128xf32>
    %81 = arith.truncf %80 : vector<256x128xf32> to vector<256x128xbf16>
    %c240_i32_22 = arith.constant 240 : i32
    %82 = tpu.dynamic_rotate %20 by %c240_i32_22 dim 0 : vector<256x128xf32>, i32 -> vector<256x128xf32>
    %83 = vector.broadcast %45 : vector<256x1xf32> to vector<256x128xf32>
    %84 = arith.mulf %82, %83 : vector<256x128xf32>
    %85 = arith.truncf %84 : vector<256x128xf32> to vector<256x128xbf16>
    %c239_i32 = arith.constant 239 : i32
    %86 = tpu.dynamic_rotate %20 by %c239_i32 dim 0 : vector<256x128xf32>, i32 -> vector<256x128xf32>
    %87 = arith.mulf %45, %53 : vector<256x1xf32>
    %88 = vector.broadcast %87 : vector<256x1xf32> to vector<256x128xf32>
    %89 = arith.mulf %86, %88 : vector<256x128xf32>
    %90 = arith.truncf %89 : vector<256x128xf32> to vector<256x128xbf16>
    %91 = tpu.concatenate %58, %62, %67, %71, %72, %76, %81, %85, %90 in 1 : vector<256x128xbf16>, vector<256x128xbf16>, vector<256x128xbf16>, vector<256x128xbf16>, vector<256x128xbf16>, vector<256x128xbf16>, vector<256x128xbf16>, vector<256x128xbf16>, vector<256x128xbf16> -> vector<256x1152xbf16>
    %c0_23 = arith.constant 0 : index
    %c0_24 = arith.constant 0 : index
    %92 = vector.load %arg7[%c0_23, %c0_24] : memref<1152x128xbf16, #tpu.memory_space<vmem>>, vector<1152x128xbf16>
    %cst_25 = arith.constant dense<0.000000e+00> : vector<256x128xf32>
    %93 = tpu.matmul %91, %92, %cst_25 {dimension_numbers = #tpu.dot_dimension_numbers<[1], [0], [0], [1], [0, 0, 1, 1], [], []>} : vector<256x1152xbf16>, vector<1152x128xbf16>, vector<256x128xf32> -> vector<256x128xf32>
    %c0_26 = arith.constant 0 : index
    %c0_27 = arith.constant 0 : index
    %94 = vector.load %arg8[%c0_26, %c0_27] : memref<1x128xf32, #tpu.memory_space<vmem>>, vector<1x128xf32>
    %95 = vector.broadcast %94 : vector<1x128xf32> to vector<256x128xf32>
    %96 = arith.mulf %93, %95 : vector<256x128xf32>
    %c0_28 = arith.constant 0 : index
    %c0_29 = arith.constant 0 : index
    %97 = vector.load %arg9[%c0_28, %c0_29] : memref<1x128xf32, #tpu.memory_space<vmem>>, vector<1x128xf32>
    %98 = vector.broadcast %97 : vector<1x128xf32> to vector<256x128xf32>
    %99 = arith.addf %96, %98 : vector<256x128xf32>
    %cst_30 = arith.constant 0.000000e+00 : f32
    %100 = vector.broadcast %cst_30 : f32 to vector<256x128xf32>
    %101 = arith.maximumf %99, %100 : vector<256x128xf32>
    %c0_31 = arith.constant 0 : index
    %c0_32 = arith.constant 0 : index
    %102 = vector.load %arg11[%c0_31, %c0_32] : memref<1x128xf32, #tpu.memory_space<vmem>>, vector<1x128xf32>
    %103 = vector.broadcast %102 : vector<1x128xf32> to vector<256x128xf32>
    %104 = arith.mulf %1, %103 : vector<256x128xf32>
    %c0_33 = arith.constant 0 : index
    %c0_34 = arith.constant 0 : index
    %105 = vector.load %arg12[%c0_33, %c0_34] : memref<1x128xf32, #tpu.memory_space<vmem>>, vector<1x128xf32>
    %106 = vector.broadcast %105 : vector<1x128xf32> to vector<256x128xf32>
    %107 = arith.addf %104, %106 : vector<256x128xf32>
    %cst_35 = arith.constant 0.000000e+00 : f32
    %108 = vector.broadcast %cst_35 : f32 to vector<256x128xf32>
    %109 = arith.maximumf %107, %108 : vector<256x128xf32>
    %110 = arith.truncf %109 : vector<256x128xf32> to vector<256x128xbf16>
    %c0_36 = arith.constant 0 : index
    %c0_37 = arith.constant 0 : index
    %111 = vector.load %arg13[%c0_36, %c0_37] : memref<128x128xbf16, #tpu.memory_space<vmem>>, vector<128x128xbf16>
    %cst_38 = arith.constant dense<0.000000e+00> : vector<256x128xf32>
    %112 = tpu.matmul %110, %111, %cst_38 {dimension_numbers = #tpu.dot_dimension_numbers<[1], [0], [0], [1], [0, 0, 1, 1], [], []>} : vector<256x128xbf16>, vector<128x128xbf16>, vector<256x128xf32> -> vector<256x128xf32>
    %113 = arith.truncf %101 : vector<256x128xf32> to vector<256x128xbf16>
    %c0_39 = arith.constant 0 : index
    %c0_40 = arith.constant 0 : index
    %114 = vector.load %arg10[%c0_39, %c0_40] : memref<128x128xbf16, #tpu.memory_space<vmem>>, vector<128x128xbf16>
    %cst_41 = arith.constant dense<0.000000e+00> : vector<256x128xf32>
    %115 = tpu.matmul %113, %114, %cst_41 {dimension_numbers = #tpu.dot_dimension_numbers<[1], [0], [0], [1], [0, 0, 1, 1], [], []>} : vector<256x128xbf16>, vector<128x128xbf16>, vector<256x128xf32> -> vector<256x128xf32>
    %116 = arith.addf %115, %112 : vector<256x128xf32>
    %c0_42 = arith.constant 0 : index
    %c0_43 = arith.constant 0 : index
    %c0_44 = arith.constant 0 : index
    %117 = vector.load %arg14[%c0_42, %c0_43, %c0_44] : memref<1x256x128xf32, #tpu.memory_space<vmem>>, vector<1x256x128xf32>
    %118 = vector.shape_cast %117 : vector<1x256x128xf32> to vector<256x128xf32>
    %119 = vector.shape_cast %116 : vector<256x128xf32> to vector<1x256x128xf32>
    tpu.vector_store %arg14[%c0_42, %c0_43, %c0_44], %119 {strides = array<i32>} : memref<1x256x128xf32, #tpu.memory_space<vmem>>, vector<1x256x128xf32>,
    return
  }
  func.func @transform_0(%arg0: i32) -> (i32, i32, i32) {
    %c0_i32 = arith.constant 0 : i32
    %c0_i32_0 = arith.constant 0 : i32
    %c0_i32_1 = arith.constant 0 : i32
    return %arg0, %c0_i32, %c0_i32_0 : i32, i32, i32
  }
  func.func @transform_1(%arg0: i32) -> (i32, i32) {
    %c0_i32 = arith.constant 0 : i32
    %c0_i32_0 = arith.constant 0 : i32
    %c0_i32_1 = arith.constant 0 : i32
    return %c0_i32, %c0_i32_0 : i32, i32
  }
  func.func @transform_2(%arg0: i32) -> (i32, i32) {
    %c0_i32 = arith.constant 0 : i32
    %c0_i32_0 = arith.constant 0 : i32
    %c0_i32_1 = arith.constant 0 : i32
    return %c0_i32, %c0_i32_0 : i32, i32
  }
  func.func @transform_3(%arg0: i32) -> (i32, i32) {
    %c0_i32 = arith.constant 0 : i32
    %c0_i32_0 = arith.constant 0 : i32
    %c0_i32_1 = arith.constant 0 : i32
    return %c0_i32, %c0_i32_0 : i32, i32
  }
  func.func @transform_4(%arg0: i32) -> (i32, i32) {
    %c0_i32 = arith.constant 0 : i32
    %c0_i32_0 = arith.constant 0 : i32
    %c0_i32_1 = arith.constant 0 : i32
    return %c0_i32, %c0_i32_0 : i32, i32
  }
  func.func @transform_5(%arg0: i32) -> (i32, i32) {
    %c0_i32 = arith.constant 0 : i32
    %c0_i32_0 = arith.constant 0 : i32
    %c0_i32_1 = arith.constant 0 : i32
    return %c0_i32, %c0_i32_0 : i32, i32
  }
  func.func @transform_6(%arg0: i32) -> (i32, i32) {
    %c0_i32 = arith.constant 0 : i32
    %c0_i32_0 = arith.constant 0 : i32
    %c0_i32_1 = arith.constant 0 : i32
    return %c0_i32, %c0_i32_0 : i32, i32
  }
  func.func @transform_7(%arg0: i32) -> (i32, i32) {
    %c0_i32 = arith.constant 0 : i32
    %c0_i32_0 = arith.constant 0 : i32
    %c0_i32_1 = arith.constant 0 : i32
    return %c0_i32, %c0_i32_0 : i32, i32
  }
  func.func @transform_8(%arg0: i32) -> (i32, i32) {
    %c0_i32 = arith.constant 0 : i32
    %c0_i32_0 = arith.constant 0 : i32
    %c0_i32_1 = arith.constant 0 : i32
    return %c0_i32, %c0_i32_0 : i32, i32
  }
  func.func @transform_9(%arg0: i32) -> (i32, i32) {
    %c0_i32 = arith.constant 0 : i32
    %c0_i32_0 = arith.constant 0 : i32
    %c0_i32_1 = arith.constant 0 : i32
    return %c0_i32, %c0_i32_0 : i32, i32
  }
  func.func @transform_10(%arg0: i32) -> (i32, i32) {
    %c0_i32 = arith.constant 0 : i32
    %c0_i32_0 = arith.constant 0 : i32
    %c0_i32_1 = arith.constant 0 : i32
    return %c0_i32, %c0_i32_0 : i32, i32
  }
  func.func @transform_11(%arg0: i32) -> (i32, i32) {
    %c0_i32 = arith.constant 0 : i32
    %c0_i32_0 = arith.constant 0 : i32
    %c0_i32_1 = arith.constant 0 : i32
    return %c0_i32, %c0_i32_0 : i32, i32
  }
  func.func @transform_12(%arg0: i32) -> (i32, i32) {
    %c0_i32 = arith.constant 0 : i32
    %c0_i32_0 = arith.constant 0 : i32
    %c0_i32_1 = arith.constant 0 : i32
    return %c0_i32, %c0_i32_0 : i32, i32
  }
  func.func @transform_13(%arg0: i32) -> (i32, i32, i32) {
    %c0_i32 = arith.constant 0 : i32
    %c0_i32_0 = arith.constant 0 : i32
    %c0_i32_1 = arith.constant 0 : i32
    return %arg0, %c0_i32, %c0_i32_0 : i32, i32, i32
  }
}

</mosaic_0001>

<bundles_post_ra>
// kernel: tpu_custom_call.1
= control target key start
LH: loop header
LB: loop body
LE: loop exit
PB: predicated region body
PF: predicated region fallthrough
CT: control target
= control target key end

     0   :  { %s8856_s0 = inlined_call_operand.hbm [shape: f32[2,256,128], index: 0, kind: input, shape index: {}]   ;;  %s8857_s1 = inlined_call_operand.vmem [shape: f32[1,128], index: 1, kind: input, shape index: {}]   ;;  %s8858_s2 = inlined_call_operand.vmem [shape: f32[1,128], index: 2, kind: input, shape index: {}]   ;;  %s8859_s3 = inlined_call_operand.hbm [shape: bf16[128,128], index: 3, kind: input, shape index: {}]   ;;  %s8860_s4 = inlined_call_operand.vmem [shape: f32[1,128], index: 4, kind: input, shape index: {}]   ;;  %s8861_s5 = inlined_call_operand.vmem [shape: f32[1,128], index: 5, kind: input, shape index: {}]   ;;  %s8862_s6 = inlined_call_operand.hbm [shape: bf16[1152,128], index: 6, kind: input, shape index: {}]   ;;  %s8863_s7 = inlined_call_operand.vmem [shape: f32[1,128], index: 7, kind: input, shape index: {}]   ;;  %s8864_s8 = inlined_call_operand.vmem [shape: f32[1,128], index: 8, kind: input, shape index: {}]   ;;  %s8865_s9 = inlined_call_operand.hbm [shape: bf16[128,128], index: 9, kind: input, shape index: {}]   ;;  %s8866_s10 = inlined_call_operand.vmem [shape: f32[1,128], index: 10, kind: input, shape index: {}]   ;;  %s8867_s11 = inlined_call_operand.vmem [shape: f32[1,128], index: 11, kind: input, shape index: {}]   ;;  %s8868_s12 = inlined_call_operand.hbm [shape: bf16[128,128], index: 12, kind: input, shape index: {}]   ;;  %s8869_s13 = inlined_call_operand.hbm [shape: f32[2,256,128], index: 13, kind: output, shape index: {}]  }
   0x1   :  { %9069 = sst [smem:[#allocation133_spill]] %s8859_s3 }
   0x2   :  { %9070 = sst [smem:[#allocation134_spill]] %s8862_s6 }
   0x3   :  { %9071 = sst [smem:[#allocation135_spill]] %s8865_s9 }
   0x4   :  { %9072 = sst [smem:[#allocation136_spill]] %s8868_s12 }
   0x5   :  { %18 = vsyncpa [#allocation3], 0 }
   0x6   :  { %20 = vsyncpa [#allocation3 + $0x1], 0 }
   0x7   :  { %21 = vsyncpa [#allocation6], 0 }
   0x8   :  { %22 = vsyncpa [#allocation9], 0 }
   0x9   :  { %23 = vsyncpa [#allocation4], 0 }
   0xa   :  { %25 = vsyncpa [#allocation4 + $0x1], 0  ;;  %s6117_s25 = smov 0   ;;  %s6119_s26 = smov 0  }
   0xb   :  { %s6121_s27 = smov 0   ;;  %s6123_s28 = smov 0  }
   0xc LB: > { %9073 = sst [smem:[#allocation16_spill]] %s6020_s25  ;;  %s6138_s29 = sadd.s32 4294967295, %s6032_s28   ;;  %s6032_s28 = sphi %s6123_s28, %s9684_s28   ;;  %s6028_s27 = sphi %s6121_s27, %s9683_s27   ;;  %s6024_s26 = sphi %s6119_s26, %s9682_s26   ;;  %s6020_s25 = sphi %s6117_s25, %s9681_s25  }
   0xd   : > { %s4710_s30 = sadd.s32 4294967294, %s6032_s28   ;;  %p51_p0 = scmp.ne.s32.totalorder %s6024_s26, %s6020_s25 }
   0xe   : > { %p8872_p1 = scmp.eq.s32.totalorder %s6138_s29, 0  ;;  %p327_p2 = scmp.eq.s32.totalorder %s6138_s29, 1 }
   0xf   : > { %p333_p3 = scmp.eq.s32.totalorder %s4710_s30, 1  ;;  %p4711_p5 = scmp.ge.s32.totalorder %s6032_s28, 1 }
  0x10   : > { %p6147_p4 = por %p8872_p1, %p51_p0  ;;  %p340_p7 = scmp.lt.s32.totalorder %s6032_s28, 3 }
  0x11   : > { %p6152_p6 = por %p333_p3, %p51_p0  ;;  %s6034_s17 = smov [#allocation5]  }
  0x12   : > { %s9074_s14 = scalar_select %p6147_p4, 1, 0 }
  0x13   : > { %s9075_s15 = scalar_select %p6152_p6, 1, 0 }
  0x14   : > { %p6157_p8 = pnand %p4711_p5, %p340_p7  ;;  %s358_s18 = sshll.u32 %s6034_s17, 4  ;;  %s359_s18 = int_to_ptr.vmem [resolvable:$true] %s358_s18 }
  0x15   : > { %9076 = sst [smem:[#allocation17_spill]] %s9075_s15  ;;  %s6035_s20 = smov [#allocation8]  }
  0x16   : > { %s9077_s16 = scalar_select %p6157_p8, 1, 0 }
  0x17   : > { %p5626_p9 = pneg %p6157_p8  ;;  %s396_s21 = sshll.u32 %s6035_s20, 4  ;;  %s397_s21 = int_to_ptr.vmem [resolvable:$true] %s396_s21 }
  0x18   : > { %s6036_s22 = smov [#allocation7]   ;;  %s5839_s24 = scalar_lea.vmem %s359_s18, 1024 }
  0x19   : > { %p6166_p11 = pnand %p5626_p9, %p8872_p1  ;;  %s377_s23 = sshll.u32 %s6036_s22, 4  ;;  %s378_s23 = int_to_ptr.vmem [resolvable:$true] %s377_s23 }
  0x1a   : > { %p5840_p13 = scmp.ne.s32.totalorder %s359_s18, %s5839_s24  ;;  %p5847_p5 = scmp.lt.s32.totalorder %s359_s18, %s359_s18 }
  0x1b   : > { %p5830_p12 = pneg %p6166_p11  ;;  %p5848_p7 = scmp.lt.s32.totalorder %s5839_s24, %s5839_s24 }
  0x1d   : > { %p5842_p0 = pnand %p5840_p13, %p5830_p12  ;;  %p5849_p9 = por %p5848_p7, %p5847_p5 }
  0x1f   : > { %p5843_p3 = pneg %p5842_p0 }
  0x21   : > { %p5850_p10 = pnand %p5849_p9, %p5843_p3 }
  0x23   : > { %5853 = shalt.err (!%p5850_p10)
}
  0x24   : > { %s6037_s30 = smov 64   ;;  %s6038_s17 = smov 4  }
  0x25   : > { %s9079_s3 = sld [smem:[#allocation133_spill]]  ;;  %s5865_s15 = scalar_lea.vmem %s397_s21, 1024 }
  0x26   : > { %p5866_p13 = scmp.ne.s32.totalorder %s397_s21, %s5865_s15  ;;  %p5873_p3 = scmp.lt.s32.totalorder %s397_s21, %s397_s21 }
  0x27   : > { %p5874_p10 = scmp.lt.s32.totalorder %s5865_s15, %s5865_s15 }
  0x28   : > { %p5868_p0 = pnand %p5866_p13, %p5830_p12 }
  0x29   : > { %p5875_p7 = por %p5874_p10, %p5873_p3 }
  0x2a   : > { %p5869_p5 = pneg %p5868_p0 }
  0x2b   : > { %5629 = dma.hbm_to_vmem [thread:$0]  (!%p6166_p11), %s9079_s3, 1024, %s359_s18, [#allocation6], %s6037_s30, %s6037_s30, %s6038_s17  }
  0x2c   : > { %p5876_p9 = pnand %p5875_p7, %p5869_p5 }
  0x2e   : > { %5879 = shalt.err (!%p5876_p9)
}
  0x2f   : > { %s9080_s9 = sld [smem:[#allocation135_spill]]  ;;  %s5891_s18 = scalar_lea.vmem %s378_s23, 9216 }
  0x30   : > { %p5892_p1 = scmp.ne.s32.totalorder %s378_s23, %s5891_s18  ;;  %p5899_p3 = scmp.lt.s32.totalorder %s378_s23, %s378_s23 }
  0x31   : > { %p5900_p5 = scmp.lt.s32.totalorder %s5891_s18, %s5891_s18 }
  0x32   : > { %p5894_p13 = pnand %p5892_p1, %p5830_p12 }
  0x33   : > { %p5901_p10 = por %p5900_p5, %p5899_p3 }
  0x34   : > { %p5895_p0 = pneg %p5894_p13 }
  0x35   : > { %5635 = dma.hbm_to_vmem [thread:$0]  (!%p6166_p11), %s9080_s9, 1024, %s397_s21, [#allocation9], %s6037_s30, %s6037_s30, %s6038_s17  }
  0x36   : > { %p5902_p7 = pnand %p5901_p10, %p5895_p0 }
  0x38   : > { %5905 = shalt.err (!%p5902_p7)
}
  0x39   : > { %s9081_s6 = sld [smem:[#allocation134_spill]]  ;;  %s6039_s21 = smov [#allocation10]  }
  0x3a   : > { %s415_s20 = sshll.u32 %s6039_s21, 4  ;;  %s416_s20 = int_to_ptr.vmem [resolvable:$true] %s415_s20 }
  0x3b   : > { %s5917_s22 = scalar_lea.vmem %s416_s20, 1024  ;;  %p5925_p0 = scmp.lt.s32.totalorder %s416_s20, %s416_s20 }
  0x3c   : > { %p5918_p1 = scmp.ne.s32.totalorder %s416_s20, %s5917_s22  ;;  %p5926_p3 = scmp.lt.s32.totalorder %s5917_s22, %s5917_s22 }
  0x3e   : > { %p5920_p9 = pnand %p5918_p1, %p5830_p12  ;;  %p5927_p5 = por %p5926_p3, %p5925_p0 }
  0x3f   : > { %5632 = dma.hbm_to_vmem [thread:$0]  (!%p6166_p11), %s9081_s6, 9216, %s378_s23, [#allocation6], %s6037_s30, %s6037_s30, %s6038_s17  }
  0x40   : > { %p5921_p13 = pneg %p5920_p9 }
  0x42   : > { %p5928_p10 = pnand %p5927_p5, %p5921_p13 }
  0x44   : > { %5931 = shalt.err (!%p5928_p10)
}
  0x45   : > { %s9082_s12 = sld [smem:[#allocation136_spill]]  ;;  %s6217_s18 = sadd.s32 1, %s6032_s28  }
  0x46   : > { %s38_s19 = sadd.s32 1, %s6028_s27  ;;  %s35_s25 = ssub.s32 %s6032_s28, %s6217_s18 }
  0x47   : > { %p45_p12 = scmp.ne.s32.totalorder %s6028_s27, %s6024_s26  ;;  %p36_p7 = scmp.eq.s32.totalorder %s35_s25, 0 }
  0x48   : > { %p46_p1 = scmp.eq.s32.totalorder %s6032_s28, 0  ;;  %p5651_p13 = scmp.lt.s32.totalorder %s6032_s28, 2 }
  0x49   : > { %p6227_p9 = por %p327_p2, %p45_p12  ;;  %s429_s22 = sand.u32 1, %s6028_s27  }
  0x4a   : > { %s6233_s21 = scalar_select %p36_p7, %s6028_s27, %s38_s19  }
  0x4b   : > { %5638 = dma.hbm_to_vmem [thread:$0]  (!%p6166_p11), %s9082_s12, 1024, %s416_s20, [#allocation9], %s6037_s30, %s6037_s30, %s6038_s17  }
  0x4c   : > { %s9083_s15 = scalar_select %p6227_p9, 1, 0 }
  0x4d   : > { %9084 = sst [smem:[#allocation18_spill]] %s6233_s21  ;;  %p47_p0 = por %p46_p1, %p45_p12 }
  0x4e   : > { %s4717_s23 = sshll.u32 %s429_s22, 8  ;;  %s4868_s30 = sshll.u32 %s6032_s28, 12 }
  0x4f   : > { %s6240_s24 = scalar_lea.hbm %s8856_s0, %s4868_s30  ;;  %s433_s25 = scalar_lea.vmem [#allocation2], %s4717_s23 }
  0x50   : > { %s440_s3 = sshll.u32 %s433_s25, 4  ;;  %p6244_p2 = pnand %p5651_p13, %p47_p0  ;;  %s6242_s3 = int_to_ptr.vmem [resolvable:$true] %s440_s3 }
  0x51   : > { %s6248_s19 = scalar_lea.sflag [#allocation3], %s429_s22  ;;  %s5932_s9 = scalar_lea.hbm %s6240_s24, 4096 }
  0x52   : > { %p5933_p11 = scmp.ne.s32.totalorder %s6240_s24, %s5932_s9  ;;  %p5934_p3 = pneg %p6244_p2 }
  0x53   : > { %s5937_s23 = scalar_lea.hbm %s8856_s0, 8192  ;;  %p5938_p12 = scmp.lt.s32.totalorder %s6240_s24, %s8856_s0 }
  0x54   : > { %p5935_p5 = pnand %p5934_p3, %p5933_p11  ;;  %p5939_p7 = scmp.lt.s32.totalorder %s5937_s23, %s5932_s9 }
  0x56   : > { %p5936_p10 = pneg %p5935_p5  ;;  %p5940_p1 = por %p5939_p7, %p5938_p12 }
  0x58   : > { %p5941_p13 = pnand %p5940_p1, %p5936_p10 }
  0x5a   : > { %5944 = shalt.err (!%p5941_p13)
}
  0x5b   : > { %s5945_s22 = scalar_lea.vmem %s6242_s3, 4096  ;;  %s6040_s12 = smov [#allocation2]  }
  0x5c   : > { %p5946_p0 = scmp.ne.s32.totalorder %s6242_s3, %s5945_s22  ;;  %s5950_s21 = sshll.u32 %s6040_s12, 4  ;;  %s5951_s21 = int_to_ptr.vmem [resolvable:$false] %s5950_s21 }
  0x5d   : > { %s5952_s30 = scalar_lea.vmem %s5951_s21, 8192  ;;  %p5953_p5 = scmp.lt.s32.totalorder %s6242_s3, %s5951_s21 }
  0x5e   : > { %p5948_p6 = pnand %p5946_p0, %p5934_p3  ;;  %p5954_p9 = scmp.lt.s32.totalorder %s5952_s30, %s5945_s22 }
  0x60   : > { %p5949_p11 = pneg %p5948_p6  ;;  %p5955_p4 = por %p5954_p9, %p5953_p5 }
  0x62   : > { %p5956_p8 = pnand %p5955_p4, %p5949_p11 }
  0x64   : > { %5959 = shalt.err (!%p5956_p8)
}
  0x65   : > { %s6041_s9 = smov 128   ;;  %s6042_s17 = smov 8  }
  0x66   : > { %5642 = dma.hbm_to_vmem [thread:$0]  (!%p6244_p2), %s6240_s24, 4096, %s6242_s3, %s6248_s19, %s6041_s9, %s6041_s9, %s6042_s17  }
  0x67   : > { %p9086_p3 = scmp.ne.s32.totalorder %s9077_s16, 0 }
  0x69   : > { %452 = sbr.rel (%p9086_p3) target bundleno = 1176 (0x498), region = 72 }
  0x6e   : > { %s6272_s12 = sand.u32 1, %s6024_s26   ;;  %p9087_p4 = scmp.ne.s32.totalorder %s9074_s14, 0 }
  0x6f   : > { %s4721_s21 = sshll.u32 %s6272_s12, 8  ;;  %s455_s23 = scalar_lea.sflag [#allocation3], %s6272_s12 }
  0x70   : > { %s6278_s20 = scalar_lea.vmem [#allocation2], %s4721_s21 }
  0x71   : > { %6003 = dma.done.wait (%p9087_p4), %s455_s23, 4096  }
  0x72   : > { %6005 = vsyncadd (%p9087_p4), %s455_s23, 4294963200  ;;  %p9088_p6 = scmp.eq.s32.totalorder %s6138_s29, 0 }
  0x74   : > { %6007 = dma.done.wait (%p9088_p6), [#allocation6], 10240   ;;  %p9089_p8 = pmov %p9088_p6 }
  0x75   : > { %p9090_p9 = pmov %p9088_p6 }
  0x76   : > { %6009 = vsyncadd (%p9089_p8), [#allocation6], 4294957056 }
  0x77   : > { %6011 = dma.done.wait (%p9090_p9), [#allocation9], 2048   ;;  %p9091_p2 = pmov %p9088_p6 }
  0x78   : > { %v5700_v0 = vld [vmem:[#allocation5 + $0x38] sm:$0xff]   ;;  %v5701_v1 = vld [vmem:[#allocation5 + $0x30] sm:$0xff]   ;;  %v5702_v2 = vld [vmem:[#allocation5 + $0x28] sm:$0xff]   ;;  %s8772_s22 = scalar_lea.vmem [#allocation11], %s4721_s21  ;;  %s4869_s21 = sshll.u32 %s6138_s29, 12 }
  0x79   : > { %6013 = vsyncadd (%p9091_p2), [#allocation9], 4294965248  ;;  %5414 = vmatprep.subr.bf16.mxu0 %v5700_v0  ;;  %v5703_v3 = vld [vmem:[#allocation5 + $0x20] sm:$0xff]   ;;  %v519_v5 = vld [vmem:[%s6278_s20 + $0x8] sm:$0xff]  ;;  %s4599_s30 = sshll.u32 %s8772_s22, 4  ;;  %s8809_s23 = scalar_lea.hbm %s8869_s13, %s4869_s21  ;;  %s8811_s30 = int_to_ptr.vmem [resolvable:$true] %s4599_s30 }
  0x7a   : > { %5415 = vmatpush3.bf16.msra.mxu0 %v5700_v0  ;;  %v518_v4 = vld [vmem:[%s6278_s20] sm:$0xff]  ;;  %v520_v11 = vld [vmem:[%s6278_s20 + $0x10] sm:$0xff]  ;;  %v521_v12 = vld [vmem:[%s6278_s20 + $0x18] sm:$0xff]  ;;  %s4586_s29 = scalar_lea.sflag [#allocation4], %s6272_s12  ;;  %s5960_s3 = scalar_lea.vmem %s8811_s30, 4096 }
  0x7b   : > { %5416 = vmatprep.subr.bf16.mxu0 %v5701_v1  ;;  %v6297_v6 = vld [vmem:[%s8857_s1] ss:$0 sm:$0xff]  ;;  %v523_v20 = vld [vmem:[%s6278_s20 + $0x28] sm:$0xff]  ;;  %v5704_v21 = vld [vmem:[#allocation5 + $0x18] sm:$0xff]   ;;  %p5961_p10 = scmp.ne.s32.totalorder %s8811_s30, %s5960_s3  ;;  %p9675_p12 = scmp.ne.s32.totalorder %s9083_s15, 0 }
  0x7c   : > { %v557_v7 = vmul.f32 %v6297_v6, %v518_v4  ;;  %v558_v8 = vmul.f32 %v6297_v6, %v519_v5  ;;  %v6304_v9 = vld [vmem:[%s8858_s2] ss:$0 sm:$0xff]  ;;  %v559_v18 = vmul.f32 %v6297_v6, %v520_v11  ;;  %v560_v22 = vmul.f32 %v6297_v6, %v521_v12  ;;  %v524_v25 = vld [vmem:[%s6278_s20 + $0x30] sm:$0xff]  ;;  %v525_v29 = vld [vmem:[%s6278_s20 + $0x38] sm:$0xff]  ;;  %s6044_s6 = smov [#allocation11]  }
  0x7d   : > { %v4845_v10 = vld [vmem:[%s8866_s10] ss:$0 sm:$0xff]  ;;  %v562_v31 = vmul.f32 %v6297_v6, %v523_v20  ;;  %v563_v35 = vmul.f32 %v6297_v6, %v524_v25  ;;  %v527_v37 = vld [vmem:[%s6278_s20 + $0x48] sm:$0xff]  ;;  %v5705_v38 = vld [vmem:[#allocation5 + $0x10] sm:$0xff]   ;;  %v564_v41 = vmul.f32 %v6297_v6, %v525_v29  ;;  %p5962_p7 = pnand %p5961_p10, %p9675_p12  ;;  %s5964_s14 = sshll.u32 %s6044_s6, 4  ;;  %s5965_s14 = int_to_ptr.vmem [resolvable:$false] %s5964_s14 }
  0x7e   : > { %5417 = vmatpush3.bf16.msra.mxu0 %v5701_v1  ;;  %v3970_v13 = vmul.f32 %v4845_v10, %v520_v11  ;;  %v4846_v14 = vld [vmem:[%s8867_s11] ss:$0 sm:$0xff]  ;;  %v596_v16 = vadd.f32 %v6304_v9, %v557_v7  ;;  %v597_v17 = vadd.f32 %v6304_v9, %v558_v8  ;;  %v3971_v19 = vmul.f32 %v4845_v10, %v521_v12  ;;  %v528_v42 = vld [vmem:[%s6278_s20 + $0x50] sm:$0xff]  ;;  %v529_v44 = vld [vmem:[%s6278_s20 + $0x58] sm:$0xff]  ;;  %s5966_s16 = scalar_lea.vmem %s5965_s14, 8192  ;;  %p5967_p13 = scmp.lt.s32.totalorder %s8811_s30, %s5965_s14 }
  0x7f   : > { %5418 = vmatprep.subr.bf16.mxu0 %v5702_v2  ;;  %v522_v15 = vld [vmem:[%s6278_s20 + $0x20] sm:$0xff]  ;;  %v6325_v33 = vadd.f32 %v6304_v9, %v559_v18  ;;  %v599_v39 = vadd.f32 %v6304_v9, %v560_v22  ;;  %v5706_v45 = vld [vmem:[#allocation5 + $0x8] sm:$0xff]   ;;  %v6340_v46 = vadd.f32 %v6304_v9, %v562_v31  ;;  %v6343_v47 = vadd.f32 %v6304_v9, %v563_v35  ;;  %v532_v55 = vld [vmem:[%s6278_s20 + $0x70] sm:$0xff]  ;;  %p5963_p1 = pneg %p5962_p7  ;;  %p5968_p0 = scmp.lt.s32.totalorder %s5966_s16, %s5960_s3 }
  0x80   : > { %v4009_v23 = vadd.f32 %v4846_v14, %v3970_v13  ;;  %v561_v24 = vmul.f32 %v6297_v6, %v522_v15  ;;  %v628_v26 = vmax.f32 %v596_v16, 0.0  ;;  %v629_v27 = vmax.f32 %v597_v17, 0.0  ;;  %v526_v36 = vld [vmem:[%s6278_s20 + $0x40] sm:$0xff]  ;;  %v531_v54 = vld [vmem:[%s6278_s20 + $0x68] sm:$0xff]  ;;  %v533_v56 = vld [vmem:[%s6278_s20 + $0x78] sm:$0xff] }
  0x81   : > { %v4010_v28 = vadd.f32 %v4846_v14, %v3971_v19  ;;  %v565_v48 = vmul.f32 %v6297_v6, %v526_v36  ;;  %v566_v49 = vmul.f32 %v6297_v6, %v527_v37  ;;  %v530_v50 = vld [vmem:[%s6278_s20 + $0x60] sm:$0xff]  ;;  %v630_v51 = vmax.f32 %v6325_v33, 0.0  ;;  %v535_v1 = vld [vmem:[%s6278_s20 + $0x88] sm:$0xff]  ;;  %v536_v8 = vld [vmem:[%s6278_s20 + $0x90] sm:$0xff]  ;;  %p5969_p11 = por %p5968_p0, %p5967_p13 }
  0x82   : > { %5419 = vmatpush3.bf16.msra.mxu0 %v5702_v2  ;;  %v4041_v30 = vmax.f32 %v4009_v23, 0.0  ;;  %v660_v32 = vpack.c.bf16 %v629_v27, %v628_v26  ;;  %v6332_v40 = vadd.f32 %v6304_v9, %v561_v24  ;;  %v6350_v52 = vadd.f32 %v6304_v9, %v564_v41  ;;  %v534_v0 = vld [vmem:[%s6278_s20 + $0x80] sm:$0xff]  ;;  %v537_v10 = vld [vmem:[%s6278_s20 + $0x98] sm:$0xff]  ;;  %v539_v17 = vld [vmem:[%s6278_s20 + $0xa8] sm:$0xff] }
  0x83   : > { %5420 = vmatprep.subr.bf16.mxu0 %v5703_v3  ;;  %v4042_v34 = vmax.f32 %v4010_v28, 0.0  ;;  %v567_v53 = vmul.f32 %v6297_v6, %v528_v42  ;;  %v631_v57 = vmax.f32 %v599_v39, 0.0  ;;  %v6358_v59 = vadd.f32 %v6304_v9, %v565_v48  ;;  %v5707_v2 = vld [vmem:[#allocation5] sm:$0xff]   ;;  %v540_v24 = vld [vmem:[%s6278_s20 + $0xb0] sm:$0xff]  ;;  %v541_v28 = vld [vmem:[%s6278_s20 + $0xb8] sm:$0xff]  ;;  %p5970_p5 = pnand %p5969_p11, %p5963_p1 }
  0x84   : > { %5430 = vmatprep.mubr.bf16.mxu0 %v660_v32  ;;  %v632_v58 = vmax.f32 %v6332_v40, 0.0  ;;  %v568_v60 = vmul.f32 %v6297_v6, %v529_v44  ;;  %v6362_v61 = vadd.f32 %v6304_v9, %v566_v49  ;;  %v569_v63 = vmul.f32 %v6297_v6, %v530_v50  ;;  %v538_v16 = vld [vmem:[%s6278_s20 + $0xa0] sm:$0xff]  ;;  %v544_v42 = vld [vmem:[%s6278_s20 + $0xd0] sm:$0xff]  ;;  %v545_v44 = vld [vmem:[%s6278_s20 + $0xd8] sm:$0xff] }
  0x85   : > { %v6336_v43 = vpack.c.bf16 %v4042_v34, %v4041_v30  ;;  %v6365_v62 = vadd.f32 %v6304_v9, %v567_v53  ;;  %v634_v4 = vmax.f32 %v6343_v47, 0.0  ;;  %v570_v5 = vmul.f32 %v6297_v6, %v531_v54  ;;  %v542_v37 = vld [vmem:[%s6278_s20 + $0xc0] sm:$0xff]  ;;  %v543_v48 = vld [vmem:[%s6278_s20 + $0xc8] sm:$0xff] }
  0x86   : > { %5421 = vmatpush3.bf16.msra.mxu0 %v5703_v3  ;;  %v633_v3 = vmax.f32 %v6340_v46, 0.0  ;;  %v571_v7 = vmul.f32 %v6297_v6, %v532_v55  ;;  %v635_v11 = vmax.f32 %v6350_v52, 0.0  ;;  %v636_v12 = vmax.f32 %v6358_v59, 0.0  ;;  %v546_v52 = vld [vmem:[%s6278_s20 + $0xe0] sm:$0xff]  ;;  %v547_v53 = vld [vmem:[%s6278_s20 + $0xe8] sm:$0xff] }
  0x87   : > { %5422 = vmatprep.subr.bf16.mxu0 %v5704_v21  ;;  %9092 = vst [vmem:[#allocation19_spill] sm:$0xff] %v6336_v43  ;;  %v6379_v13 = vadd.f32 %v6304_v9, %v568_v60  ;;  %v6382_v14 = vadd.f32 %v6304_v9, %v569_v63  ;;  %v572_v15 = vmul.f32 %v6297_v6, %v533_v56  ;;  %v637_v18 = vmax.f32 %v6362_v61, 0.0  ;;  %v548_v60 = vld [vmem:[%s6278_s20 + $0xf0] sm:$0xff] }
  0x88   : > { %v638_v19 = vmax.f32 %v6365_v62, 0.0  ;;  %v6390_v20 = vadd.f32 %v6304_v9, %v570_v5  ;;  %v573_v22 = vmul.f32 %v6297_v6, %v534_v0  ;;  %v574_v23 = vmul.f32 %v6297_v6, %v535_v1  ;;  %v549_v1 = vld [vmem:[%s6278_s20 + $0xf8] sm:$0xff] }
  0x89   : > { %v6399_v25 = vadd.f32 %v6304_v9, %v572_v15  ;;  %v575_v26 = vmul.f32 %v6297_v6, %v536_v8  ;;  %v576_v27 = vmul.f32 %v6297_v6, %v537_v10  ;;  %v661_v29 = vpack.c.bf16 %v631_v57, %v630_v51 }
  0x8a   : > { %5423 = vmatpush3.bf16.msra.mxu0 %v5704_v21  ;;  %v6393_v21 = vadd.f32 %v6304_v9, %v571_v7  ;;  %v639_v30 = vmax.f32 %v6379_v13, 0.0  ;;  %v640_v31 = vmax.f32 %v6382_v14, 0.0  ;;  %v6407_v32 = vadd.f32 %v6304_v9, %v573_v22  ;;  %v5709_v13 = vld [vmem:[#allocation7 + $0xf8] sm:$0xff]  }
  0x8b   : > { %5424 = vmatprep.subr.bf16.mxu0 %v5705_v38  ;;  %v6410_v33 = vadd.f32 %v6304_v9, %v574_v23  ;;  %v6413_v34 = vadd.f32 %v6304_v9, %v575_v26  ;;  %v577_v35 = vmul.f32 %v6297_v6, %v538_v16  ;;  %v578_v36 = vmul.f32 %v6297_v6, %v539_v17  ;;  %v5708_v14 = vld [vmem:[#allocation7 + $0x78] sm:$0xff]  }
  0x8c   : > { %v642_v39 = vmax.f32 %v6393_v21, 0.0  ;;  %v6421_v40 = vadd.f32 %v6304_v9, %v576_v27  ;;  %v579_v41 = vmul.f32 %v6297_v6, %v540_v24  ;;  %v643_v46 = vmax.f32 %v6399_v25, 0.0  ;;  %v5710_v21 = vld [vmem:[#allocation7 + $0x38] sm:$0xff]   ;;  %4894 = vmatprep.subr.bf16.mxu1 %v5708_v14 }
  0x8d   : > { %v644_v47 = vmax.f32 %v6407_v32, 0.0  ;;  %v616_v49 = vadd.f32 %v6304_v9, %v577_v35  ;;  %v617_v50 = vadd.f32 %v6304_v9, %v578_v36  ;;  %v580_v51 = vmul.f32 %v6297_v6, %v541_v28  ;;  %4895 = vmatpush3.bf16.msra.mxu1 %v5710_v21 }
  0x8e   : > { %5425 = vmatpush3.bf16.msra.mxu0 %v5705_v38  ;;  %v641_v38 = vmax.f32 %v6390_v20, 0.0  ;;  %v645_v54 = vmax.f32 %v6410_v33, 0.0  ;;  %v646_v55 = vmax.f32 %v6413_v34, 0.0  ;;  %v647_v56 = vmax.f32 %v6421_v40, 0.0 }
  0x8f   : > { %5426 = vmatprep.subr.bf16.mxu0 %v5706_v45  ;;  %v618_v57 = vadd.f32 %v6304_v9, %v579_v41  ;;  %v581_v59 = vmul.f32 %v6297_v6, %v542_v37  ;;  %v663_v61 = vpack.c.bf16 %v635_v11, %v634_v4  ;;  %v583_v63 = vmul.f32 %v6297_v6, %v544_v42 }
  0x90   : > { %v584_v0 = vmul.f32 %v6297_v6, %v545_v44  ;;  %v649_v5 = vmax.f32 %v617_v50, 0.0  ;;  %v582_v7 = vmul.f32 %v6297_v6, %v543_v48  ;;  %v585_v15 = vmul.f32 %v6297_v6, %v546_v52  ;;  %v5718_v50 = vld [vmem:[#allocation7 + $0x28] sm:$0xff]   ;;  %v5720_v52 = vld [vmem:[#allocation7 + $0x60] sm:$0xff]  }
  0x91   : > { %v622_v8 = vadd.f32 %v6304_v9, %v583_v63  ;;  %v586_v16 = vmul.f32 %v6297_v6, %v547_v53  ;;  %v650_v17 = vmax.f32 %v618_v57, 0.0  ;;  %v620_v11 = vadd.f32 %v6304_v9, %v581_v59  ;;  %v5723_v53 = vld [vmem:[#allocation7 + $0xa0] sm:$0xff]   ;;  %v5727_v57 = vld [vmem:[#allocation7 + $0x98] sm:$0xff]   ;;  %v5729_v59 = vld [vmem:[#allocation7 + $0xd0] sm:$0xff]  }
  0x92   : > { %5427 = vmatpush3.bf16.msra.mxu0 %v5706_v45  ;;  %v662_v45 = vpack.c.bf16 %v633_v3, %v632_v58  ;;  %v619_v58 = vadd.f32 %v6304_v9, %v580_v51  ;;  %v648_v3 = vmax.f32 %v616_v49, 0.0  ;;  %v623_v10 = vadd.f32 %v6304_v9, %v584_v0  ;;  %v5719_v49 = vld [vmem:[#allocation7 + $0xa8] sm:$0xff]   ;;  %v5721_v51 = vld [vmem:[#allocation7 + $0xe0] sm:$0xff]   ;;  %v5730_v63 = vld [vmem:[#allocation7 + $0x10] sm:$0xff]  }
  0x93   : > { %5428 = vmatprep.subr.bf16.mxu0 %v5707_v2  ;;  %v587_v20 = vmul.f32 %v6297_v6, %v548_v60  ;;  %v654_v22 = vmax.f32 %v622_v8, 0.0  ;;  %v625_v23 = vadd.f32 %v6304_v9, %v586_v16  ;;  %v621_v24 = vadd.f32 %v6304_v9, %v582_v7  ;;  %v5728_v60 = vld [vmem:[#allocation7 + $0x50] sm:$0xff]   ;;  %v5733_v0 = vld [vmem:[#allocation7 + $0xc8] sm:$0xff]   ;;  %v5737_v7 = vld [vmem:[#allocation7 + $0xc0] sm:$0xff]  }
  0x94   : > { %v651_v4 = vmax.f32 %v619_v58, 0.0  ;;  %v588_v25 = vmul.f32 %v6297_v6, %v549_v1  ;;  %v652_v32 = vmax.f32 %v620_v11, 0.0  ;;  %v665_v40 = vpack.c.bf16 %v639_v30, %v638_v19  ;;  %v5711_v19 = vld [vmem:[#allocation7 + $0xb8] sm:$0xff]   ;;  %v5713_v30 = vld [vmem:[#allocation7 + $0xf0] sm:$0xff]   ;;  %v5732_v1 = vld [vmem:[#allocation7 + $0x48] sm:$0xff]  }
  0x95   : > { %v626_v26 = vadd.f32 %v6304_v9, %v587_v20  ;;  %v653_v36 = vmax.f32 %v621_v24, 0.0  ;;  %v666_v41 = vpack.c.bf16 %v641_v38, %v640_v31  ;;  %v667_v42 = vpack.c.bf16 %v643_v46, %v642_v39  ;;  %v5712_v31 = vld [vmem:[#allocation7 + $0x70] sm:$0xff]   ;;  %v5717_v46 = vld [vmem:[#allocation7 + $0xe8] sm:$0xff]   ;;  %v5726_v58 = vld [vmem:[#allocation7 + $0x18] sm:$0xff]  }
  0x96   : > { %5429 = vmatpush3.bf16.msra.mxu0 %v5707_v2  ;;  %v664_v2 = vpack.c.bf16 %v637_v18, %v636_v12  ;;  %v655_v12 = vmax.f32 %v623_v10, 0.0  ;;  %v624_v18 = vadd.f32 %v6304_v9, %v585_v15  ;;  %v627_v33 = vadd.f32 %v6304_v9, %v588_v25  ;;  %v5715_v38 = vld [vmem:[#allocation7 + $0xb0] sm:$0xff]   ;;  %4896 = vmatprep.subr.bf16.mxu1 %v5712_v31  ;;  %v5738_v8 = vld [vmem:[#allocation7] sm:$0xff]   ;;  %v5740_v15 = vld [vmem:[#allocation7 + $0x178] sm:$0xff]  }
  0x97   : > { %v658_v34 = vmax.f32 %v626_v26, 0.0  ;;  %v668_v9 = vpack.c.bf16 %v645_v54, %v644_v47  ;;  %v669_v44 = vpack.c.bf16 %v647_v56, %v646_v55  ;;  %v671_v62 = vpack.c.bf16 %v651_v4, %v650_v17  ;;  %5006 = vmatprep.subr.bf16.mxu0 %v5709_v13  ;;  %v5714_v39 = vld [vmem:[#allocation7 + $0x30] sm:$0xff]   ;;  %v5716_v47 = vld [vmem:[#allocation7 + $0x68] sm:$0xff]   ;;  %v5722_v54 = vld [vmem:[#allocation7 + $0x20] sm:$0xff]  }
  0x98   : > { %v673_v27 = vpack.c.bf16 %v655_v12, %v654_v22  ;;  %v656_v28 = vmax.f32 %v624_v18, 0.0  ;;  %v659_v37 = vmax.f32 %v627_v33, 0.0  ;;  %v672_v48 = vpack.c.bf16 %v653_v36, %v652_v32  ;;  %4897 = vmatpush3.bf16.msra.mxu1 %v5714_v39  ;;  %v5725_v55 = vld [vmem:[#allocation7 + $0xd8] sm:$0xff]   ;;  %v5739_v10 = vld [vmem:[#allocation7 + $0x80] sm:$0xff]  }
  0x99   : > { %5431 = vmatmul.mubr.bf16.vlgmr.msra.gmra.mxu0 %v661_v29  ;;  %v657_v29 = vmax.f32 %v625_v23, 0.0  ;;  %4898 = vmatprep.subr.bf16.mxu1 %v5716_v47  ;;  %v5724_v56 = vld [vmem:[#allocation7 + $0x58] sm:$0xff]   ;;  %v1011_v16 = vlaneseq  ;;  %v8876_v32 = vmov 0.0  }
  0x9a   : > { %5434 = vmatprep.mubr.bf16.mxu0 %v662_v45  ;;  %v675_v6 = vpack.c.bf16 %v659_v37, %v658_v34  ;;  %v670_v45 = vpack.c.bf16 %v649_v5, %v648_v3  ;;  %5007 = vmatpush3.bf16.msra.mxu0 %v5711_v19  ;;  %v5734_v3 = vld [vmem:[#allocation7 + $0x8] sm:$0xff]   ;;  %v5736_v5 = vld [vmem:[#allocation7 + $0x40] sm:$0xff]  }
  0x9b   : > { %v674_v35 = vpack.c.bf16 %v657_v29, %v656_v28  ;;  %5008 = vmatprep.subr.bf16.mxu0 %v5713_v30  ;;  %v6465_v17 = vshrl.u32 %v1011_v16, 7 }
  0x9c   : > { %4899 = vmatpush3.bf16.msra.mxu1 %v5718_v50 }
  0x9d   : > { %4900 = vmatprep.subr.bf16.mxu1 %v5720_v52  ;;  %v1013_v4 = vadd.s32 8, %v6465_v17  ;;  %v1048_v11 = vand.u32 15, %v6465_v17  ;;  %v1014_v20 = vadd.s32 16, %v6465_v17  ;;  %v1015_v22 = vadd.s32 24, %v6465_v17 }
  0x9e   : > { %5009 = vmatpush3.bf16.msra.mxu0 %v5715_v38  ;;  %v1016_v12 = vadd.s32 32, %v6465_v17  ;;  %v1017_v25 = vadd.s32 40, %v6465_v17  ;;  %v1019_v28 = vadd.s32 56, %v6465_v17  ;;  %v1020_v29 = vadd.s32 64, %v6465_v17 }
  0x9f   : > { %5010 = vmatprep.subr.bf16.mxu0 %v5717_v46  ;;  %v1055_v18 = vand.u32 15, %v1013_v4  ;;  %vm1620_vm0 = vcmp.ge.s32.totalorder %v1048_v11, 1  ;;  %v1062_v23 = vand.u32 15, %v1014_v20  ;;  %v1069_v24 = vand.u32 15, %v1015_v22  ;;  %v6549_v4 = vld [vmem:[%s8860_s4] ss:$0 sm:$0xff] }
  0xa0   : > { %4901 = vmatpush3.bf16.msra.mxu1 %v5722_v54  ;;  %v1076_v26 = vand.u32 15, %v1016_v12  ;;  %v6477_v33 = vsel %vm1620_vm0, 1.0, %v8876_v32  ;;  %v1083_v34 = vand.u32 15, %v1017_v25  ;;  %v1097_v36 = vand.u32 15, %v1019_v28 }
  0xa1   : > { %5435 = vmatmul.mubr.bf16.gmra.mxu0 %v663_v61  ;;  %4902 = vmatprep.subr.bf16.mxu1 %v5724_v56  ;;  %v5731_v61 = vld [vmem:[#allocation7 + $0x90] sm:$0xff]   ;;  %vm1717_vm1 = vcmp.lt.s32.totalorder %v1055_v18, 15  ;;  %vm1622_vm2 = vcmp.ge.s32.totalorder %v1062_v23, 1  ;;  %vm1719_vm3 = vcmp.lt.s32.totalorder %v1069_v24, 15  ;;  %v1104_v37 = vand.u32 15, %v1020_v29 }
  0xa2   : > { %5438 = vmatprep.mubr.bf16.mxu0 %v664_v2  ;;  %5011 = vmatpush3.bf16.msra.mxu0 %v5719_v49  ;;  %v5735_v2 = vld [vmem:[#allocation7 + $0x88] sm:$0xff]   ;;  %vm1624_vm4 = vcmp.ge.s32.totalorder %v1076_v26, 1  ;;  %v6493_v13 = vsel %vm1719_vm3, 1.0, %v8876_v32  ;;  %vm1721_vm5 = vcmp.lt.s32.totalorder %v1083_v34, 15  ;;  %vm1723_vm7 = vcmp.lt.s32.totalorder %v1097_v36, 15 }
  0xa3   : > { %5012 = vmatprep.subr.bf16.mxu0 %v5721_v51  ;;  %9095 = vst [vmem:[#allocation22_spill] sm:$0xff] %v6493_v13  ;;  %v6496_v14 = vsel %vm1624_vm4, 1.0, %v8876_v32  ;;  %vm1628_vm8 = vcmp.ge.s32.totalorder %v1104_v37, 1  ;;  %v6499_v19 = vadd.s32 248, %v6465_v17  ;;  %v1028_v38 = vadd.s32 128, %v6465_v17 }
  0xa4   : > { %4903 = vmatpush3.bf16.msra.mxu1 %v5726_v58  ;;  %9096 = vst [vmem:[#allocation23_spill] sm:$0xff] %v6496_v14  ;;  %v6503_v50 = vsel %vm1721_vm5, 1.0, %v8876_v32  ;;  %v1029_v52 = vadd.s32 136, %v6465_v17  ;;  %v6511_v54 = vsel %vm1723_vm7, 1.0, %v8876_v32  ;;  %v1031_v56 = vadd.s32 152, %v6465_v17 }
  0xa5   : > { %4904 = vmatprep.subr.bf16.mxu1 %v5728_v60  ;;  %9097 = vst [vmem:[#allocation24_spill] sm:$0xff] %v6499_v19  ;;  %9098 = vst [vmem:[#allocation25_spill] sm:$0xff] %v6503_v50  ;;  %v1160_v58 = vand.u32 15, %v1028_v38  ;;  %v1035_v16 = vadd.s32 184, %v6465_v17  ;;  %v1036_v12 = vadd.s32 192, %v6465_v17  ;;  %v1037_v28 = vadd.s32 200, %v6465_v17 }
  0xa6   : > { %5013 = vmatpush3.bf16.msra.mxu0 %v5723_v53  ;;  %v1030_v53 = vadd.s32 144, %v6465_v17  ;;  %9100 = vst [vmem:[#allocation27_spill] sm:$0xff] %v6511_v54  ;;  %v1038_v37 = vadd.s32 208, %v6465_v17 }
  0xa7   : > { %5014 = vmatprep.subr.bf16.mxu0 %v5725_v55  ;;  %v6514_v55 = vsel %vm1628_vm8, 1.0, %v8876_v32  ;;  %vm1636_vm0 = vcmp.ge.s32.totalorder %v1160_v58, 1  ;;  %v1209_v36 = vand.u32 15, %v1035_v16  ;;  %vm1844_vm8 = vcmp.lt.s32.totalorder %v6465_v17, 1 }
  0xa8   : > { %4905 = vmatpush3.bf16.msra.mxu1 %v5730_v63  ;;  %9101 = vst [vmem:[#allocation28_spill] sm:$0xff] %v6514_v55  ;;  %v1167_v63 = vand.u32 15, %v1029_v52  ;;  %v6571_v26 = vsel %vm1636_vm0, 1.0, %v8876_v32 }
  0xa9   : > { %5439 = vmatmul.mubr.bf16.gmra.mxu0 %v665_v40  ;;  %4906 = vmatprep.subr.bf16.mxu1 %v5732_v1  ;;  %v6480_v40 = vsel %vm1717_vm1, 1.0, %v8876_v32  ;;  %v1032_v1 = vadd.s32 160, %v6465_v17  ;;  %9115 = vst [vmem:[#allocation36_spill] sm:$0xff] %v6571_v26  ;;  %vm1739_vm7 = vcmp.lt.s32.totalorder %v1209_v36, 15  ;;  %v6654_v36 = vadd.s32 240, %v6465_v17 }
  0xaa   : > { %5442 = vmatprep.mubr.bf16.mxu0 %v666_v41  ;;  %5015 = vmatpush3.bf16.msra.mxu0 %v5727_v57  ;;  %9093 = vst [vmem:[#allocation20_spill] sm:$0xff] %v6480_v40  ;;  %v1022_v41 = vadd.s32 80, %v6465_v17  ;;  %vm1733_vm1 = vcmp.lt.s32.totalorder %v1167_v63, 15  ;;  %v6568_v25 = vmul.f32 0.0, %v6480_v40  ;;  %v6634_v16 = vsel %vm1739_vm7, 1.0, %v8876_v32 }
  0xab   : > { %5016 = vmatprep.subr.bf16.mxu0 %v5729_v59  ;;  %v1188_v23 = vand.u32 15, %v1032_v1  ;;  %9127 = vst [vmem:[#allocation40_spill] sm:$0xff] %v6634_v16  ;;  %9131 = vst [vmem:[#allocation42_spill] sm:$0xff] %v6654_v36 }
  0xac   : > { %4907 = vmatpush3.bf16.msra.mxu1 %v5734_v3  ;;  %v1118_v30 = vand.u32 15, %v1022_v41  ;;  %v6586_v41 = vmul.f32 0.0, %v6477_v33 }
  0xad   : > { %4908 = vmatprep.subr.bf16.mxu1 %v5736_v5  ;;  %vm6594_vm4 = vcmp.ge.s32.totalorder %v1188_v23, 1 }
  0xae   : > { %5017 = vmatpush3.bf16.msra.mxu0 %v5731_v61  ;;  %vm1630_vm10 = vcmp.ge.s32.totalorder %v1118_v30, 1  ;;  %v1039_v30 = vadd.s32 216, %v6465_v17  ;;  %v6617_v59 = vsel %vm6594_vm4, 1.0, %v8876_v32 }
  0xaf   : > { %5018 = vmatprep.subr.bf16.mxu0 %v5733_v0  ;;  %v1174_v0 = vand.u32 15, %v1030_v53  ;;  %v6536_v5 = vsel %vm1630_vm10, 1.0, %v8876_v32  ;;  %v5748_v53 = vld [vmem:[#allocation7 + $0x1f8] sm:$0xff]   ;;  %9123 = vst [vmem:[#allocation38_spill] sm:$0xff] %v6617_v59 }
  0xb0   : > { %4909 = vmatpush3.bf16.msra.mxu1 %v5738_v8  ;;  %9109 = vst [vmem:[#allocation30_spill] sm:$0xff] %v6536_v5  ;;  %v1181_v8 = vand.u32 15, %v1031_v56  ;;  %v1230_v56 = vand.u32 15, %v1038_v37 }
  0xb1   : > { %5443 = vmatmul.mubr.bf16.gmra.mxu0 %v667_v42  ;;  %5118 = vmatprep.subr.bf16.mxu1 %v5740_v15  ;;  %v1023_v42 = vadd.s32 88, %v6465_v17  ;;  %v1034_v15 = vadd.s32 176, %v6465_v17 }
  0xb2   : > { %5446 = vmatprep.mubr.bf16.mxu0 %v668_v9  ;;  %5019 = vmatpush3.bf16.msra.mxu0 %v5735_v2  ;;  %v1024_v9 = vadd.s32 96, %v6465_v17  ;;  %v1033_v2 = vadd.s32 168, %v6465_v17  ;;  %vm6573_vm3 = vcmp.lt.s32.totalorder %v1181_v8, 15 }
  0xb3   : > { %5020 = vmatprep.subr.bf16.mxu0 %v5737_v7  ;;  %v1125_v31 = vand.u32 15, %v1023_v42  ;;  %v6589_v42 = vsel %vm1733_vm1, 1.0, %v8876_v32 }
  0xb4   : > { %v1132_v39 = vand.u32 15, %v1024_v9  ;;  %v1195_v24 = vand.u32 15, %v1033_v2  ;;  %9118 = vst [vmem:[#allocation37_spill] sm:$0xff] %v6589_v42  ;;  %v1237_v2 = vand.u32 15, %v1039_v30 }
  0xb5   : > { %vm1727_vm11 = vcmp.lt.s32.totalorder %v1125_v31, 15  ;;  %v1040_v31 = vadd.s32 224, %v6465_v17 }
  0xb6   : > { %5021 = vmatpush3.bf16.msra.mxu0 %v5739_v10  ;;  %vm1632_vm12 = vcmp.ge.s32.totalorder %v1132_v39, 1  ;;  %v6539_v7 = vsel %vm1727_vm11, 1.0, %v8876_v32  ;;  %vm6598_vm5 = vcmp.lt.s32.totalorder %v1195_v24, 15  ;;  %v6608_v39 = vsel %vm6573_vm3, 1.0, %v8876_v32 }
  0xb7   : > { %9110 = vst [vmem:[#allocation31_spill] sm:$0xff] %v6539_v7  ;;  %v6542_v10 = vsel %vm1632_vm12, 1.0, %v8876_v32  ;;  %v6622_v60 = vsel %vm6598_vm5, 1.0, %v8876_v32  ;;  %5230 = vmatprep.subr.bf16.mxu0 %v5748_v53  ;;  %v1244_v8 = vand.u32 15, %v1040_v31  ;;  %vm1646_vm11 = vcmp.ge.s32.totalorder %v1230_v56, 1 }
  0xb8   : > { %9111 = vst [vmem:[#allocation32_spill] sm:$0xff] %v6542_v10  ;;  %vm2037_vm12 = vcmp.lt.s32.totalorder %v6465_v17, 7  ;;  %v6666_v30 = vsel %vm1646_vm11, 1.0, %v8876_v32 }
  0xb9   : > { %5447 = vmatmul.mubr.bf16.gmra.mxu0 %v669_v44  ;;  %v1025_v44 = vadd.s32 104, %v6465_v17  ;;  %9134 = vst [vmem:[#allocation45_spill] sm:$0xff] %v6666_v30 }
  0xba   : > { %5450 = vmatprep.mubr.bf16.mxu0 %v670_v45  ;;  %v1026_v45 = vadd.s32 112, %v6465_v17 }
  0xbb   : > { %v1139_v46 = vand.u32 15, %v1025_v44  ;;  %v1216_v44 = vand.u32 15, %v1036_v12 }
  0xbc   : > { %v1146_v47 = vand.u32 15, %v1026_v45 }
  0xbd   : > { %vm6518_vm13 = vcmp.lt.s32.totalorder %v1139_v46, 15  ;;  %v1223_v46 = vand.u32 15, %v1037_v28 }
  0xbe   : > { %vm6522_vm14 = vcmp.ge.s32.totalorder %v1146_v47, 1  ;;  %v6554_v11 = vsel %vm6518_vm13, 1.0, %v8876_v32  ;;  %v1041_v47 = vadd.s32 232, %v6465_v17  ;;  %vm1743_vm13 = vcmp.lt.s32.totalorder %v1237_v2, 15 }
  0xbf   : > { %9112 = vst [vmem:[#allocation33_spill] sm:$0xff] %v6554_v11  ;;  %v6559_v20 = vsel %vm6522_vm14, 1.0, %v8876_v32  ;;  %vm6636_vm10 = vcmp.lt.s32.totalorder %v1223_v46, 15  ;;  %vm1648_vm14 = vcmp.ge.s32.totalorder %v1244_v8, 1  ;;  %v6678_v56 = vsel %vm1743_vm13, 1.0, %v8876_v32 }
  0xc0   : > { %9113 = vst [vmem:[#allocation34_spill] sm:$0xff] %v6559_v20  ;;  %9137 = vst [vmem:[#allocation46_spill] sm:$0xff] %v6678_v56 }
  0xc1   : > { %5451 = vmatmul.mubr.bf16.gmra.mxu0 %v671_v62  ;;  %v1027_v62 = vadd.s32 120, %v6465_v17 }
  0xc2   : > { %5454 = vmatprep.mubr.bf16.mxu0 %v672_v48  ;;  %v6490_v48 = vsel %vm1622_vm2, 1.0, %v8876_v32  ;;  %vm1638_vm2 = vcmp.ge.s32.totalorder %v1174_v0, 1 }
  0xc3   : > { %9094 = vst [vmem:[#allocation21_spill] sm:$0xff] %v6490_v48  ;;  %v1153_v49 = vand.u32 15, %v1027_v62  ;;  %v6592_v9 = vsel %vm1638_vm2, 1.0, %v8876_v32 }
  0xc5   : > { %vm6526_vm15 = vcmp.lt.s32.totalorder %v1153_v49, 15 }
  0xc6   : > { %v6564_v22 = vsel %vm6526_vm15, 1.0, %v8876_v32 }
  0xc7   : > { %9114 = vst [vmem:[#allocation35_spill] sm:$0xff] %v6564_v22 }
  0xc9   : > { %5455 = vmatmul.mubr.bf16.gmra.mxu0 %v673_v27  ;;  %v1018_v27 = vadd.s32 48, %v6465_v17 }
  0xca   : > { %5458 = vmatprep.mubr.bf16.mxu0 %v674_v35 }
  0xcb   : > { %v1090_v35 = vand.u32 15, %v1018_v27 }
  0xcd   : > { %vm1626_vm6 = vcmp.ge.s32.totalorder %v1090_v35, 1  ;;  %v1202_v35 = vand.u32 15, %v1034_v15 }
  0xce   : > { %v6506_v51 = vsel %vm1626_vm6, 1.0, %v8876_v32 }
  0xcf   : > { %9099 = vst [vmem:[#allocation26_spill] sm:$0xff] %v6506_v51  ;;  %vm1642_vm6 = vcmp.ge.s32.totalorder %v1202_v35, 1 }
  0xd0   : > { %v6631_v15 = vsel %vm1642_vm6, 1.0, %v8876_v32 }
  0xd1   : > { %5459 = vmatmul.mubr.bf16.gmra.mxu0 %v675_v6  ;;  %v1021_v6 = vadd.s32 72, %v6465_v17  ;;  %9126 = vst [vmem:[#allocation39_spill] sm:$0xff] %v6631_v15  ;;  %v5769_v17 = vld [vmem:[#allocation7 + $0x188] sm:$0xff]  }
  0xd3   : > { %v1111_v21 = vand.u32 15, %v1021_v6  ;;  %v6583_v6 = vld [vmem:[%s8861_s5] ss:$0 sm:$0xff] }
  0xd5   : > { %vm1725_vm9 = vcmp.lt.s32.totalorder %v1111_v21, 15  ;;  %v6663_v21 = vsel %vm6636_vm10, 1.0, %v8876_v32 }
  0xd6   : > { %v6533_v3 = vsel %vm1725_vm9, 1.0, %v8876_v32  ;;  %vm6624_vm9 = vcmp.ge.s32.totalorder %v1216_v44, 1  ;;  %9133 = vst [vmem:[#allocation44_spill] sm:$0xff] %v6663_v21 }
  0xd7   : > { %9108 = vst [vmem:[#allocation29_spill] sm:$0xff] %v6533_v3  ;;  %v6651_v35 = vsel %vm6624_vm9, 1.0, %v8876_v32 }
  0xd8   : > { %9130 = vst [vmem:[#allocation41_spill] sm:$0xff] %v6651_v35 }
 0x159   : > { %v5432_v18 = vpop.f32.mrf.mxu0 }
 0x15a   : > { %v910_v29 = vmul.f32 %v5432_v18, %v6549_v4  ;;  %v1251_v18 = vand.u32 15, %v1041_v47 }
 0x15b   : > { %v774_v34 = vpop.f32.mrf.mxu0 }
 0x15c   : > { %v949_v49 = vadd.f32 %v6583_v6, %v910_v29  ;;  %v908_v63 = vmul.f32 %v6549_v4, %v774_v34  ;;  %vm6668_vm15 = vcmp.lt.s32.totalorder %v1251_v18, 15 }
 0x15d   : > { %v5433_v45 = vpop.f32.mrf.mxu0 }
 0x15e   : > { %v911_v38 = vmul.f32 %v5433_v45, %v6549_v4  ;;  %v6640_v23 = vmax.f32 %v949_v49, 0.0  ;;  %v947_v37 = vadd.f32 %v6583_v6, %v908_v63 }
 0x15f   : > { %v777_v52 = vpop.f32.mrf.mxu0 }
 0x160   : > { %v950_v58 = vadd.f32 %v6583_v6, %v911_v38  ;;  %v909_v0 = vmul.f32 %v6549_v4, %v777_v52  ;;  %v1814_v38 = vrot.slane %v6640_v23, 7  ;;  %v6684_v63 = vmax.f32 %v947_v37, 0.0 }
 0x161   : > { %v5436_v1 = vpop.f32.mrf.mxu0  ;;  %v2007_v12 = vrot.slane %v6640_v23, 1 }
 0x162   : > { %v948_v24 = vadd.f32 %v6583_v6, %v909_v0  ;;  %v914_v27 = vmul.f32 %v5436_v1, %v6549_v4  ;;  %v6644_v29 = vmax.f32 %v950_v58, 0.0  ;;  %v6681_v58 = vsel %vm1648_vm14, 1.0, %v8876_v32 }
 0x163   : > { %v790_v28 = vpop.f32.mrf.mxu0  ;;  %9138 = vst [vmem:[#allocation47_spill] sm:$0xff] %v6681_v58  ;;  %v9146_v56 = vrot.slane %v6684_v63, 7 }
 0x164   : > { %v912_v34 = vmul.f32 %v6549_v4, %v790_v28  ;;  %v6657_v44 = vmax.f32 %v948_v24, 0.0  ;;  %v953_v46 = vadd.f32 %v6583_v6, %v914_v27  ;;  %v1815_v53 = vrot.slane %v6644_v29, 7 }
 0x165   : > { %v5437_v45 = vpop.f32.mrf.mxu0  ;;  %v2008_v18 = vrot.slane %v6644_v29, 1  ;;  %v6698_v27 = vsel %vm6668_vm15, 1.0, %v8876_v32  ;;  %v6731_v43 = vpack.c.bf16 %v6644_v29, %v6640_v23 }
 0x166   : > { %9132 = vst [vmem:[#allocation43_spill] sm:$0xff] %v6657_v44  ;;  %v915_v62 = vmul.f32 %v5437_v45, %v6549_v4  ;;  %v951_v47 = vadd.f32 %v6583_v6, %v912_v34  ;;  %v1813_v52 = vrot.slane %v6657_v44, 7  ;;  %9139 = vst [vmem:[#allocation48_spill] sm:$0xff] %v6698_v27  ;;  %v6700_v28 = vmax.f32 %v953_v46, 0.0 }
 0x167   : > { %v793_v49 = vpop.f32.mrf.mxu0  ;;  %v6713_v31 = vsel %vm1844_vm8, %v1814_v38, %v1815_v53  ;;  %v2006_v46 = vrot.slane %v6657_v44, 1  ;;  %9143 = vst [vmem:[#allocation52_spill] sm:$0xff] %v6731_v43 }
 0x168   : > { %v954_v0 = vadd.f32 %v6583_v6, %v915_v62  ;;  %v913_v1 = vmul.f32 %v6549_v4, %v793_v49  ;;  %v6690_v8 = vsel %vm1844_vm8, %v1813_v52, %v1814_v38  ;;  %v6702_v34 = vmax.f32 %v951_v47, 0.0  ;;  %9141 = vst [vmem:[#allocation50_spill] sm:$0xff] %v6713_v31 }
 0x169   : > { %v5440_v2 = vpop.f32.mrf.mxu0  ;;  %v6707_v62 = vmul.f32 %v6477_v33, %v6690_v8  ;;  %v6727_v38 = vpack.c.bf16 %v6657_v44, %v6684_v63  ;;  %v6749_v23 = vsel %vm2037_vm12, %v2006_v46, %v2007_v12  ;;  %v6819_v15 = vmul.f32 %v6496_v14, %v6690_v8 }
 0x16a   : > { %v918_v24 = vmul.f32 %v5440_v2, %v6549_v4  ;;  %v952_v37 = vadd.f32 %v6583_v6, %v913_v1  ;;  %v6717_v32 = vmax.f32 %v954_v0, 0.0  ;;  %v1818_v0 = vrot.slane %v6700_v28, 7  ;;  %9145 = vst [vmem:[#allocation54_spill] sm:$0xff] %v6749_v23 }
 0x16b   : > { %v806_v45 = vpop.f32.mrf.mxu0  ;;  %9140 = vst [vmem:[#allocation49_spill] sm:$0xff] %v6707_v62  ;;  %9142 = vst [vmem:[#allocation51_spill] sm:$0xff] %v6727_v38  ;;  %v6745_v62 = vmul.f32 %v6490_v48, %v6690_v8 }
 0x16c   : > { %v957_v49 = vadd.f32 %v6583_v6, %v918_v24  ;;  %v916_v2 = vmul.f32 %v6549_v4, %v806_v45  ;;  %v6719_v1 = vmax.f32 %v952_v37, 0.0  ;;  %v1816_v37 = vrot.slane %v6702_v34, 7  ;;  %9158 = vst [vmem:[#allocation64_spill] sm:$0xff] %v6819_v15 }
 0x16d   : > { %v5441_v57 = vpop.f32.mrf.mxu0  ;;  %v9153_v21 = vrot.slane %v6717_v32, 7 }
 0x16e   : > { %v919_v24 = vmul.f32 %v5441_v57, %v6549_v4  ;;  %v955_v47 = vadd.f32 %v6583_v6, %v916_v2  ;;  %v6738_v57 = vsel %vm2037_vm12, %v2007_v12, %v2008_v18  ;;  %v6741_v45 = vmax.f32 %v957_v49, 0.0 }
 0x16f   : > { %v809_v40 = vpop.f32.mrf.mxu0  ;;  %9144 = vst [vmem:[#allocation53_spill] sm:$0xff] %v6738_v57  ;;  %v1817_v2 = vrot.slane %v6719_v1, 7  ;;  %v2009_v49 = vrot.slane %v6702_v34, 1  ;;  %v6762_v12 = vsel %vm1844_vm8, %v9146_v56, %v1813_v52  ;;  %v6773_v61 = vsel %vm1844_vm8, %v1815_v53, %v1816_v37 }
 0x170   : > { %v958_v44 = vadd.f32 %v6583_v6, %v919_v24  ;;  %v917_v27 = vmul.f32 %v6549_v4, %v809_v40  ;;  %9147 = vst [vmem:[#allocation55_spill] sm:$0xff] %v6762_v12  ;;  %v6764_v29 = vmax.f32 %v955_v47, 0.0  ;;  %v6769_v40 = vmul.f32 %v6493_v13, %v6749_v23  ;;  %9149 = vst [vmem:[#allocation57_spill] sm:$0xff] %v6773_v61 }
 0x171   : > { %v5444_v19 = vpop.f32.mrf.mxu0  ;;  %v9150_v56 = vrot.slane %v6684_v63, 1  ;;  %v6790_v53 = vsel %vm1844_vm8, %v1816_v37, %v1817_v2  ;;  %v6796_v52 = vsel %vm1844_vm8, %v1818_v0, %v9153_v21 }
 0x172   : > { %v922_v58 = vmul.f32 %v5444_v19, %v6549_v4  ;;  %9148 = vst [vmem:[#allocation56_spill] sm:$0xff] %v6764_v29  ;;  %v956_v30 = vadd.f32 %v6583_v6, %v917_v27  ;;  %v2010_v19 = vrot.slane %v6719_v1, 1  ;;  %v6786_v23 = vmax.f32 %v958_v44, 0.0  ;;  %9152 = vst [vmem:[#allocation59_spill] sm:$0xff] %v6790_v53 }
 0x173   : > { %v822_v24 = vpop.f32.mrf.mxu0  ;;  %v6783_v27 = vsel %vm2037_vm12, %v9150_v56, %v2006_v46  ;;  %9154 = vst [vmem:[#allocation60_spill] sm:$0xff] %v6796_v52  ;;  %v6802_v56 = vmul.f32 %v6496_v14, %v6773_v61  ;;  %v6806_v44 = vsel %vm2037_vm12, %v2008_v18, %v2009_v49  ;;  %v1820_v37 = vrot.slane %v6764_v29, 7 }
 0x174   : > { %9151 = vst [vmem:[#allocation58_spill] sm:$0xff] %v6783_v27  ;;  %v961_v35 = vadd.f32 %v6583_v6, %v922_v58  ;;  %v920_v46 = vmul.f32 %v6549_v4, %v822_v24  ;;  %9156 = vst [vmem:[#allocation62_spill] sm:$0xff] %v6806_v44  ;;  %v6809_v47 = vmax.f32 %v956_v30, 0.0  ;;  %v6823_v18 = vsel %vm1844_vm8, %v1817_v2, %v1818_v0 }
 0x175   : > { %v5445_v43 = vpop.f32.mrf.mxu0  ;;  %9155 = vst [vmem:[#allocation61_spill] sm:$0xff] %v6802_v56  ;;  %9159 = vst [vmem:[#allocation65_spill] sm:$0xff] %v6823_v18  ;;  %v6829_v58 = vmul.f32 %v6503_v50, %v6806_v44  ;;  %v9160_v24 = vrot.slane %v6700_v28, 1  ;;  %v6846_v50 = vmul.f32 %v6506_v51, %v6823_v18 }
 0x176   : > { %9157 = vst [vmem:[#allocation63_spill] sm:$0xff] %v6809_v47  ;;  %v923_v16 = vmul.f32 %v5445_v43, %v6549_v4  ;;  %v6838_v14 = vmax.f32 %v961_v35, 0.0  ;;  %v959_v0 = vadd.f32 %v6583_v6, %v920_v46 }
 0x177   : > { %v825_v21 = vpop.f32.mrf.mxu0  ;;  %v6835_v61 = vsel %vm2037_vm12, %v2010_v19, %v9160_v24  ;;  %9162 = vst [vmem:[#allocation67_spill] sm:$0xff] %v6846_v50 }
 0x178   : > { %v921_v43 = vmul.f32 %v6549_v4, %v825_v21  ;;  %9161 = vst [vmem:[#allocation66_spill] sm:$0xff] %v6835_v61  ;;  %v1821_v21 = vrot.slane %v6809_v47, 7  ;;  %v962_v30 = vadd.f32 %v6583_v6, %v923_v16  ;;  %v6850_v24 = vmul.f32 %v6493_v13, %v6835_v61 }
 0x179   : > { %v5448_v36 = vpop.f32.mrf.mxu0  ;;  %v6868_v53 = vmax.f32 %v959_v0, 0.0  ;;  %v6877_v13 = vpack.c.bf16 %v6719_v1, %v6702_v34 }
 0x17a   : > { %v926_v2 = vmul.f32 %v5448_v36, %v6549_v4  ;;  %9163 = vst [vmem:[#allocation68_spill] sm:$0xff] %v6850_v24  ;;  %v960_v35 = vadd.f32 %v6583_v6, %v921_v43  ;;  %v6857_v36 = vsel %vm2037_vm12, %v2009_v49, %v2010_v19  ;;  %v6871_v19 = vmax.f32 %v962_v30, 0.0 }
 0x17b   : > { %v838_v44 = vpop.f32.mrf.mxu0  ;;  %9164 = vst [vmem:[#allocation69_spill] sm:$0xff] %v6857_v36  ;;  %9165 = vst [vmem:[#allocation70_spill] sm:$0xff] %v6868_v53  ;;  %v9167_v43 = vrot.slane %v6717_v32, 7  ;;  %v6915_v36 = vmul.f32 %v6511_v54, %v6835_v61 }
 0x17c   : > { %v965_v8 = vadd.f32 %v6583_v6, %v926_v2  ;;  %v924_v46 = vmul.f32 %v6549_v4, %v838_v44  ;;  %9166 = vst [vmem:[#allocation71_spill] sm:$0xff] %v6877_v13  ;;  %v6885_v0 = vmax.f32 %v960_v35, 0.0  ;;  %v6891_v44 = vsel %vm1844_vm8, %v1820_v37, %v1821_v21 }
 0x17d   : > { %v5449_v56 = vpop.f32.mrf.mxu0  ;;  %v6883_v2 = vsel %vm1844_vm8, %v9167_v43, %v1820_v37  ;;  %v6900_v43 = vpack.c.bf16 %v6717_v32, %v6700_v28  ;;  %v9172_v35 = vrot.slane %v6764_v29, 1  ;;  %v1824_v37 = vrot.slane %v6868_v53, 7  ;;  %9175 = vst [vmem:[#allocation77_spill] sm:$0xff] %v6915_v36 }
 0x17e   : > { %v927_v49 = vmul.f32 %v5449_v56, %v6549_v4  ;;  %9168 = vst [vmem:[#allocation72_spill] sm:$0xff] %v6883_v2  ;;  %9169 = vst [vmem:[#allocation73_spill] sm:$0xff] %v6885_v0  ;;  %v963_v56 = vadd.f32 %v6583_v6, %v924_v46  ;;  %v6896_v1 = vmul.f32 %v6514_v55, %v6883_v2  ;;  %v9173_v46 = vrot.slane %v6717_v32, 1 }
 0x17f   : > { %v841_v16 = vpop.f32.mrf.mxu0  ;;  %9171 = vst [vmem:[#allocation75_spill] sm:$0xff] %v6900_v43  ;;  %v6917_v13 = vmax.f32 %v965_v8, 0.0  ;;  %v9188_v36 = vrot.slane %v6741_v45, 1 }
 0x180   : > { %v966_v30 = vadd.f32 %v6583_v6, %v927_v49  ;;  %v925_v51 = vmul.f32 %v6549_v4, %v841_v16  ;;  %9170 = vst [vmem:[#allocation74_spill] sm:$0xff] %v6896_v1  ;;  %v6908_v49 = vsel %vm2037_vm12, %v9173_v46, %v9172_v35  ;;  %v9176_v35 = vmov %v9173_v46 }
 0x181   : > { %v5452_v34 = vpop.f32.mrf.mxu0  ;;  %9174 = vst [vmem:[#allocation76_spill] sm:$0xff] %v6908_v49  ;;  %v9177_v46 = vrot.slane %v6700_v28, 1  ;;  %v6931_v54 = vmax.f32 %v963_v56, 0.0  ;;  %v9180_v28 = vrot.slane %v6786_v23, 7 }
 0x182   : > { %v930_v24 = vmul.f32 %v5452_v34, %v6549_v4  ;;  %v964_v43 = vadd.f32 %v6583_v6, %v925_v51  ;;  %v6937_v1 = vmax.f32 %v966_v30, 0.0  ;;  %v9194_v34 = vrot.slane %v6764_v29, 1 }
 0x183   : > { %v854_v15 = vpop.f32.mrf.mxu0  ;;  %v6928_v16 = vsel %vm2037_vm12, %v9177_v46, %v9176_v35  ;;  %9179 = vst [vmem:[#allocation79_spill] sm:$0xff] %v6931_v54  ;;  %v9181_v35 = vrot.slane %v6741_v45, 7 }
 0x184   : > { %9178 = vst [vmem:[#allocation78_spill] sm:$0xff] %v6928_v16  ;;  %v969_v8 = vadd.f32 %v6583_v6, %v930_v24  ;;  %v928_v51 = vmul.f32 %v6549_v4, %v854_v15  ;;  %v6958_v16 = vmax.f32 %v964_v43, 0.0 }
 0x185   : > { %v5453_v32 = vpop.f32.mrf.mxu0  ;;  %v6945_v46 = vsel %vm1844_vm8, %v9181_v35, %v9180_v28  ;;  %v9183_v61 = vmov %v9181_v35 }
 0x186   : > { %9182 = vst [vmem:[#allocation80_spill] sm:$0xff] %v6945_v46  ;;  %v967_v24 = vadd.f32 %v6583_v6, %v928_v51  ;;  %v931_v15 = vmul.f32 %v5453_v32, %v6549_v4  ;;  %v6954_v30 = vsel %vm1844_vm8, %v1821_v21, %v9183_v61  ;;  %9185 = vst [vmem:[#allocation82_spill] sm:$0xff] %v6958_v16  ;;  %v9189_v51 = vrot.slane %v6809_v47, 1 }
 0x187   : > { %9184 = vst [vmem:[#allocation81_spill] sm:$0xff] %v6954_v30  ;;  %v857_v28 = vpop.f32.mrf.mxu0  ;;  %v6962_v35 = vmul.f32 %v6536_v5, %v6954_v30  ;;  %v6969_v61 = vmul.f32 %v6533_v3, %v6908_v49  ;;  %v6984_v49 = vmax.f32 %v969_v8, 0.0 }
 0x188   : > { %v970_v56 = vadd.f32 %v6583_v6, %v931_v15  ;;  %v929_v43 = vmul.f32 %v6549_v4, %v857_v28  ;;  %v6981_v32 = vsel %vm2037_vm12, %v9189_v51, %v9188_v36  ;;  %v6989_v28 = vmul.f32 %v6514_v55, %v6823_v18 }
 0x189   : > { %9186 = vst [vmem:[#allocation83_spill] sm:$0xff] %v6962_v35  ;;  %9187 = vst [vmem:[#allocation84_spill] sm:$0xff] %v6969_v61  ;;  %v5456_v50 = vpop.f32.mrf.mxu0  ;;  %v6995_v61 = vmul.f32 %v6539_v7, %v6981_v32  ;;  %v6999_v36 = vmul.f32 %v6536_v5, %v6883_v2  ;;  %v7001_v8 = vmax.f32 %v967_v24, 0.0  ;;  %v9193_v15 = vrot.slane %v6809_v47, 1 }
 0x18a   : > { %9190 = vst [vmem:[#allocation85_spill] sm:$0xff] %v6981_v32  ;;  %v934_v21 = vmul.f32 %v5456_v50, %v6549_v4  ;;  %v968_v35 = vadd.f32 %v6583_v6, %v929_v43  ;;  %v7014_v7 = vmax.f32 %v970_v56, 0.0  ;;  %v9196_v32 = vrot.slane %v6885_v0, 7 }
 0x18b   : > { %v870_v3 = vpop.f32.mrf.mxu0  ;;  %9191 = vst [vmem:[#allocation86_spill] sm:$0xff] %v6995_v61  ;;  %9192 = vst [vmem:[#allocation87_spill] sm:$0xff] %v6999_v36  ;;  %v7011_v43 = vsel %vm2037_vm12, %v9194_v34, %v9193_v15  ;;  %v9197_v56 = vrot.slane %v6786_v23, 7  ;;  %v9201_v2 = vrot.slane %v6786_v23, 1 }
 0x18c   : > { %v973_v50 = vadd.f32 %v6583_v6, %v934_v21  ;;  %v932_v51 = vmul.f32 %v6549_v4, %v870_v3  ;;  %9195 = vst [vmem:[#allocation88_spill] sm:$0xff] %v7011_v43  ;;  %v7026_v34 = vsel %vm1844_vm8, %v1824_v37, %v9196_v32  ;;  %v7046_v61 = vmax.f32 %v968_v35, 0.0 }
 0x18d   : > { %v5457_v5 = vpop.f32.mrf.mxu0  ;;  %v7032_v15 = vsel %vm1844_vm8, %v9197_v56, %v1824_v37  ;;  %v9200_v43 = vrot.slane %v6868_v53, 1  ;;  %v9203_v36 = vmov %v9201_v2  ;;  %v9204_v35 = vrot.slane %v6741_v45, 1 }
 0x18e   : > { %v971_v3 = vadd.f32 %v6583_v6, %v932_v51  ;;  %v935_v55 = vmul.f32 %v5457_v5, %v6549_v4  ;;  %v7038_v5 = vmul.f32 %v6542_v10, %v7032_v15  ;;  %v7042_v51 = vpack.c.bf16 %v6786_v23, %v6741_v45 }
 0x18f   : > { %v873_v18 = vpop.f32.mrf.mxu0  ;;  %v7070_v32 = vmax.f32 %v973_v50, 0.0  ;;  %v7080_v45 = vmul.f32 %v6542_v10, %v6954_v30  ;;  %v9220_v30 = vrot.slane %v6931_v54, 7 }
 0x190   : > { %9198 = vst [vmem:[#allocation89_spill] sm:$0xff] %v7038_v5  ;;  %9199 = vst [vmem:[#allocation90_spill] sm:$0xff] %v7042_v51  ;;  %v974_v37 = vadd.f32 %v6583_v6, %v935_v55  ;;  %v933_v56 = vmul.f32 %v6549_v4, %v873_v18  ;;  %v7058_v51 = vsel %vm2037_vm12, %v9201_v2, %v9200_v43  ;;  %v9209_v43 = vrot.slane %v6838_v14, 7 }
 0x191   : > { %v5460_v21 = vpop.f32.mrf.mxu0  ;;  %9202 = vst [vmem:[#allocation91_spill] sm:$0xff] %v7058_v51  ;;  %v7066_v55 = vsel %vm2037_vm12, %v9204_v35, %v9203_v36  ;;  %v7076_v23 = vmul.f32 %v6554_v11, %v7058_v51  ;;  %9207 = vst [vmem:[#allocation94_spill] sm:$0xff] %v7080_v45  ;;  %v9208_v36 = vrot.slane %v6871_v19, 7 }
 0x192   : > { %9205 = vst [vmem:[#allocation92_spill] sm:$0xff] %v7066_v55  ;;  %v938_v5 = vmul.f32 %v5460_v21, %v6549_v4  ;;  %v972_v47 = vadd.f32 %v6583_v6, %v933_v56  ;;  %v7090_v21 = vmax.f32 %v971_v3, 0.0  ;;  %v7092_v56 = vmax.f32 %v974_v37, 0.0 }
 0x193   : > { %v886_v2 = vpop.f32.mrf.mxu0  ;;  %9206 = vst [vmem:[#allocation93_spill] sm:$0xff] %v7076_v23  ;;  %v7088_v50 = vsel %vm1844_vm8, %v9209_v43, %v9208_v36  ;;  %v9210_v36 = vmov %v9209_v43  ;;  %v9211_v3 = vrot.slane %v6885_v0, 7 }
 0x194   : > { %v977_v35 = vadd.f32 %v6583_v6, %v938_v5  ;;  %v936_v24 = vmul.f32 %v6549_v4, %v886_v2 }
 0x195   : > { %v5461_v10 = vpop.f32.mrf.mxu0  ;;  %v7107_v37 = vsel %vm1844_vm8, %v9211_v3, %v9210_v36  ;;  %v9213_v36 = vrot.slane %v6838_v14, 1  ;;  %v9216_v3 = vrot.slane %v6868_v53, 1 }
 0x196   : > { %v7109_v5 = vmax.f32 %v977_v35, 0.0  ;;  %v7112_v2 = vadd.f32 %v6583_v6, %v936_v24  ;;  %v939_v43 = vmul.f32 %v5461_v10, %v6549_v4  ;;  %v7117_v11 = vmul.f32 %v6559_v20, %v7107_v37 }
 0x197   : > { %v889_v23 = vpop.f32.mrf.mxu0  ;;  %v9214_v35 = vrot.slane %v6885_v0, 1 }
 0x198   : > { %9212 = vst [vmem:[#allocation95_spill] sm:$0xff] %v7117_v11  ;;  %v978_v51 = vadd.f32 %v6583_v6, %v939_v43  ;;  %v1842_v18 = vrot.slane %v7109_v5, 7  ;;  %v937_v46 = vmul.f32 %v6549_v4, %v889_v23  ;;  %v9219_v23 = vrot.slane %v6958_v16, 7 }
 0x199   : > { %v7128_v24 = vsel %vm2037_vm12, %v9214_v35, %v9213_v36  ;;  %v1957_v36 = vmul.f32 0.0, %v7109_v5  ;;  %v7148_v43 = vsel %vm2037_vm12, %v9216_v3, %v9214_v35  ;;  %v9221_v3 = vmov %v9220_v30 }
 0x19a   : > { %v7139_v29 = vmax.f32 %v978_v51, 0.0  ;;  %v7152_v55 = vmul.f32 %v6564_v22, %v7128_v24  ;;  %v976_v4 = vadd.f32 %v6583_v6, %v937_v46  ;;  %v7157_v51 = vmul.f32 %v6559_v20, %v7032_v15 }
 0x19b   : > { %v7165_v10 = vsel %vm1844_vm8, %v9220_v30, %v9219_v23  ;;  %v9222_v35 = vrot.slane %v6871_v19, 7 }
 0x19c   : > { %9215 = vst [vmem:[#allocation96_spill] sm:$0xff] %v7139_v29  ;;  %9217 = vst [vmem:[#allocation97_spill] sm:$0xff] %v7152_v55  ;;  %v1843_v6 = vrot.slane %v7139_v29, 7  ;;  %v2036_v46 = vrot.slane %v7139_v29, 1  ;;  %v1958_v0 = vmul.f32 0.0, %v7139_v29  ;;  %v7180_v11 = vmax.f32 %v976_v4, 0.0 }
 0x19d   : > { %9218 = vst [vmem:[#allocation98_spill] sm:$0xff] %v7157_v51  ;;  %v7173_v45 = vsel %vm1844_vm8, %v9222_v35, %v9221_v3  ;;  %v7190_v3 = vpack.c.bf16 %v6871_v19, %v6838_v14  ;;  %v9225_v35 = vrot.slane %v7109_v5, 1  ;;  %v9227_v4 = vrot.slane %v6684_v63, 1 }
 0x19e   : > { %v7186_v23 = vmul.f32 %v6571_v26, %v7173_v45  ;;  %v1989_v30 = vpack.c.bf16 %v1958_v0, %v1957_v36  ;;  %v9229_v51 = vrot.slane %v6684_v63, 7  ;;  %v8965_v20 = vrot.slane %v7180_v11, 7 }
 0x19f   : > { %9224 = vst [vmem:[#allocation100_spill] sm:$0xff] %v7190_v3  ;;  %v7196_v29 = vsel %vm2037_vm12, %v9225_v35, %v2036_v46  ;;  %v7202_v53 = vsel %vm2037_vm12, %v2036_v46, %v9227_v4  ;;  %v7219_v0 = vsel %vm1844_vm8, %v1842_v18, %v1843_v6  ;;  %v7227_v4 = vmax.f32 %v972_v47, 0.0 }
 0x1a0   : > { %9223 = vst [vmem:[#allocation99_spill] sm:$0xff] %v7186_v23  ;;  %9226 = vst [vmem:[#allocation101_spill] sm:$0xff] %v7196_v29  ;;  %v7208_v55 = vsel %vm1844_vm8, %v1843_v6, %v9229_v51  ;;  %v2102_v22 = vmul.f32 0.0, %v7196_v29  ;;  %3078 = vmatprep.mubr.bf16.mxu1 %v1989_v30  ;;  %v2103_v46 = vmul.f32 %v6568_v25, %v7202_v53  ;;  %v5749_v30 = vld [vmem:[#allocation7 + $0x1b8] sm:$0xff]   ;;  %v9232_v6 = vrot.slane %v6931_v54, 1 }
 0x1a1   : > { %9228 = vst [vmem:[#allocation102_spill] sm:$0xff] %v7202_v53  ;;  %9230 = vst [vmem:[#allocation103_spill] sm:$0xff] %v7208_v55  ;;  %v2150_v35 = vmul.f32 %v6477_v33, %v7208_v55  ;;  %v7223_v36 = vmul.f32 %v6490_v48, %v7208_v55  ;;  %v7234_v25 = vsel %vm1844_vm8, %v8965_v20, %v1842_v18  ;;  %v9233_v3 = vrot.slane %v6871_v19, 1  ;;  %v5741_v29 = vld [vmem:[#allocation7 + $0x138] sm:$0xff]   ;;  %v5742_v55 = vld [vmem:[#allocation7 + $0x170] sm:$0xff]  }
 0x1a2   : > { %9231 = vst [vmem:[#allocation104_spill] sm:$0xff] %v7219_v0  ;;  %v2134_v51 = vpack.c.bf16 %v2103_v46, %v2102_v22  ;;  %v1909_v47 = vmul.f32 %v6586_v41, %v7234_v25  ;;  %v9235_v18 = vrot.slane %v6838_v14, 1  ;;  %v7261_v22 = vmul.f32 %v6571_v26, %v7107_v37 }
 0x1a3   : > { %v2182_v33 = vpack.c.bf16 %v6762_v12, %v2150_v35  ;;  %v7242_v48 = vsel %vm2037_vm12, %v9233_v3, %v9232_v6  ;;  %v1910_v35 = vmul.f32 0.0, %v7219_v0  ;;  %v9234_v23 = vmov %v9233_v3  ;;  %v5759_v0 = vld [vmem:[#allocation7 + $0x108] sm:$0xff]  }
 0x1a4   : > { %v7253_v20 = vsel %vm2037_vm12, %v9235_v18, %v9234_v23  ;;  %v7257_v3 = vmul.f32 %v6589_v42, %v7242_v48  ;;  %9237 = vst [vmem:[#allocation106_spill] sm:$0xff] %v7261_v22  ;;  %v9238_v41 = vrot.slane %v6937_v1, 7  ;;  %v9239_v19 = vrot.slane %v6917_v13, 7 }
 0x1a5   : > { %3239 = vmatprep.mubr.bf16.mxu0 %v2182_v33  ;;  %v9241_v46 = vrot.slane %v6958_v16, 7  ;;  %v1941_v6 = vpack.c.bf16 %v1910_v35, %v1909_v47  ;;  %v9245_v47 = vpack.c.bf16 %v6713_v31, %v6745_v62  ;;  %v9247_v42 = vrot.slane %v6931_v54, 1  ;;  %v5743_v62 = vld [vmem:[#allocation7 + $0x130] sm:$0xff]  }
 0x1a6   : > { %9236 = vst [vmem:[#allocation105_spill] sm:$0xff] %v7257_v3  ;;  %v7269_v14 = vsel %vm1844_vm8, %v9239_v19, %v9238_v41  ;;  %v9240_v23 = vmov %v9239_v19  ;;  %3240 = vmatmul.mubr.bf16.vlgmr.msra.gmra.mxu0 %v2134_v51  ;;  %v9243_v41 = vrot.slane %v6917_v13, 1  ;;  %v9244_v19 = vrot.slane %v6958_v16, 1  ;;  %v5755_v3 = vld [vmem:[#allocation7 + $0x110] sm:$0xff]  }
 0x1a7   : > { %v7277_v33 = vsel %vm1844_vm8, %v9241_v46, %v9240_v23  ;;  %v5752_v23 = vld [vmem:[#allocation7 + $0x1f0] sm:$0xff]   ;;  %3247 = vmatprep.mubr.bf16.mxu0 %v9245_v47  ;;  %5231 = vmatpush3.bf16.msra.mxu0 %v5749_v30  ;;  %v7317_v47 = vmul.f32 %v6592_v9, %v7173_v45  ;;  %v9251_v46 = vrot.slane %v7046_v61, 7  ;;  %v9252_v35 = vrot.slane %v7001_v8, 7 }
 0x1a8   : > { %v7283_v53 = vmul.f32 %v6592_v9, %v7277_v33  ;;  %v7291_v26 = vsel %vm2037_vm12, %v9244_v19, %v9243_v41  ;;  %v9246_v18 = vmov %v9244_v19  ;;  %v5753_v19 = vld [vmem:[#allocation7 + $0x1b0] sm:$0xff]   ;;  %3079 = vmatmul.mubr.bf16.vlgmr.msra.gmra.mxu1 %v1941_v6  ;;  %v5756_v6 = vld [vmem:[#allocation7 + $0x1e8] sm:$0xff]   ;;  %v9254_v22 = vrot.slane %v6937_v1, 7  ;;  %5232 = vmatprep.subr.bf16.mxu0 %v5752_v23 }
 0x1a9   : > { %v7307_v41 = vsel %vm2037_vm12, %v9247_v42, %v9246_v18  ;;  %v7313_v30 = vmul.f32 %v6608_v39, %v7291_v26  ;;  %9250 = vst [vmem:[#allocation110_spill] sm:$0xff] %v7317_v47  ;;  %v7325_v42 = vsel %vm1844_vm8, %v9252_v35, %v9251_v46  ;;  %5119 = vmatpush3.bf16.msra.mxu1 %v5741_v29  ;;  %v9257_v46 = vrot.slane %v6937_v1, 1 }
 0x1aa   : > { %9242 = vst [vmem:[#allocation107_spill] sm:$0xff] %v7283_v53  ;;  %9248 = vst [vmem:[#allocation108_spill] sm:$0xff] %v7307_v41  ;;  %3086 = vmatprep.mubr.bf16.mxu1 %v6727_v38  ;;  %v9253_v51 = vmov %v9252_v35  ;;  %v7339_v54 = vpack.c.bf16 %v6937_v1, %v6917_v13  ;;  %v9256_v35 = vrot.slane %v7001_v8, 1  ;;  %v7350_v18 = vmax.f32 %v7112_v2, 0.0  ;;  %5120 = vmatprep.subr.bf16.mxu1 %v5742_v55  ;;  %v5744_v38 = vld [vmem:[#allocation7 + $0x168] sm:$0xff]  }
 0x1ab   : > { %9249 = vst [vmem:[#allocation109_spill] sm:$0xff] %v7313_v30  ;;  %v7335_v16 = vsel %vm1844_vm8, %v9254_v22, %v9253_v51  ;;  %5233 = vmatpush3.bf16.msra.mxu0 %v5753_v19  ;;  %v7374_v51 = vmul.f32 %v6617_v59, %v7277_v33  ;;  %v9263_v22 = vrot.slane %v7014_v7, 7  ;;  %v9264_v23 = vrot.slane %v6984_v49, 7  ;;  %v9271_v19 = vld [vmem:[#allocation42_spill] sm:$0xff] }
 0x1ac   : > { %9255 = vst [vmem:[#allocation111_spill] sm:$0xff] %v7339_v54  ;;  %v7347_v29 = vsel %vm2037_vm12, %v9257_v46, %v9256_v35  ;;  %v7358_v54 = vmul.f32 %v6617_v59, %v7335_v16  ;;  %v9259_v35 = vmov %v9257_v46  ;;  %v9260_v46 = vrot.slane %v6917_v13, 1  ;;  %v5757_v13 = vld [vmem:[#allocation7 + $0x1a8] sm:$0xff]   ;;  %5234 = vmatprep.subr.bf16.mxu0 %v5756_v6  ;;  %v9275_v59 = vld [vmem:[#allocation39_spill] sm:$0xff] }
 0x1ad   : > { %v7370_v2 = vmul.f32 %v6622_v60, %v7347_v29  ;;  %9262 = vst [vmem:[#allocation114_spill] sm:$0xff] %v7374_v51  ;;  %v7382_v1 = vsel %vm1844_vm8, %v9264_v23, %v9263_v22  ;;  %v7396_v30 = vpack.c.bf16 %v7046_v61, %v7001_v8  ;;  %v9269_v53 = vrot.slane %v6984_v49, 1  ;;  %5121 = vmatpush3.bf16.msra.mxu1 %v5743_v62 }
 0x1ae   : > { %9258 = vst [vmem:[#allocation112_spill] sm:$0xff] %v7358_v54  ;;  %v7366_v55 = vsel %vm2037_vm12, %v9260_v46, %v9259_v35  ;;  %9265 = vst [vmem:[#allocation115_spill] sm:$0xff] %v7382_v1  ;;  %v9266_v35 = vmov %v9264_v23  ;;  %v9267_v46 = vrot.slane %v7046_v61, 7  ;;  %v9270_v22 = vrot.slane %v7046_v61, 1  ;;  %5122 = vmatprep.subr.bf16.mxu1 %v5744_v38  ;;  %v9286_v38 = vld [vmem:[#allocation59_spill] sm:$0xff] }
 0x1af   : > { %9261 = vst [vmem:[#allocation113_spill] sm:$0xff] %v7370_v2  ;;  %9268 = vst [vmem:[#allocation116_spill] sm:$0xff] %v7396_v30  ;;  %v9272_v54 = vand.u32 15, %v9271_v19  ;;  %v9278_v6 = vrot.slane %v7001_v8, 1  ;;  %v1840_v62 = vrot.slane %v7350_v18, 7  ;;  %v9280_v19 = vpack.c.bf16 %v6769_v40, %v6783_v27  ;;  %v9281_v30 = vld [vmem:[#allocation40_spill] sm:$0xff]  ;;  %5235 = vmatpush3.bf16.msra.mxu0 %v5757_v13 }
 0x1b0   : > { %v7392_v47 = vsel %vm1844_vm8, %v9267_v46, %v9266_v35  ;;  %v7404_v23 = vsel %vm2037_vm12, %v9270_v22, %v9269_v53  ;;  %v5745_v35 = vld [vmem:[#allocation7 + $0x128] sm:$0xff]   ;;  %v9277_v53 = vmov %v9270_v22  ;;  %v5746_v22 = vld [vmem:[#allocation7 + $0x160] sm:$0xff]   ;;  %v7438_v61 = vmul.f32 %v9275_v59, %v7335_v16  ;;  %v9293_v40 = vld [vmem:[#allocation41_spill] sm:$0xff] }
 0x1b1   : > { %vm7408_vm0 = vcmp.ge.s32.totalorder %v9272_v54, 1  ;;  %v7418_v41 = vmul.f32 %v9275_v59, %v7392_v47  ;;  %v7426_v54 = vsel %vm2037_vm12, %v9278_v6, %v9277_v53  ;;  %3248 = vmatmul.mubr.bf16.gmra.mxu0 %v9280_v19  ;;  %v7434_v46 = vmul.f32 %v9281_v30, %v7404_v23  ;;  %v9287_v19 = vld [vmem:[#allocation61_spill] sm:$0xff]  ;;  %5123 = vmatpush3.bf16.msra.mxu1 %v5745_v35 }
 0x1b2   : > { %9279 = vst [vmem:[#allocation117_spill] sm:$0xff] %v7426_v54  ;;  %9283 = vst [vmem:[#allocation119_spill] sm:$0xff] %v7438_v61  ;;  %v9284_v8 = vrot.slane %v7227_v4, 7  ;;  %v9285_v53 = vrot.slane %v7090_v21, 7  ;;  %v9288_v27 = vpack.c.bf16 %v9286_v38, %v9287_v19  ;;  %v9290_v59 = vrot.slane %v7014_v7, 7  ;;  %v5747_v19 = vld [vmem:[#allocation7 + $0x120] sm:$0xff]   ;;  %5124 = vmatprep.subr.bf16.mxu1 %v5746_v22 }
 0x1b3   : > { %9276 = vst [vmem:[#allocation42_spill] sm:$0xff] %v7418_v41  ;;  %9282 = vst [vmem:[#allocation118_spill] sm:$0xff] %v7434_v46  ;;  %v9297_v41 = vld [vmem:[#allocation52_spill] sm:$0xff]  ;;  %v9299_v61 = vrot.slane %v6984_v49, 1  ;;  %v7523_v22 = vpack.c.bf16 %v7227_v4, %v7090_v21  ;;  %v9315_v35 = vrot.slane %v7090_v21, 1  ;;  %v7573_v1 = vpack.c.bf16 %v7092_v56, %v7070_v32 }
 0x1b4   : > { %v7446_v6 = vsel %vm1844_vm8, %v9285_v53, %v9284_v8  ;;  %3255 = vmatprep.mubr.bf16.mxu0 %v9288_v27  ;;  %v9289_v2 = vmov %v9285_v53  ;;  %v7464_v8 = vpack.c.bf16 %v7014_v7, %v6984_v49  ;;  %v5760_v53 = vld [vmem:[#allocation7 + $0x1e0] sm:$0xff]   ;;  %v9292_v27 = vpack.c.bf16 %v6762_v12, %v7223_v36  ;;  %v9301_v12 = vld [vmem:[#allocation44_spill] sm:$0xff] }
 0x1b5   : > { %v7460_v30 = vsel %vm1844_vm8, %v9290_v59, %v9289_v2  ;;  %v9295_v2 = vrot.slane %v7090_v21, 1  ;;  %v5761_v36 = vld [vmem:[#allocation7 + $0x1a0] sm:$0xff]   ;;  %v9305_v49 = vrot.slane %v7070_v32, 7  ;;  %9308 = vst [vmem:[#allocation124_spill] sm:$0xff] %v7523_v22  ;;  %5236 = vmatprep.subr.bf16.mxu0 %v5760_v53  ;;  %v5765_v21 = vld [vmem:[#allocation7 + $0x198] sm:$0xff]   ;;  %5125 = vmatpush3.bf16.msra.mxu1 %v5747_v19  ;;  %9321 = vst [vmem:[#allocation129_spill] sm:$0xff] %v7573_v1 }
 0x1b6   : > { %9291 = vst [vmem:[#allocation61_spill] sm:$0xff] %v7464_v8  ;;  %3087 = vmatmul.mubr.bf16.gmra.mxu1 %v9292_v27  ;;  %v7475_v59 = vmul.f32 %v9293_v40, %v7460_v30  ;;  %v9296_v8 = vrot.slane %v7014_v7, 1  ;;  %v9304_v7 = vrot.slane %v7092_v56, 7  ;;  %v9307_v27 = vrot.slane %v7227_v4, 7  ;;  %5237 = vmatpush3.bf16.msra.mxu0 %v5761_v36  ;;  %v9325_v1 = vld [vmem:[#allocation47_spill] sm:$0xff] }
 0x1b7   : > { %3094 = vmatprep.mubr.bf16.mxu1 %v9297_v41  ;;  %v9323_v36 = vrot.slane %v7092_v56, 1  ;;  %v9324_v53 = vpack.c.bf16 %v6829_v58, %v6738_v57  ;;  %v9331_v58 = vld [vmem:[#allocation67_spill] sm:$0xff]  ;;  %v9335_v57 = vld [vmem:[#allocation48_spill] sm:$0xff] }
 0x1b8   : > { %9294 = vst [vmem:[#allocation120_spill] sm:$0xff] %v7475_v59  ;;  %v7483_v13 = vsel %vm2037_vm12, %v9296_v8, %v9295_v2  ;;  %v9298_v51 = vmov %v9296_v8  ;;  %v7501_v8 = vmul.f32 %v9293_v40, %v7392_v47  ;;  %v5750_v2 = vld [vmem:[#allocation7 + $0x158] sm:$0xff]   ;;  %v9311_v40 = vrot.slane %v7070_v32, 1 }
 0x1b9   : > { %v7493_v46 = vsel %vm2037_vm12, %v9299_v61, %v9298_v51  ;;  %v7497_v54 = vmul.f32 %v9301_v12, %v7483_v13  ;;  %v7511_v51 = vsel %vm1844_vm8, %v9305_v49, %v9304_v7  ;;  %v9306_v61 = vmov %v9305_v49  ;;  %v9309_v7 = vld [vmem:[#allocation45_spill] sm:$0xff]  ;;  %3256 = vmatmul.mubr.bf16.gmra.mxu0 %v9324_v53 }
 0x1ba   : > { %9300 = vst [vmem:[#allocation121_spill] sm:$0xff] %v7493_v46  ;;  %9303 = vst [vmem:[#allocation123_spill] sm:$0xff] %v7501_v8  ;;  %v7519_v41 = vsel %vm1844_vm8, %v9307_v27, %v9306_v61  ;;  %v9312_v12 = vrot.slane %v7227_v4, 1  ;;  %v5763_v61 = vld [vmem:[#allocation7 + $0x1d8] sm:$0xff]   ;;  %v7555_v46 = vmul.f32 %v9309_v7, %v7460_v30  ;;  %5126 = vmatprep.subr.bf16.mxu1 %v5750_v2  ;;  %v9333_v53 = vrot.slane %v7092_v56, 1 }
 0x1bb   : > { %9302 = vst [vmem:[#allocation122_spill] sm:$0xff] %v7497_v54  ;;  %v7531_v49 = vmul.f32 %v9309_v7, %v7519_v41  ;;  %v9316_v8 = vld [vmem:[#allocation46_spill] sm:$0xff]  ;;  %v9332_v2 = vpack.c.bf16 %v6796_v52, %v9331_v58  ;;  %5238 = vmatprep.subr.bf16.mxu0 %v5763_v61  ;;  %v7632_v61 = vpack.c.bf16 %v7180_v11, %v7350_v18 }
 0x1bc   : > { %v7539_v27 = vsel %vm2037_vm12, %v9312_v12, %v9311_v40  ;;  %v9314_v22 = vmov %v9312_v12  ;;  %9318 = vst [vmem:[#allocation128_spill] sm:$0xff] %v7555_v46  ;;  %v9319_v12 = vrot.slane %v7180_v11, 7  ;;  %v5751_v4 = vld [vmem:[#allocation7 + $0x118] sm:$0xff]   ;;  %5239 = vmatpush3.bf16.msra.mxu0 %v5765_v21  ;;  %v9345_v21 = vrot.slane %v7109_v5, 1 }
 0x1bd   : > { %9310 = vst [vmem:[#allocation125_spill] sm:$0xff] %v7531_v49  ;;  %9313 = vst [vmem:[#allocation126_spill] sm:$0xff] %v7539_v27  ;;  %v7547_v59 = vsel %vm2037_vm12, %v9315_v35, %v9314_v22  ;;  %v7551_v54 = vmul.f32 %v9316_v8, %v7539_v27  ;;  %v9320_v35 = vrot.slane %v7092_v56, 7  ;;  %v5754_v49 = vld [vmem:[#allocation7 + $0x150] sm:$0xff]   ;;  %v9327_v27 = vld [vmem:[#allocation24_spill] sm:$0xff]  ;;  %3263 = vmatprep.mubr.bf16.mxu0 %v9332_v2  ;;  %5127 = vmatpush3.bf16.msra.mxu1 %v5751_v4 }
 0x1be   : > { %v7561_v40 = vsel %vm1844_vm8, %v1840_v62, %v9319_v12  ;;  %v9322_v12 = vrot.slane %v7350_v18, 1  ;;  %v5766_v8 = vld [vmem:[#allocation7 + $0x1d0] sm:$0xff]   ;;  %v9339_v56 = vld [vmem:[#allocation64_spill] sm:$0xff]  ;;  %5128 = vmatprep.subr.bf16.mxu1 %v5754_v49 }
 0x1bf   : > { %9317 = vst [vmem:[#allocation127_spill] sm:$0xff] %v7551_v54  ;;  %v7569_v22 = vsel %vm1844_vm8, %v9320_v35, %v1840_v62  ;;  %v9334_v62 = vrot.slane %v7070_v32, 1  ;;  %v9340_v32 = vpack.c.bf16 %v6713_v31, %v9339_v56  ;;  %9342 = vst [vmem:[#allocation64_spill] sm:$0xff] %v7632_v61  ;;  %v9343_v54 = vld [vmem:[#allocation71_spill] sm:$0xff]  ;;  %v9346_v31 = vrot.slane %v7180_v11, 1  ;;  %v5768_v4 = vld [vmem:[#allocation7 + $0x1c8] sm:$0xff]   ;;  %5240 = vmatprep.subr.bf16.mxu0 %v5766_v8 }
 0x1c0   : > { %v7581_v19 = vsel %vm2037_vm12, %v9323_v36, %v9322_v12  ;;  %v7592_v7 = vmul.f32 %v9325_v1, %v7569_v22  ;;  %v9328_v12 = vand.u32 15, %v9327_v27  ;;  %v7617_v27 = vmul.f32 %v9325_v1, %v7519_v41  ;;  %v5758_v61 = vld [vmem:[#allocation7 + $0x148] sm:$0xff]   ;;  %v9354_v56 = vld [vmem:[#allocation69_spill] sm:$0xff] }
 0x1c1   : > { %v7609_v35 = vsel %vm2037_vm12, %v9334_v62, %v9333_v53  ;;  %v7613_v46 = vmul.f32 %v9335_v57, %v7581_v19  ;;  %3095 = vmatmul.mubr.bf16.gmra.mxu1 %v9340_v32  ;;  %v5767_v53 = vld [vmem:[#allocation7 + $0x190] sm:$0xff]   ;;  %v9347_v32 = vmov %v9346_v31  ;;  %v9348_v36 = vrot.slane %v7350_v18, 1  ;;  %v9356_v18 = vld [vmem:[#allocation66_spill] sm:$0xff] }
 0x1c2   : > { %9326 = vst [vmem:[#allocation47_spill] sm:$0xff] %v7592_v7  ;;  %vm7596_vm1 = vcmp.lt.s32.totalorder %v9328_v12, 15  ;;  %9337 = vst [vmem:[#allocation67_spill] sm:$0xff] %v7617_v27  ;;  %v9338_v12 = vmov 0.0   ;;  %3102 = vmatprep.mubr.bf16.mxu1 %v9343_v54  ;;  %v7650_v54 = vsel %vm2037_vm12, %v9346_v31, %v9345_v21  ;;  %v9351_v31 = vld [vmem:[#allocation57_spill] sm:$0xff]  ;;  %v9352_v21 = vld [vmem:[#allocation26_spill] sm:$0xff]  ;;  %5241 = vmatpush3.bf16.msra.mxu0 %v5767_v53  ;;  %v1945_v11 = vpack.c.bf16 %v6796_v52, %v6989_v28 }
 0x1c3   : > { %9336 = vst [vmem:[#allocation24_spill] sm:$0xff] %v7613_v46  ;;  %v4754_v58 = vsel %vm7408_vm0, 1.0, %v9338_v12  ;;  %v7642_v62 = vsel %vm7596_vm1, 1.0, %v9338_v12  ;;  %v7660_v12 = vsel %vm2037_vm12, %v9348_v36, %v9347_v32  ;;  %v1915_v49 = vmul.f32 %v9352_v21, %v9351_v31  ;;  %v9355_v8 = vld [vmem:[#allocation77_spill] sm:$0xff]  ;;  %5129 = vmatpush3.bf16.msra.mxu1 %v5755_v3  ;;  %5242 = vmatprep.subr.bf16.mxu0 %v5768_v4  ;;  %v9361_v3 = vld [vmem:[#allocation74_spill] sm:$0xff]  ;;  %v9363_v4 = vld [vmem:[#allocation56_spill] sm:$0xff] }
 0x1c4   : > { %v7628_v2 = vmul.f32 %v4754_v58, %v7234_v25  ;;  %9344 = vst [vmem:[#allocation130_spill] sm:$0xff] %v7642_v62  ;;  %9349 = vst [vmem:[#allocation131_spill] sm:$0xff] %v7660_v12  ;;  %v7664_v27 = vmul.f32 %v7642_v62, %v7650_v54  ;;  %v7669_v46 = vmul.f32 %v4754_v58, %v7569_v22  ;;  %v9357_v32 = vld [vmem:[#allocation25_spill] sm:$0xff]  ;;  %v9359_v62 = vld [vmem:[#allocation78_spill] sm:$0xff]  ;;  %5130 = vmatprep.subr.bf16.mxu1 %v5758_v61 }
 0x1c5   : > { %v7677_v36 = vmul.f32 %v9357_v32, %v9356_v18  ;;  %v1944_v7 = vpack.c.bf16 %v9286_v38, %v1915_v49  ;;  %v5770_v12 = vld [vmem:[#allocation7 + $0x1c0] sm:$0xff]   ;;  %v9362_v49 = vpack.c.bf16 %v6891_v44, %v9361_v3  ;;  %v9367_v28 = vld [vmem:[#allocation29_spill] sm:$0xff]  ;;  %v9370_v38 = vld [vmem:[#allocation28_spill] sm:$0xff] }
 0x1c6   : > { %9341 = vst [vmem:[#allocation48_spill] sm:$0xff] %v7628_v2  ;;  %9350 = vst [vmem:[#allocation132_spill] sm:$0xff] %v7664_v27  ;;  %v2137_v2 = vpack.c.bf16 %v9355_v8, %v9354_v56  ;;  %v9360_v8 = vld [vmem:[#allocation84_spill] sm:$0xff]  ;;  %v5762_v27 = vld [vmem:[#allocation7 + $0x140] sm:$0xff]   ;;  %5243 = vmatpush3.bf16.msra.mxu0 %v5769_v17 }
 0x1c7   : > { %9353 = vst [vmem:[#allocation26_spill] sm:$0xff] %v7669_v46  ;;  %9358 = vst [vmem:[#allocation77_spill] sm:$0xff] %v7677_v36  ;;  %v2138_v53 = vpack.c.bf16 %v9360_v8, %v9359_v62  ;;  %v9364_v32 = vld [vmem:[#allocation63_spill] sm:$0xff]  ;;  %v9366_v62 = vld [vmem:[#allocation85_spill] sm:$0xff]  ;;  %5131 = vmatpush3.bf16.msra.mxu1 %v5759_v0  ;;  %5244 = vmatprep.subr.bf16.mxu0 %v5770_v12 }
 0x1c8   : > { %3264 = vmatmul.mubr.bf16.gmra.mxu0 %v2137_v2  ;;  %v7693_v31 = vpack.c.bf16 %v9364_v32, %v9363_v4  ;;  %v9365_v2 = vld [vmem:[#allocation72_spill] sm:$0xff]  ;;  %v7701_v61 = vmul.f32 %v9367_v28, %v9366_v62  ;;  %v9369_v52 = vld [vmem:[#allocation81_spill] sm:$0xff]  ;;  %v5771_v3 = vld [vmem:[#allocation7 + $0x180] sm:$0xff]   ;;  %5132 = vmatprep.subr.bf16.mxu1 %v5762_v27 }
 0x1c9   : > { %3271 = vmatprep.mubr.bf16.mxu0 %v9362_v49  ;;  %v7697_v8 = vmul.f32 %v9352_v21, %v9365_v2  ;;  %v7705_v46 = vmul.f32 %v9370_v38, %v9369_v52  ;;  %3103 = vmatmul.mubr.bf16.gmra.mxu1 %v1944_v7  ;;  %v9372_v49 = vld [vmem:[#allocation91_spill] sm:$0xff]  ;;  %v9375_v32 = vld [vmem:[#allocation30_spill] sm:$0xff]  ;;  %v9377_v21 = vld [vmem:[#allocation33_spill] sm:$0xff]  ;;  %v2292_v52 = vmul.f32 0.0, %v4754_v58  ;;  %v7735_v7 = vmul.f32 0.0, %v6684_v63 }
 0x1ca   : > { %9368 = vst [vmem:[#allocation66_spill] sm:$0xff] %v7701_v61  ;;  %v9373_v18 = vld [vmem:[#allocation31_spill] sm:$0xff]  ;;  %v7713_v4 = vmul.f32 %v9375_v32, %v7032_v15  ;;  %v7717_v2 = vmul.f32 %v9377_v21, %v7128_v24  ;;  %v9380_v17 = vld [vmem:[#allocation88_spill] sm:$0xff]  ;;  %v7726_v15 = vld [vmem:[#allocation7 + $0x238] sm:$0xff]   ;;  %5245 = vmatpush3.bf16.msra.mxu0 %v5771_v3 }
 0x1cb   : > { %9371 = vst [vmem:[#allocation84_spill] sm:$0xff] %v7705_v46  ;;  %v7709_v56 = vmul.f32 %v9373_v18, %v9372_v49  ;;  %v9379_v36 = vld [vmem:[#allocation75_spill] sm:$0xff]  ;;  %v9381_v28 = vld [vmem:[#allocation80_spill] sm:$0xff]  ;;  %9383 = vst [vmem:[#allocation72_spill] sm:$0xff] %v7735_v7 }
 0x1cc   : > { %9376 = vst [vmem:[#allocation56_spill] sm:$0xff] %v7713_v4  ;;  %9378 = vst [vmem:[#allocation63_spill] sm:$0xff] %v7717_v2  ;;  %3110 = vmatprep.mubr.bf16.mxu1 %v9379_v36  ;;  %v5764_v38 = vld [vmem:[#allocation7 + $0x100] sm:$0xff]   ;;  %v9382_v32 = vld [vmem:[#allocation92_spill] sm:$0xff] }
 0x1cd   : > { %9374 = vst [vmem:[#allocation74_spill] sm:$0xff] %v7709_v56  ;;  %v9384_v18 = vld [vmem:[#allocation32_spill] sm:$0xff]  ;;  %v9386_v27 = vld [vmem:[#allocation35_spill] sm:$0xff]  ;;  %v9388_v49 = vld [vmem:[#allocation34_spill] sm:$0xff]  ;;  %5133 = vmatpush3.bf16.msra.mxu1 %v5764_v38 }
 0x1ce   : > { %v7739_v61 = vmul.f32 %v9384_v18, %v7107_v37  ;;  %v7743_v12 = vmul.f32 %v9386_v27, %v7242_v48  ;;  %v7747_v21 = vmul.f32 %v9388_v49, %v7173_v45  ;;  %v9390_v0 = vld [vmem:[#allocation37_spill] sm:$0xff]  ;;  %v9392_v63 = vld [vmem:[#allocation36_spill] sm:$0xff]  ;;  %v7759_v37 = vmul.f32 %v6608_v39, %v7347_v29  ;;  %5462 = vmatprep.subr.bf16.mxu1 %v7726_v15  ;;  %v9398_v3 = vld [vmem:[#allocation43_spill] sm:$0xff] }
 0x1cf   : > { %v7751_v4 = vmul.f32 %v9390_v0, %v7291_v26  ;;  %v7755_v58 = vmul.f32 %v9392_v63, %v7277_v33  ;;  %v7763_v18 = vmul.f32 %v6592_v9, %v7335_v16  ;;  %v7767_v45 = vmul.f32 %v6622_v60, %v7404_v23  ;;  %v9397_v63 = vld [vmem:[#allocation108_spill] sm:$0xff]  ;;  %v9400_v49 = vld [vmem:[#allocation83_spill] sm:$0xff]  ;;  %v9402_v2 = vld [vmem:[#allocation117_spill] sm:$0xff] }
 0x1d0   : > { %9385 = vst [vmem:[#allocation85_spill] sm:$0xff] %v7739_v61  ;;  %9387 = vst [vmem:[#allocation81_spill] sm:$0xff] %v7743_v12  ;;  %3272 = vmatmul.mubr.bf16.gmra.mxu0 %v2138_v53  ;;  %v7785_v33 = vmul.f32 0.0, %v9398_v3  ;;  %v9404_v9 = vld [vmem:[#allocation40_spill] sm:$0xff]  ;;  %v9406_v38 = vld [vmem:[#allocation39_spill] sm:$0xff]  ;;  %v7841_v61 = vmul.f32 %v9335_v57, %v7650_v54 }
 0x1d1   : > { %9389 = vst [vmem:[#allocation28_spill] sm:$0xff] %v7747_v21  ;;  %9391 = vst [vmem:[#allocation30_spill] sm:$0xff] %v7751_v4  ;;  %v9401_v21 = vpack.c.bf16 %v9381_v28, %v9400_v49  ;;  %v9403_v4 = vld [vmem:[#allocation38_spill] sm:$0xff]  ;;  %v7798_v16 = vmul.f32 %v9404_v9, %v7483_v13  ;;  %3111 = vmatmul.mubr.bf16.gmra.mxu1 %v1945_v11  ;;  %v9429_v7 = vld [vmem:[#allocation101_spill] sm:$0xff] }
 0x1d2   : > { %9393 = vst [vmem:[#allocation75_spill] sm:$0xff] %v7755_v58  ;;  %9394 = vst [vmem:[#allocation88_spill] sm:$0xff] %v7759_v37  ;;  %v7794_v12 = vmul.f32 %v9403_v4, %v7392_v47  ;;  %v9408_v3 = vld [vmem:[#allocation126_spill] sm:$0xff]  ;;  %v9409_v37 = vld [vmem:[#allocation44_spill] sm:$0xff]  ;;  %3118 = vmatprep.mubr.bf16.mxu1 %v7693_v31 }
 0x1d3   : > { %9395 = vst [vmem:[#allocation80_spill] sm:$0xff] %v7763_v18  ;;  %9396 = vst [vmem:[#allocation92_spill] sm:$0xff] %v7767_v45  ;;  %3279 = vmatprep.mubr.bf16.mxu0 %v9401_v21  ;;  %v7802_v18 = vmul.f32 %v9406_v38, %v7460_v30  ;;  %v7806_v49 = vmul.f32 %v9409_v37, %v9408_v3  ;;  %v9411_v21 = vld [vmem:[#allocation41_spill] sm:$0xff]  ;;  %v9413_v47 = vld [vmem:[#allocation46_spill] sm:$0xff] }
 0x1d4   : > { %9399 = vst [vmem:[#allocation32_spill] sm:$0xff] %v7785_v33  ;;  %9405 = vst [vmem:[#allocation35_spill] sm:$0xff] %v7798_v16  ;;  %v7810_v53 = vmul.f32 %v9411_v21, %v7519_v41  ;;  %v7814_v4 = vmul.f32 %v9413_v47, %v7581_v19  ;;  %v9415_v45 = vld [vmem:[#allocation45_spill] sm:$0xff]  ;;  %v9417_v30 = vld [vmem:[#allocation115_spill] sm:$0xff] }
 0x1d5   : > { %9407 = vst [vmem:[#allocation34_spill] sm:$0xff] %v7802_v18  ;;  %9410 = vst [vmem:[#allocation37_spill] sm:$0xff] %v7806_v49  ;;  %v7818_v58 = vmul.f32 %v9415_v45, %v7569_v22  ;;  %v9418_v38 = vld [vmem:[#allocation121_spill] sm:$0xff]  ;;  %v9419_v21 = vld [vmem:[#allocation96_spill] sm:$0xff] }
 0x1d6   : > { %9412 = vst [vmem:[#allocation36_spill] sm:$0xff] %v7810_v53  ;;  %9414 = vst [vmem:[#allocation108_spill] sm:$0xff] %v7814_v4  ;;  %v7829_v56 = vpack.c.bf16 %v9419_v21, %v7109_v5  ;;  %v7845_v5 = vmul.f32 %v9325_v1, %v7234_v25  ;;  %v9421_v46 = vld [vmem:[#allocation102_spill] sm:$0xff]  ;;  %v9424_v4 = vld [vmem:[#allocation103_spill] sm:$0xff] }
 0x1d7   : > { %9416 = vst [vmem:[#allocation43_spill] sm:$0xff] %v7818_v58  ;;  %v9422_v41 = vld [vmem:[#allocation130_spill] sm:$0xff]  ;;  %v7857_v11 = vmul.f32 %v2292_v52, %v9424_v4  ;;  %v9425_v58 = vld [vmem:[#allocation27_spill] sm:$0xff]  ;;  %v9428_v1 = vld [vmem:[#allocation104_spill] sm:$0xff] }
 0x1d8   : > { %9420 = vst [vmem:[#allocation83_spill] sm:$0xff] %v7829_v56  ;;  %v7851_v22 = vmul.f32 %v9422_v41, %v9421_v46  ;;  %v9423_v56 = vld [vmem:[#allocation55_spill] sm:$0xff]  ;;  %v7861_v53 = vmul.f32 %v9425_v58, %v9366_v62  ;;  %v9431_v18 = vld [vmem:[#allocation29_spill] sm:$0xff]  ;;  %v9432_v16 = vld [vmem:[#allocation86_spill] sm:$0xff]  ;;  %v7895_v62 = vmul.f32 %v9386_v27, %v7291_v26  ;;  %v7914_v26 = vmul.f32 %v9404_v9, %v9408_v3 }
 0x1d9   : > { %v7854_v45 = vmul.f32 0.0, %v9423_v56  ;;  %v9427_v49 = vld [vmem:[#allocation131_spill] sm:$0xff]  ;;  %v9433_v52 = vpack.c.bf16 %v9432_v16, %v9380_v17  ;;  %v9434_v25 = vld [vmem:[#allocation89_spill] sm:$0xff]  ;;  %v9447_v27 = vld [vmem:[#allocation90_spill] sm:$0xff] }
 0x1da   : > { %9426 = vst [vmem:[#allocation117_spill] sm:$0xff] %v7861_v53  ;;  %v9430_v33 = vld [vmem:[#allocation91_spill] sm:$0xff]  ;;  %v9435_v21 = vpack.c.bf16 %v7026_v34, %v9434_v25  ;;  %v9438_v16 = vld [vmem:[#allocation33_spill] sm:$0xff]  ;;  %9440 = vst [vmem:[#allocation39_spill] sm:$0xff] %v7895_v62  ;;  %v7939_v25 = vmul.f32 %v9413_v47, %v7650_v54 }
 0x1db   : > { %v7871_v56 = vmul.f32 %v9431_v18, %v9430_v33  ;;  %3280 = vmatmul.mubr.bf16.gmra.mxu0 %v9433_v52  ;;  %v9436_v18 = vld [vmem:[#allocation31_spill] sm:$0xff]  ;;  %v7891_v52 = vmul.f32 %v9438_v16, %v7242_v48  ;;  %v7910_v48 = vmul.f32 %v6622_v60, %v7483_v13  ;;  %9446 = vst [vmem:[#allocation46_spill] sm:$0xff] %v7914_v26  ;;  %v9455_v54 = vld [vmem:[#allocation70_spill] sm:$0xff]  ;;  %v9456_v47 = vld [vmem:[#allocation73_spill] sm:$0xff] }
 0x1dc   : > { %3287 = vmatprep.mubr.bf16.mxu0 %v9435_v21  ;;  %v7887_v33 = vmul.f32 %v9436_v18, %v7128_v24  ;;  %v9441_v4 = vld [vmem:[#allocation87_spill] sm:$0xff]  ;;  %v7902_v21 = vmul.f32 %v9390_v0, %v7347_v29  ;;  %v7906_v24 = vmul.f32 %v6608_v39, %v7404_v23  ;;  %v7925_v23 = vmul.f32 %v9409_v37, %v7581_v19  ;;  %v9451_v18 = vld [vmem:[#allocation93_spill] sm:$0xff]  ;;  %v9520_v26 = vld [vmem:[#allocation52_spill] sm:$0xff] }
 0x1dd   : > { %9439 = vst [vmem:[#allocation40_spill] sm:$0xff] %v7891_v52  ;;  %v9442_v53 = vpack.c.bf16 %v6891_v44, %v9441_v4  ;;  %9445 = vst [vmem:[#allocation41_spill] sm:$0xff] %v7910_v48  ;;  %v7943_v19 = vmul.f32 %v9335_v57, %v9421_v46  ;;  %v9452_v16 = vpack.c.bf16 %v9451_v18, %v9382_v32  ;;  %v9453_v3 = vld [vmem:[#allocation95_spill] sm:$0xff]  ;;  %v9457_v57 = vld [vmem:[#allocation94_spill] sm:$0xff] }
 0x1de   : > { %9437 = vst [vmem:[#allocation38_spill] sm:$0xff] %v7887_v33  ;;  %9443 = vst [vmem:[#allocation126_spill] sm:$0xff] %v7902_v21  ;;  %v9454_v9 = vpack.c.bf16 %v7088_v50, %v9453_v3  ;;  %v7957_v0 = vpack.c.bf16 %v9456_v47, %v9455_v54  ;;  %v9458_v46 = vpack.c.bf16 %v9381_v28, %v9457_v57  ;;  %v9459_v37 = vld [vmem:[#allocation97_spill] sm:$0xff]  ;;  %v9461_v18 = vld [vmem:[#allocation99_spill] sm:$0xff] }
 0x1df   : > { %3119 = vmatmul.mubr.bf16.gmra.mxu1 %v9442_v53  ;;  %9444 = vst [vmem:[#allocation44_spill] sm:$0xff] %v7906_v24  ;;  %9448 = vst [vmem:[#allocation45_spill] sm:$0xff] %v7925_v23  ;;  %v9460_v4 = vpack.c.bf16 %v9459_v37, %v7148_v43  ;;  %v9465_v54 = vld [vmem:[#allocation100_spill] sm:$0xff]  ;;  %v9466_v47 = vld [vmem:[#allocation105_spill] sm:$0xff] }
 0x1e0   : > { %3126 = vmatprep.mubr.bf16.mxu1 %v9447_v27  ;;  %9449 = vst [vmem:[#allocation115_spill] sm:$0xff] %v7939_v25  ;;  %9450 = vst [vmem:[#allocation121_spill] sm:$0xff] %v7943_v19  ;;  %v9467_v57 = vpack.c.bf16 %v9466_v47, %v7253_v20  ;;  %v9470_v37 = vld [vmem:[#allocation79_spill] sm:$0xff]  ;;  %v9476_v47 = vld [vmem:[#allocation112_spill] sm:$0xff] }
 0x1e1   : > { %v9517_v25 = vld [vmem:[#allocation20_spill] sm:$0xff]  ;;  %v9526_v24 = vld [vmem:[#allocation50_spill] sm:$0xff]  ;;  %v9527_v21 = vld [vmem:[#allocation49_spill] sm:$0xff] }
 0x1e2   : > { %v9528_v62 = vpack.c.bf16 %v9526_v24, %v9527_v21  ;;  %v9529_v52 = vld [vmem:[#allocation71_spill] sm:$0xff]  ;;  %v9535_v21 = vld [vmem:[#allocation65_spill] sm:$0xff] }
 0x1e3   : > { %3288 = vmatmul.mubr.bf16.gmra.mxu0 %v9452_v16  ;;  %v9462_v16 = vpack.c.bf16 %v7165_v10, %v9461_v18  ;;  %v9472_v18 = vld [vmem:[#allocation106_spill] sm:$0xff]  ;;  %v9531_v33 = vld [vmem:[#allocation51_spill] sm:$0xff] }
 0x1e4   : > { %3295 = vmatprep.mubr.bf16.mxu0 %v9454_v9  ;;  %v9463_v9 = vld [vmem:[#allocation98_spill] sm:$0xff] }
 0x1e5   : > { %v9464_v3 = vpack.c.bf16 %v7026_v34, %v9463_v9  ;;  %v9474_v9 = vld [vmem:[#allocation109_spill] sm:$0xff] }
 0x1e7   : > { %3127 = vmatmul.mubr.bf16.gmra.mxu1 %v9458_v46  ;;  %v9468_v46 = vld [vmem:[#allocation107_spill] sm:$0xff] }
 0x1e8   : > { %3134 = vmatprep.mubr.bf16.mxu1 %v7957_v0  ;;  %v9469_v13 = vpack.c.bf16 %v7269_v14, %v9468_v46 }
 0x1eb   : > { %3296 = vmatmul.mubr.bf16.gmra.mxu0 %v9460_v4  ;;  %v9471_v4 = vld [vmem:[#allocation82_spill] sm:$0xff] }
 0x1ec   : > { %3303 = vmatprep.mubr.bf16.mxu0 %v9462_v16  ;;  %v7981_v60 = vpack.c.bf16 %v9471_v4, %v9470_v37  ;;  %v9473_v16 = vpack.c.bf16 %v7088_v50, %v9472_v18  ;;  %v9480_v37 = vld [vmem:[#allocation111_spill] sm:$0xff]  ;;  %v9481_v4 = vld [vmem:[#allocation113_spill] sm:$0xff] }
 0x1ed   : > { %v9482_v18 = vpack.c.bf16 %v9481_v4, %v7366_v55  ;;  %v9492_v4 = vld [vmem:[#allocation119_spill] sm:$0xff] }
 0x1ef   : > { %3135 = vmatmul.mubr.bf16.gmra.mxu1 %v9464_v3  ;;  %v9475_v3 = vpack.c.bf16 %v9474_v9, %v9397_v63  ;;  %v9485_v9 = vld [vmem:[#allocation114_spill] sm:$0xff] }
 0x1f0   : > { %3142 = vmatprep.mubr.bf16.mxu1 %v9465_v54 }
 0x1f3   : > { %3304 = vmatmul.mubr.bf16.gmra.mxu0 %v9467_v57  ;;  %v9477_v57 = vpack.c.bf16 %v7325_v42, %v9476_v47  ;;  %v9487_v47 = vld [vmem:[#allocation116_spill] sm:$0xff] }
 0x1f4   : > { %3311 = vmatprep.mubr.bf16.mxu0 %v9469_v13  ;;  %v9478_v13 = vld [vmem:[#allocation110_spill] sm:$0xff] }
 0x1f5   : > { %v9479_v46 = vpack.c.bf16 %v7165_v10, %v9478_v13 }
 0x1f7   : > { %3143 = vmatmul.mubr.bf16.gmra.mxu1 %v9473_v16  ;;  %v9483_v16 = vld [vmem:[#allocation42_spill] sm:$0xff] }
 0x1f8   : > { %3150 = vmatprep.mubr.bf16.mxu1 %v7981_v60  ;;  %v9484_v39 = vpack.c.bf16 %v9417_v30, %v9483_v16  ;;  %v9494_v16 = vld [vmem:[#allocation61_spill] sm:$0xff] }
 0x1fb   : > { %3312 = vmatmul.mubr.bf16.gmra.mxu0 %v9475_v3  ;;  %v9486_v3 = vpack.c.bf16 %v7269_v14, %v9485_v9 }
 0x1fc   : > { %3319 = vmatprep.mubr.bf16.mxu0 %v9477_v57  ;;  %v9488_v57 = vld [vmem:[#allocation118_spill] sm:$0xff] }
 0x1fd   : > { %v9489_v13 = vpack.c.bf16 %v9488_v57, %v9402_v2  ;;  %v9499_v57 = vld [vmem:[#allocation123_spill] sm:$0xff] }
 0x1ff   : > { %3151 = vmatmul.mubr.bf16.gmra.mxu1 %v9479_v46  ;;  %v9490_v46 = vld [vmem:[#allocation120_spill] sm:$0xff] }
 0x200   : > { %3158 = vmatprep.mubr.bf16.mxu1 %v9480_v37  ;;  %v9491_v29 = vpack.c.bf16 %v7446_v6, %v9490_v46  ;;  %v9501_v46 = vld [vmem:[#allocation124_spill] sm:$0xff] }
 0x203   : > { %3320 = vmatmul.mubr.bf16.gmra.mxu0 %v9482_v18  ;;  %v9493_v18 = vpack.c.bf16 %v7325_v42, %v9492_v4 }
 0x204   : > { %3327 = vmatprep.mubr.bf16.mxu0 %v9484_v39  ;;  %v9495_v39 = vld [vmem:[#allocation122_spill] sm:$0xff] }
 0x205   : > { %v9496_v9 = vpack.c.bf16 %v9495_v39, %v9418_v38  ;;  %v9506_v39 = vld [vmem:[#allocation128_spill] sm:$0xff] }
 0x207   : > { %3159 = vmatmul.mubr.bf16.gmra.mxu1 %v9486_v3  ;;  %v9497_v3 = vld [vmem:[#allocation125_spill] sm:$0xff] }
 0x208   : > { %3166 = vmatprep.mubr.bf16.mxu1 %v9487_v47  ;;  %v9498_v53 = vpack.c.bf16 %v7511_v51, %v9497_v3  ;;  %v9508_v3 = vld [vmem:[#allocation129_spill] sm:$0xff] }
 0x20b   : > { %3328 = vmatmul.mubr.bf16.gmra.mxu0 %v9489_v13  ;;  %v9500_v13 = vpack.c.bf16 %v9417_v30, %v9499_v57 }
 0x20c   : > { %3335 = vmatprep.mubr.bf16.mxu0 %v9491_v29  ;;  %v9502_v29 = vld [vmem:[#allocation127_spill] sm:$0xff] }
 0x20d   : > { %v9503_v4 = vpack.c.bf16 %v9502_v29, %v7547_v59  ;;  %v9513_v29 = vld [vmem:[#allocation67_spill] sm:$0xff] }
 0x20f   : > { %3167 = vmatmul.mubr.bf16.gmra.mxu1 %v9493_v18  ;;  %v9504_v18 = vld [vmem:[#allocation47_spill] sm:$0xff] }
 0x210   : > { %3174 = vmatprep.mubr.bf16.mxu1 %v9494_v16  ;;  %v9505_v41 = vpack.c.bf16 %v7561_v40, %v9504_v18  ;;  %v9515_v18 = vld [vmem:[#allocation64_spill] sm:$0xff] }
 0x213   : > { %3336 = vmatmul.mubr.bf16.gmra.mxu0 %v9496_v9  ;;  %v9507_v9 = vpack.c.bf16 %v7446_v6, %v9506_v39 }
 0x214   : > { %3343 = vmatprep.mubr.bf16.mxu0 %v9498_v53  ;;  %v9509_v53 = vld [vmem:[#allocation24_spill] sm:$0xff] }
 0x215   : > { %v9510_v57 = vpack.c.bf16 %v9509_v53, %v7609_v35  ;;  %v9521_v53 = vld [vmem:[#allocation58_spill] sm:$0xff] }
 0x217   : > { %3175 = vmatmul.mubr.bf16.gmra.mxu1 %v9500_v13  ;;  %v9511_v13 = vld [vmem:[#allocation48_spill] sm:$0xff] }
 0x218   : > { %3182 = vmatprep.mubr.bf16.mxu1 %v9501_v46  ;;  %v9512_v19 = vpack.c.bf16 %v9428_v1, %v9511_v13  ;;  %v9522_v13 = vld [vmem:[#allocation26_spill] sm:$0xff] }
 0x21b   : > { %3344 = vmatmul.mubr.bf16.gmra.mxu0 %v9503_v4  ;;  %v9514_v4 = vpack.c.bf16 %v7511_v51, %v9513_v29  ;;  %v9524_v29 = vld [vmem:[#allocation62_spill] sm:$0xff] }
 0x21c   : > { %3351 = vmatprep.mubr.bf16.mxu0 %v9505_v41  ;;  %v9516_v41 = vld [vmem:[#allocation54_spill] sm:$0xff] }
 0x21d   : > { %v2215_v39 = vmul.f32 %v9517_v25, %v9516_v41  ;;  %v5773_v41 = vld [vmem:[#allocation7 + $0x230] sm:$0xff]  }
 0x21f   : > { %3183 = vmatmul.mubr.bf16.gmra.mxu1 %v9507_v9  ;;  %v9518_v9 = vld [vmem:[#allocation132_spill] sm:$0xff] }
 0x220   : > { %3190 = vmatprep.mubr.bf16.mxu1 %v9508_v3  ;;  %v9519_v23 = vpack.c.bf16 %v9518_v9, %v9427_v49 }
 0x223   : > { %3352 = vmatmul.mubr.bf16.gmra.mxu0 %v9510_v57  ;;  %v2246_v57 = vpack.c.bf16 %v2215_v39, %v9521_v53  ;;  %v9532_v39 = vld [vmem:[#allocation57_spill] sm:$0xff] }
 0x224   : > { %3359 = vmatprep.mubr.bf16.mxu0 %v9512_v19  ;;  %v9523_v19 = vpack.c.bf16 %v7561_v40, %v9522_v13  ;;  %v9533_v13 = vld [vmem:[#allocation21_spill] sm:$0xff] }
 0x227   : > { %3191 = vmatmul.mubr.bf16.gmra.mxu1 %v9514_v4  ;;  %v9525_v4 = vld [vmem:[#allocation22_spill] sm:$0xff] }
 0x228   : > { %3198 = vmatprep.mubr.bf16.mxu1 %v9515_v18  ;;  %v2217_v48 = vmul.f32 %v9525_v4, %v9524_v29  ;;  %v9534_v4 = vld [vmem:[#allocation59_spill] sm:$0xff] }
 0x22b   : > { %3360 = vmatmul.mubr.bf16.gmra.mxu0 %v9519_v23  ;;  %v9530_v23 = vld [vmem:[#allocation53_spill] sm:$0xff] }
 0x22c   : > { %3561 = vmatprep.mubr.bf16.mxu0 %v9520_v26  ;;  %v2247_v9 = vpack.c.bf16 %v2217_v48, %v9530_v23  ;;  %v9538_v48 = vld [vmem:[#allocation69_spill] sm:$0xff] }
 0x22f   : > { %3199 = vmatmul.mubr.bf16.gmra.mxu1 %v9523_v19  ;;  %v5774_v19 = vld [vmem:[#allocation7 + $0x228] sm:$0xff]  }
 0x230   : > { %3400 = vmatprep.mubr.bf16.mxu1 %v2246_v57  ;;  %v2296_v57 = vmul.f32 %v9533_v13, %v9532_v39  ;;  %v5776_v39 = vld [vmem:[#allocation7 + $0x218] sm:$0xff]   ;;  %v9540_v13 = vld [vmem:[#allocation76_spill] sm:$0xff] }
 0x232   : > { %v2327_v53 = vpack.c.bf16 %v9534_v4, %v2296_v57  ;;  %v5777_v4 = vld [vmem:[#allocation7 + $0x210] sm:$0xff]  }
 0x233   : > { %3562 = vmatmul.mubr.bf16.vlgmr.msra.gmra.mxu0 %v9528_v62  ;;  %v5775_v62 = vld [vmem:[#allocation7 + $0x220] sm:$0xff]  }
 0x234   : > { %3569 = vmatprep.mubr.bf16.mxu0 %v9529_v52 }
 0x237   : > { %3401 = vmatmul.mubr.bf16.vlgmr.msra.gmra.mxu1 %v9531_v33  ;;  %v9536_v33 = vld [vmem:[#allocation23_spill] sm:$0xff] }
 0x238   : > { %5463 = vmatpush3.bf16.msra.mxu1 %v7726_v15  ;;  %3408 = vmatprep.mubr.bf16.mxu1 %v2247_v9  ;;  %v2298_v24 = vmul.f32 %v9536_v33, %v9535_v21  ;;  %v9537_v15 = vld [vmem:[#allocation77_spill] sm:$0xff]  ;;  %v9544_v33 = vld [vmem:[#allocation66_spill] sm:$0xff] }
 0x239   : > { %5464 = vmatprep.subr.bf16.mxu1 %v5773_v41  ;;  %v9539_v9 = vpack.c.bf16 %v9537_v15, %v9538_v48 }
 0x23b   : > { %3570 = vmatmul.mubr.bf16.gmra.mxu0 %v2327_v53  ;;  %v9541_v53 = vld [vmem:[#allocation60_spill] sm:$0xff] }
 0x23c   : > { %5465 = vmatpush3.bf16.msra.mxu1 %v5773_v41  ;;  %3577 = vmatprep.mubr.bf16.mxu0 %v9379_v36  ;;  %v2221_v41 = vmul.f32 %v9425_v58, %v9540_v13  ;;  %v2328_v57 = vpack.c.bf16 %v9541_v53, %v2298_v24  ;;  %v9543_v58 = vpack.c.bf16 %v6891_v44, %v7697_v8  ;;  %v9548_v44 = vld [vmem:[#allocation74_spill] sm:$0xff] }
 0x23d   : > { %5466 = vmatprep.subr.bf16.mxu1 %v5774_v19  ;;  %v9545_v24 = vpack.c.bf16 %v9544_v33, %v9380_v17  ;;  %v9549_v8 = vpack.c.bf16 %v9548_v44, %v9382_v32  ;;  %v9564_v33 = vld [vmem:[#allocation88_spill] sm:$0xff] }
 0x23f   : > { %3409 = vmatmul.mubr.bf16.gmra.mxu1 %v9520_v26  ;;  %v9542_v26 = vld [vmem:[#allocation78_spill] sm:$0xff] }
 0x240   : > { %3416 = vmatprep.mubr.bf16.mxu1 %v9539_v9  ;;  %5467 = vmatpush3.bf16.msra.mxu1 %v5774_v19  ;;  %v2249_v21 = vpack.c.bf16 %v2221_v41, %v9542_v26  ;;  %v5778_v19 = vld [vmem:[#allocation7 + $0x208] sm:$0xff]   ;;  %v9554_v41 = vld [vmem:[#allocation85_spill] sm:$0xff] }
 0x241   : > { %5468 = vmatprep.subr.bf16.mxu1 %v5775_v62  ;;  %v9555_v53 = vpack.c.bf16 %v7088_v50, %v9554_v41 }
 0x243   : > { %3578 = vmatmul.mubr.bf16.gmra.mxu0 %v2328_v57  ;;  %v9558_v57 = vld [vmem:[#allocation28_spill] sm:$0xff] }
 0x244   : > { %5469 = vmatpush3.bf16.msra.mxu1 %v5775_v62  ;;  %3585 = vmatprep.mubr.bf16.mxu0 %v7693_v31  ;;  %v5779_v62 = vld [vmem:[#allocation7 + $0x200] sm:$0xff]  }
 0x245   : > { %5470 = vmatprep.subr.bf16.mxu1 %v5776_v39 }
 0x247   : > { %3417 = vmatmul.mubr.bf16.gmra.mxu1 %v9529_v52  ;;  %v9546_v52 = vld [vmem:[#allocation84_spill] sm:$0xff] }
 0x248   : > { %3424 = vmatprep.mubr.bf16.mxu1 %v2249_v21  ;;  %5471 = vmatpush3.bf16.msra.mxu1 %v5776_v39  ;;  %v9547_v15 = vpack.c.bf16 %v9381_v28, %v9546_v52  ;;  %v9552_v39 = vld [vmem:[#allocation63_spill] sm:$0xff] }
 0x249   : > { %5472 = vmatprep.subr.bf16.mxu1 %v5777_v4  ;;  %v9553_v28 = vpack.c.bf16 %v9552_v39, %v7148_v43 }
 0x24b   : > { %3586 = vmatmul.mubr.bf16.gmra.mxu0 %v9543_v58 }
 0x24c   : > { %5473 = vmatpush3.bf16.msra.mxu1 %v5777_v4  ;;  %3593 = vmatprep.mubr.bf16.mxu0 %v9447_v27  ;;  %v9559_v4 = vpack.c.bf16 %v7165_v10, %v9558_v57 }
 0x24d   : > { %5474 = vmatprep.subr.bf16.mxu1 %v5778_v19 }
 0x24f   : > { %3425 = vmatmul.mubr.bf16.gmra.mxu1 %v9379_v36  ;;  %v9550_v36 = vld [vmem:[#allocation56_spill] sm:$0xff] }
 0x250   : > { %3432 = vmatprep.mubr.bf16.mxu1 %v9545_v24  ;;  %5475 = vmatpush3.bf16.msra.mxu1 %v5778_v19  ;;  %v9551_v9 = vpack.c.bf16 %v7026_v34, %v9550_v36  ;;  %v9562_v19 = vld [vmem:[#allocation75_spill] sm:$0xff]  ;;  %v9565_v24 = vpack.c.bf16 %v9564_v33, %v7366_v55 }
 0x251   : > { %5476 = vmatprep.subr.bf16.mxu1 %v5779_v62 }
 0x253   : > { %3594 = vmatmul.mubr.bf16.gmra.mxu0 %v9547_v15 }
 0x254   : > { %5477 = vmatpush3.bf16.msra.mxu1 %v5779_v62  ;;  %3601 = vmatprep.mubr.bf16.mxu0 %v7957_v0 }
 0x257   : > { %3433 = vmatmul.mubr.bf16.gmra.mxu1 %v7693_v31  ;;  %v9556_v31 = vld [vmem:[#allocation81_spill] sm:$0xff] }
 0x258   : > { %3440 = vmatprep.mubr.bf16.mxu1 %v9549_v8  ;;  %v9557_v34 = vpack.c.bf16 %v9556_v31, %v7253_v20 }
 0x25b   : > { %3602 = vmatmul.mubr.bf16.gmra.mxu0 %v9551_v9 }
 0x25c   : > { %3609 = vmatprep.mubr.bf16.mxu0 %v9465_v54 }
 0x25f   : > { %3441 = vmatmul.mubr.bf16.gmra.mxu1 %v9447_v27  ;;  %v9560_v27 = vld [vmem:[#allocation30_spill] sm:$0xff] }
 0x260   : > { %3448 = vmatprep.mubr.bf16.mxu1 %v9553_v28  ;;  %v9561_v50 = vpack.c.bf16 %v9560_v27, %v9397_v63  ;;  %v9566_v28 = vld [vmem:[#allocation80_spill] sm:$0xff] }
 0x261   : > { %v9567_v41 = vpack.c.bf16 %v7325_v42, %v9566_v28 }
 0x263   : > { %3610 = vmatmul.mubr.bf16.gmra.mxu0 %v9555_v53 }
 0x264   : > { %3617 = vmatprep.mubr.bf16.mxu0 %v7981_v60 }
 0x266   : > { %v5022_v21 = vpop.f32.mrf.mxu0 }
 0x267   : > { %3449 = vmatmul.mubr.bf16.gmra.mxu1 %v7957_v0  ;;  %v9563_v0 = vpack.c.bf16 %v7269_v14, %v9562_v19 }
 0x268   : > { %3456 = vmatprep.mubr.bf16.mxu1 %v9557_v34  ;;  %v4910_v58 = vpop.f32.mrf.mxu1  ;;  %v5023_v10 = vpop.f32.mrf.mxu0 }
 0x269   : > { %v5024_v62 = vadd.f32 %v5023_v10, %v5022_v21 }
 0x26a   : > { %v5025_v52 = vpop.f32.mrf.mxu0 }
 0x26b   : > { %3618 = vmatmul.mubr.bf16.gmra.mxu0 %v9559_v4  ;;  %v9568_v4 = vld [vmem:[#allocation92_spill] sm:$0xff] }
 0x26c   : > { %3625 = vmatprep.mubr.bf16.mxu0 %v9480_v37  ;;  %v5026_v8 = vpop.f32.mrf.mxu0  ;;  %v9569_v27 = vpack.c.bf16 %v9568_v4, %v9402_v2 }
 0x26d   : > { %v5027_v14 = vadd.f32 %v5026_v8, %v5025_v52  ;;  %v9571_v8 = vld [vmem:[#allocation35_spill] sm:$0xff] }
 0x26f   : > { %3457 = vmatmul.mubr.bf16.gmra.mxu1 %v9465_v54  ;;  %v4911_v54 = vpop.f32.mrf.mxu1 }
 0x270   : > { %3464 = vmatprep.mubr.bf16.mxu1 %v9561_v50  ;;  %v4912_v15 = vadd.f32 %v4911_v54, %v4910_v58 }
 0x271   : > { %v4913_v44 = vpop.f32.mrf.mxu1  ;;  %v5028_v39 = vpop.f32.mrf.mxu0 }
 0x272   : > { %v8130_v36 = vadd.f32 %v5024_v62, %v4912_v15 }
 0x273   : > { %3626 = vmatmul.mubr.bf16.gmra.mxu0 %v9563_v0  ;;  %v4914_v9 = vpop.f32.mrf.mxu1  ;;  %v5029_v31 = vpop.f32.mrf.mxu0 }
 0x274   : > { %3633 = vmatprep.mubr.bf16.mxu0 %v9487_v47  ;;  %v5030_v57 = vadd.f32 %v5029_v31, %v5028_v39 }
 0x275   : > { %v5031_v21 = vpop.f32.mrf.mxu0 }
 0x276   : > { %v4916_v53 = vpop.f32.mrf.mxu1 }
 0x277   : > { %3465 = vmatmul.mubr.bf16.gmra.mxu1 %v7981_v60  ;;  %v4915_v60 = vadd.f32 %v4914_v9, %v4913_v44  ;;  %v5032_v42 = vpop.f32.mrf.mxu0  ;;  %v5780_v9 = vld [vmem:[#allocation10 + $0x38] sm:$0xff]  }
 0x278   : > { %3472 = vmatprep.mubr.bf16.mxu1 %v9565_v24  ;;  %v4917_v50 = vpop.f32.mrf.mxu1  ;;  %v5033_v10 = vadd.f32 %v5032_v42, %v5031_v21  ;;  %5510 = vmatprep.subr.bf16.mxu0 %v5780_v9  ;;  %v9575_v42 = vld [vmem:[#allocation37_spill] sm:$0xff] }
 0x279   : > { %v8137_v34 = vadd.f32 %v5027_v14, %v4915_v60  ;;  %v4918_v19 = vadd.f32 %v4917_v50, %v4916_v53  ;;  %v5034_v33 = vpop.f32.mrf.mxu0  ;;  %v9572_v14 = vpack.c.bf16 %v9571_v8, %v9418_v38  ;;  %5511 = vmatpush3.bf16.msra.mxu0 %v5780_v9 }
 0x27a   : > { %v4919_v0 = vpop.f32.mrf.mxu1 }
 0x27b   : > { %3634 = vmatmul.mubr.bf16.gmra.mxu0 %v9567_v41  ;;  %v8142_v58 = vadd.f32 %v5030_v57, %v4918_v19  ;;  %v5035_v52 = vpop.f32.mrf.mxu0  ;;  %v9573_v57 = vld [vmem:[#allocation34_spill] sm:$0xff] }
 0x27c   : > { %3641 = vmatprep.mubr.bf16.mxu0 %v9494_v16  ;;  %v4920_v62 = vpop.f32.mrf.mxu1  ;;  %v5036_v44 = vadd.f32 %v5035_v52, %v5034_v33  ;;  %v9574_v4 = vpack.c.bf16 %v7446_v6, %v9573_v57 }
 0x27d   : > { %v4921_v24 = vadd.f32 %v4920_v62, %v4919_v0  ;;  %v5037_v28 = vpop.f32.mrf.mxu0 }
 0x27f   : > { %3473 = vmatmul.mubr.bf16.gmra.mxu1 %v9480_v37  ;;  %v9570_v37 = vpack.c.bf16 %v9417_v30, %v7794_v12  ;;  %v8149_v15 = vadd.f32 %v5033_v10, %v4921_v24  ;;  %v5038_v30 = vpop.f32.mrf.mxu0  ;;  %v9576_v10 = vpack.c.bf16 %v9575_v42, %v7547_v59  ;;  %v9581_v42 = vld [vmem:[#allocation43_spill] sm:$0xff] }
 0x280   : > { %3480 = vmatprep.mubr.bf16.mxu1 %v9569_v27  ;;  %v5039_v53 = vadd.f32 %v5038_v30, %v5037_v28  ;;  %v9579_v30 = vld [vmem:[#allocation108_spill] sm:$0xff] }
 0x281   : > { %v4922_v54 = vpop.f32.mrf.mxu1 }
 0x283   : > { %3642 = vmatmul.mubr.bf16.gmra.mxu0 %v9570_v37  ;;  %v4923_v39 = vpop.f32.mrf.mxu1 }
 0x284   : > { %3649 = vmatprep.mubr.bf16.mxu0 %v9501_v46  ;;  %v4924_v41 = vadd.f32 %v4923_v39, %v4922_v54 }
 0x285   : > { %v4925_v12 = vpop.f32.mrf.mxu1 }
 0x286   : > { %v8154_v60 = vadd.f32 %v5036_v44, %v4924_v41 }
 0x287   : > { %3481 = vmatmul.mubr.bf16.gmra.mxu1 %v9487_v47  ;;  %v4926_v47 = vpop.f32.mrf.mxu1 }
 0x288   : > { %3488 = vmatprep.mubr.bf16.mxu1 %v9572_v14  ;;  %v5040_v31 = vpop.f32.mrf.mxu0  ;;  %v4927_v27 = vadd.f32 %v4926_v47, %v4925_v12  ;;  %v5781_v47 = vld [vmem:[#allocation10 + $0x30] sm:$0xff]  }
 0x289   : > { %v4928_v50 = vpop.f32.mrf.mxu1  ;;  %5512 = vmatprep.subr.bf16.mxu0 %v5781_v47 }
 0x28a   : > { %v5041_v21 = vpop.f32.mrf.mxu0  ;;  %v8161_v19 = vadd.f32 %v5039_v53, %v4927_v27  ;;  %v9580_v53 = vpack.c.bf16 %v9579_v30, %v7609_v35  ;;  %5513 = vmatpush3.bf16.msra.mxu0 %v5781_v47  ;;  %v9586_v47 = vld [vmem:[#allocation32_spill] sm:$0xff] }
 0x28b   : > { %3650 = vmatmul.mubr.bf16.gmra.mxu0 %v9574_v4  ;;  %v5042_v0 = vadd.f32 %v5041_v21, %v5040_v31  ;;  %v4929_v62 = vpop.f32.mrf.mxu1 }
 0x28c   : > { %3657 = vmatprep.mubr.bf16.mxu0 %v9508_v3  ;;  %v5043_v33 = vpop.f32.mrf.mxu0  ;;  %v4930_v37 = vadd.f32 %v4929_v62, %v4928_v50 }
 0x28d   : > { %v4931_v24 = vpop.f32.mrf.mxu1 }
 0x28e   : > { %v5044_v6 = vpop.f32.mrf.mxu0  ;;  %v8166_v54 = vadd.f32 %v5042_v0, %v4930_v37 }
 0x28f   : > { %3489 = vmatmul.mubr.bf16.gmra.mxu1 %v9494_v16  ;;  %v5045_v52 = vadd.f32 %v5044_v6, %v5043_v33  ;;  %v4932_v44 = vpop.f32.mrf.mxu1  ;;  %v9577_v16 = vld [vmem:[#allocation36_spill] sm:$0xff]  ;;  %v9583_v33 = vld [vmem:[#allocation83_spill] sm:$0xff] }
 0x290   : > { %3496 = vmatprep.mubr.bf16.mxu1 %v9576_v10  ;;  %v5046_v8 = vpop.f32.mrf.mxu0  ;;  %v9578_v14 = vpack.c.bf16 %v7511_v51, %v9577_v16  ;;  %v4933_v9 = vadd.f32 %v4932_v44, %v4931_v24  ;;  %v9582_v10 = vpack.c.bf16 %v7561_v40, %v9581_v42  ;;  %v9584_v44 = vpack.c.bf16 %v7841_v61, %v9427_v49 }
 0x291   : > { %v4934_v39 = vpop.f32.mrf.mxu1  ;;  %v2423_v42 = vmul.f32 %v9517_v25, %v9524_v29 }
 0x292   : > { %v5047_v28 = vpop.f32.mrf.mxu0  ;;  %v8173_v41 = vadd.f32 %v5045_v52, %v4933_v9 }
 0x293   : > { %3658 = vmatmul.mubr.bf16.gmra.mxu0 %v9578_v14  ;;  %v5048_v12 = vadd.f32 %v5047_v28, %v5046_v8  ;;  %v4935_v31 = vpop.f32.mrf.mxu1 }
 0x294   : > { %3665 = vmatprep.mubr.bf16.mxu0 %v9515_v18  ;;  %v5049_v57 = vpop.f32.mrf.mxu0  ;;  %v4936_v4 = vadd.f32 %v4935_v31, %v4934_v39  ;;  %v9587_v31 = vld [vmem:[#allocation72_spill] sm:$0xff] }
 0x295   : > { %v4937_v51 = vpop.f32.mrf.mxu1 }
 0x296   : > { %v5050_v27 = vpop.f32.mrf.mxu0  ;;  %v8178_v50 = vadd.f32 %v5048_v12, %v4936_v4 }
 0x297   : > { %3497 = vmatmul.mubr.bf16.gmra.mxu1 %v9501_v46  ;;  %v5051_v21 = vadd.f32 %v5050_v27, %v5049_v57  ;;  %v4938_v46 = vpop.f32.mrf.mxu1  ;;  %v9588_v57 = vpack.c.bf16 %v9586_v47, %v9587_v31 }
 0x298   : > { %3504 = vmatprep.mubr.bf16.mxu1 %v9580_v53  ;;  %v4939_v62 = vadd.f32 %v4938_v46, %v4937_v51  ;;  %v5782_v46 = vld [vmem:[#allocation10 + $0x28] sm:$0xff]  }
 0x299   : > { %5514 = vmatprep.subr.bf16.mxu0 %v5782_v46 }
 0x29a   : > { %v8185_v6 = vadd.f32 %v5051_v21, %v4939_v62  ;;  %v9589_v21 = vpack.c.bf16 %v7851_v22, %v9429_v7  ;;  %5515 = vmatpush3.bf16.msra.mxu0 %v5782_v46  ;;  %v9590_v22 = vpack.c.bf16 %v7854_v45, %v7857_v11 }
 0x29b   : > { %v5052_v0 = vpop.f32.mrf.mxu0  ;;  %3666 = vmatmul.mubr.bf16.gmra.mxu0 %v9582_v10 }
 0x29c   : > { %3673 = vmatprep.mubr.bf16.mxu0 %v9583_v33 }
 0x29d   : > { %v5053_v24 = vpop.f32.mrf.mxu0 }
 0x29e   : > { %v5054_v52 = vadd.f32 %v5053_v24, %v5052_v0 }
 0x29f   : > { %v4940_v37 = vpop.f32.mrf.mxu1  ;;  %3505 = vmatmul.mubr.bf16.gmra.mxu1 %v9508_v3  ;;  %v5055_v16 = vpop.f32.mrf.mxu0  ;;  %v9585_v3 = vpack.c.bf16 %v9428_v1, %v7845_v5 }
 0x2a0   : > { %3512 = vmatprep.mubr.bf16.mxu1 %v9584_v44 }
 0x2a1   : > { %v4941_v8 = vpop.f32.mrf.mxu1  ;;  %v5056_v40 = vpop.f32.mrf.mxu0 }
 0x2a2   : > { %v4942_v14 = vadd.f32 %v4941_v8, %v4940_v37  ;;  %v5057_v28 = vadd.f32 %v5056_v40, %v5055_v16  ;;  %v2454_v8 = vpack.c.bf16 %v2423_v42, %v9530_v23 }
 0x2a3   : > { %v4943_v9 = vpop.f32.mrf.mxu1  ;;  %v5058_v30 = vpop.f32.mrf.mxu0  ;;  %3674 = vmatmul.mubr.bf16.gmra.mxu0 %v9585_v3 }
 0x2a4   : > { %v8190_v39 = vadd.f32 %v5054_v52, %v4942_v14  ;;  %3681 = vmatprep.mubr.bf16.mxu0 %v9588_v57 }
 0x2a5   : > { %v4944_v12 = vpop.f32.mrf.mxu1  ;;  %v5059_v4 = vpop.f32.mrf.mxu0 }
 0x2a6   : > { %v4945_v53 = vadd.f32 %v4944_v12, %v4943_v9  ;;  %v5060_v27 = vadd.f32 %v5059_v4, %v5058_v30  ;;  %v9591_v12 = vld [vmem:[#allocation25_spill] sm:$0xff] }
 0x2a7   : > { %v4946_v61 = vpop.f32.mrf.mxu1  ;;  %3513 = vmatmul.mubr.bf16.gmra.mxu1 %v9515_v18  ;;  %v5061_v5 = vpop.f32.mrf.mxu0  ;;  %v2427_v30 = vmul.f32 %v9591_v12, %v9540_v13  ;;  %v5783_v13 = vld [vmem:[#allocation10 + $0x20] sm:$0xff]  }
 0x2a8   : > { %v8199_v51 = vadd.f32 %v5057_v28, %v4945_v53  ;;  %3520 = vmatprep.mubr.bf16.mxu1 %v9589_v21  ;;  %5516 = vmatprep.subr.bf16.mxu0 %v5783_v13 }
 0x2a9   : > { %v4947_v0 = vpop.f32.mrf.mxu1  ;;  %v5062_v62 = vpop.f32.mrf.mxu0  ;;  %5517 = vmatpush3.bf16.msra.mxu0 %v5783_v13 }
 0x2aa   : > { %v4948_v1 = vadd.f32 %v4947_v0, %v4946_v61  ;;  %v5063_v37 = vadd.f32 %v5062_v62, %v5061_v5  ;;  %v9592_v61 = vld [vmem:[#allocation68_spill] sm:$0xff] }
 0x2ab   : > { %v4949_v10 = vpop.f32.mrf.mxu1  ;;  %v5064_v52 = vpop.f32.mrf.mxu0  ;;  %3682 = vmatmul.mubr.bf16.gmra.mxu0 %v9590_v22  ;;  %v9593_v4 = vpack.c.bf16 %v9592_v61, %v9538_v48  ;;  %v9594_v22 = vld [vmem:[#allocation117_spill] sm:$0xff] }
 0x2ac   : > { %v8206_v18 = vadd.f32 %v5060_v27, %v4948_v1 }
 0x2ad   : > { %v4950_v24 = vpop.f32.mrf.mxu1  ;;  %v5065_v25 = vpop.f32.mrf.mxu0 }
 0x2ae   : > { %v4951_v44 = vadd.f32 %v4950_v24, %v4949_v10  ;;  %v5066_v14 = vadd.f32 %v5065_v25, %v5064_v52 }
 0x2af   : > { %v4952_v16 = vpop.f32.mrf.mxu1  ;;  %3521 = vmatmul.mubr.bf16.gmra.mxu1 %v9583_v33  ;;  %v5067_v40 = vpop.f32.mrf.mxu0  ;;  %v2456_v33 = vpack.c.bf16 %v2427_v30, %v9542_v26 }
 0x2b0   : > { %v8213_v29 = vadd.f32 %v5063_v37, %v4951_v44  ;;  %5478 = vmatprep.mubr.bf16.mxu1 %v2454_v8  ;;  %v9595_v44 = vpack.c.bf16 %v9594_v22, %v9380_v17 }
 0x2b1   : > { %v4953_v9 = vpop.f32.mrf.mxu1  ;;  %v5068_v11 = vpop.f32.mrf.mxu0 }
 0x2b2   : > { %v4954_v28 = vadd.f32 %v4953_v9, %v4952_v16  ;;  %v5069_v53 = vadd.f32 %v5068_v11, %v5067_v40 }
 0x2b3   : > { %v4955_v3 = vpop.f32.mrf.mxu1  ;;  %v5070_v47 = vpop.f32.mrf.mxu0 }
 0x2b4   : > { %v8217_v45 = vadd.f32 %v5066_v14, %v4954_v28  ;;  %v9596_v14 = vpack.c.bf16 %v7871_v56, %v9382_v32  ;;  %v9599_v56 = vld [vmem:[#allocation40_spill] sm:$0xff] }
 0x2b5   : > { %v4956_v23 = vpop.f32.mrf.mxu1  ;;  %v5071_v27 = vpop.f32.mrf.mxu0 }
 0x2b6   : > { %v4957_v31 = vadd.f32 %v4956_v23, %v4955_v3  ;;  %v5072_v46 = vadd.f32 %v5071_v27, %v5070_v47  ;;  %v5784_v27 = vld [vmem:[#allocation10 + $0x18] sm:$0xff]  }
 0x2b7   : > { %v4958_v57 = vpop.f32.mrf.mxu1  ;;  %5479 = vmatmul.mubr.bf16.vlgmr.msra.gmra.mxu1 %v9593_v4  ;;  %v5073_v5 = vpop.f32.mrf.mxu0  ;;  %v9600_v4 = vpack.c.bf16 %v9599_v56, %v7253_v20  ;;  %5518 = vmatprep.subr.bf16.mxu0 %v5784_v27  ;;  %v9601_v20 = vld [vmem:[#allocation39_spill] sm:$0xff] }
 0x2b8   : > { %v8223_v21 = vadd.f32 %v5069_v53, %v4957_v31  ;;  %5482 = vmatprep.mubr.bf16.mxu1 %v2456_v33  ;;  %v9597_v31 = vld [vmem:[#allocation38_spill] sm:$0xff]  ;;  %5519 = vmatpush3.bf16.msra.mxu0 %v5784_v27 }
 0x2b9   : > { %v4959_v0 = vpop.f32.mrf.mxu1  ;;  %v5074_v10 = vpop.f32.mrf.mxu0  ;;  %v9598_v33 = vpack.c.bf16 %v9597_v31, %v7148_v43 }
 0x2ba   : > { %v4960_v1 = vadd.f32 %v4959_v0, %v4958_v57  ;;  %v5075_v26 = vadd.f32 %v5074_v10, %v5073_v5 }
 0x2bb   : > { %v4961_v42 = vpop.f32.mrf.mxu1  ;;  %v5076_v24 = vpop.f32.mrf.mxu0 }
 0x2bc   : > { %v8225_v62 = vadd.f32 %v5072_v46, %v4960_v1  ;;  %v5785_v46 = vld [vmem:[#allocation8 + $0x38] sm:$0xff]  }
 0x2bd   : > { %v4962_v37 = vpop.f32.mrf.mxu1  ;;  %v5077_v8 = vpop.f32.mrf.mxu0  ;;  %5558 = vmatprep.subr.bf16.mxu1 %v5785_v46 }
 0x2be   : > { %v4963_v48 = vadd.f32 %v4962_v37, %v4961_v42  ;;  %v5078_v25 = vadd.f32 %v5077_v8, %v5076_v24  ;;  %5559 = vmatpush3.bf16.msra.mxu1 %v5785_v46  ;;  %v5787_v46 = vld [vmem:[#allocation10 + $0x10] sm:$0xff]  }
 0x2bf   : > { %v4964_v52 = vpop.f32.mrf.mxu1  ;;  %5483 = vmatmul.mubr.bf16.gmra.mxu1 %v9595_v44  ;;  %v5079_v40 = vpop.f32.mrf.mxu0  ;;  %5520 = vmatprep.subr.bf16.mxu0 %v5787_v46 }
 0x2c0   : > { %v8230_v16 = vadd.f32 %v5075_v26, %v4963_v48  ;;  %5486 = vmatprep.mubr.bf16.mxu1 %v9596_v14  ;;  %5521 = vmatpush3.bf16.msra.mxu0 %v5787_v46 }
 0x2c1   : > { %v4965_v9 = vpop.f32.mrf.mxu1  ;;  %v5080_v30 = vpop.f32.mrf.mxu0 }
 0x2c2   : > { %v4966_v28 = vadd.f32 %v4965_v9, %v4964_v52  ;;  %v5081_v11 = vadd.f32 %v5080_v30, %v5079_v40  ;;  %v9602_v52 = vpack.c.bf16 %v9601_v20, %v9397_v63  ;;  %v5786_v9 = vld [vmem:[#allocation8 + $0x30] sm:$0xff]  }
 0x2c3   : > { %v4967_v12 = vpop.f32.mrf.mxu1  ;;  %v5082_v23 = vpop.f32.mrf.mxu0  ;;  %5560 = vmatprep.subr.bf16.mxu1 %v5786_v9 }
 0x2c4   : > { %v8235_v3 = vadd.f32 %v5078_v25, %v4966_v28  ;;  %v9603_v25 = vld [vmem:[#allocation126_spill] sm:$0xff]  ;;  %5561 = vmatpush3.bf16.msra.mxu1 %v5786_v9 }
 0x2c5   : > { %v4968_v53 = vpop.f32.mrf.mxu1  ;;  %v5083_v57 = vpop.f32.mrf.mxu0  ;;  %v9604_v14 = vpack.c.bf16 %v9603_v25, %v7366_v55 }
 0x2c6   : > { %v4969_v17 = vadd.f32 %v4968_v53, %v4967_v12  ;;  %v5084_v32 = vadd.f32 %v5083_v57, %v5082_v23 }
 0x2c7   : > { %v4970_v47 = vpop.f32.mrf.mxu1  ;;  %5487 = vmatmul.mubr.bf16.gmra.mxu1 %v9598_v33  ;;  %v5085_v0 = vpop.f32.mrf.mxu0  ;;  %v9605_v33 = vld [vmem:[#allocation44_spill] sm:$0xff] }
 0x2c8   : > { %v8240_v61 = vadd.f32 %v5081_v11, %v4969_v17  ;;  %5490 = vmatprep.mubr.bf16.mxu1 %v9600_v4  ;;  %v9606_v57 = vpack.c.bf16 %v9605_v33, %v9402_v2  ;;  %v9607_v4 = vld [vmem:[#allocation41_spill] sm:$0xff] }
 0x2c9   : > { %v4971_v13 = vpop.f32.mrf.mxu1  ;;  %v5086_v42 = vpop.f32.mrf.mxu0  ;;  %v9608_v27 = vpack.c.bf16 %v9607_v4, %v9418_v38  ;;  %v9609_v38 = vld [vmem:[#allocation46_spill] sm:$0xff] }
 0x2ca   : > { %v4972_v5 = vadd.f32 %v4971_v13, %v4970_v47  ;;  %v5087_v10 = vadd.f32 %v5086_v42, %v5085_v0  ;;  %v5788_v13 = vld [vmem:[#allocation8 + $0x28] sm:$0xff]  }
 0x2cb   : > { %v4973_v1 = vpop.f32.mrf.mxu1  ;;  %v5088_v37 = vpop.f32.mrf.mxu0  ;;  %5562 = vmatprep.subr.bf16.mxu1 %v5788_v13 }
 0x2cc   : > { %v8245_v43 = vadd.f32 %v5084_v32, %v4972_v5  ;;  %5563 = vmatpush3.bf16.msra.mxu1 %v5788_v13  ;;  %v9616_v13 = vld [vmem:[#allocation121_spill] sm:$0xff] }
 0x2cd   : > { %v4974_v26 = vpop.f32.mrf.mxu1  ;;  %v5089_v22 = vpop.f32.mrf.mxu0 }
 0x2ce   : > { %v4975_v24 = vadd.f32 %v4974_v26, %v4973_v1  ;;  %v5090_v8 = vadd.f32 %v5089_v22, %v5088_v37 }
 0x2cf   : > { %v4976_v48 = vpop.f32.mrf.mxu1  ;;  %5491 = vmatmul.mubr.bf16.gmra.mxu1 %v9602_v52  ;;  %v5091_v28 = vpop.f32.mrf.mxu0  ;;  %v9610_v52 = vpack.c.bf16 %v9609_v38, %v7547_v59 }
 0x2d0   : > { %v8250_v44 = vadd.f32 %v5087_v10, %v4975_v24  ;;  %5494 = vmatprep.mubr.bf16.mxu1 %v9604_v14  ;;  %v9611_v14 = vld [vmem:[#allocation45_spill] sm:$0xff] }
 0x2d1   : > { %v4977_v40 = vpop.f32.mrf.mxu1  ;;  %v5092_v11 = vpop.f32.mrf.mxu0  ;;  %v9612_v9 = vpack.c.bf16 %v9611_v14, %v7609_v35 }
 0x2d2   : > { %v4978_v12 = vadd.f32 %v4977_v40, %v4976_v48  ;;  %v5093_v63 = vadd.f32 %v5092_v11, %v5091_v28  ;;  %v5789_v40 = vld [vmem:[#allocation8 + $0x20] sm:$0xff]  }
 0x2d3   : > { %v4979_v30 = vpop.f32.mrf.mxu1  ;;  %v5094_v17 = vpop.f32.mrf.mxu0  ;;  %5564 = vmatprep.subr.bf16.mxu1 %v5789_v40 }
 0x2d4   : > { %v8255_v53 = vadd.f32 %v5090_v8, %v4978_v12  ;;  %5565 = vmatpush3.bf16.msra.mxu1 %v5789_v40 }
 0x2d5   : > { %v4980_v23 = vpop.f32.mrf.mxu1  ;;  %v5095_v55 = vpop.f32.mrf.mxu0 }
 0x2d6   : > { %v4981_v47 = vadd.f32 %v4980_v23, %v4979_v30  ;;  %v5096_v56 = vadd.f32 %v5095_v55, %v5094_v17  ;;  %v9613_v17 = vld [vmem:[#allocation130_spill] sm:$0xff] }
 0x2d7   : > { %v4982_v31 = vpop.f32.mrf.mxu1  ;;  %5495 = vmatmul.mubr.bf16.gmra.mxu1 %v9606_v57  ;;  %v5097_v5 = vpop.f32.mrf.mxu0 }
 0x2d8   : > { %v8260_v32 = vadd.f32 %v5093_v63, %v4981_v47  ;;  %5498 = vmatprep.mubr.bf16.mxu1 %v9608_v27  ;;  %v2421_v47 = vmul.f32 0.0, %v9613_v17 }
 0x2d9   : > { %v4983_v0 = vpop.f32.mrf.mxu1  ;;  %v5098_v10 = vpop.f32.mrf.mxu0 }
 0x2da   : > { %v4984_v1 = vadd.f32 %v4983_v0, %v4982_v31  ;;  %v5099_v26 = vadd.f32 %v5098_v10, %v5097_v5  ;;  %v9617_v0 = vpack.c.bf16 %v9616_v13, %v9429_v7  ;;  %v5790_v5 = vld [vmem:[#allocation10 + $0x8] sm:$0xff]  }
 0x2db   : > { %v4985_v42 = vpop.f32.mrf.mxu1  ;;  %v5100_v24 = vpop.f32.mrf.mxu0  ;;  %5522 = vmatprep.subr.bf16.mxu0 %v5790_v5 }
 0x2dc   : > { %v8265_v2 = vadd.f32 %v5096_v56, %v4984_v1  ;;  %v9614_v56 = vld [vmem:[#allocation115_spill] sm:$0xff]  ;;  %v5791_v1 = vld [vmem:[#allocation8 + $0x18] sm:$0xff]   ;;  %5523 = vmatpush3.bf16.msra.mxu0 %v5790_v5 }
 0x2dd   : > { %v4986_v37 = vpop.f32.mrf.mxu1  ;;  %v5101_v22 = vpop.f32.mrf.mxu0  ;;  %v9615_v35 = vpack.c.bf16 %v9614_v56, %v9427_v49  ;;  %5566 = vmatprep.subr.bf16.mxu1 %v5791_v1 }
 0x2de   : > { %v4987_v48 = vadd.f32 %v4986_v37, %v4985_v42  ;;  %v5102_v25 = vadd.f32 %v5101_v22, %v5100_v24  ;;  %v9618_v42 = vld [vmem:[#allocation58_spill] sm:$0xff]  ;;  %5567 = vmatpush3.bf16.msra.mxu1 %v5791_v1 }
 0x2df   : > { %v4988_v20 = vpop.f32.mrf.mxu1  ;;  %5499 = vmatmul.mubr.bf16.gmra.mxu1 %v9610_v52  ;;  %v5103_v12 = vpop.f32.mrf.mxu0  ;;  %v2452_v10 = vmul.f32 0.0, %v9618_v42  ;;  %v9619_v24 = vld [vmem:[#allocation54_spill] sm:$0xff] }
 0x2e0   : > { %v8270_v8 = vadd.f32 %v5099_v26, %v4987_v48  ;;  %5502 = vmatprep.mubr.bf16.mxu1 %v9612_v9  ;;  %v2453_v48 = vmul.f32 %v2421_v47, %v9619_v24 }
 0x2e1   : > { %v4989_v28 = vpop.f32.mrf.mxu1  ;;  %v5104_v63 = vpop.f32.mrf.mxu0 }
 0x2e2   : > { %v4990_v30 = vadd.f32 %v4989_v28, %v4988_v20  ;;  %v5105_v59 = vadd.f32 %v5104_v63, %v5103_v12  ;;  %v2469_v14 = vpack.c.bf16 %v2453_v48, %v2452_v10 }
 0x2e3   : > { %v4991_v11 = vpop.f32.mrf.mxu1  ;;  %v5106_v33 = vpop.f32.mrf.mxu0 }
 0x2e4   : > { %v8275_v23 = vadd.f32 %v5102_v25, %v4990_v30 }
 0x2e5   : > { %v4992_v31 = vpop.f32.mrf.mxu1  ;;  %v5107_v4 = vpop.f32.mrf.mxu0 }
 0x2e6   : > { %v4993_v57 = vadd.f32 %v4992_v31, %v4991_v11  ;;  %v5108_v46 = vadd.f32 %v5107_v4, %v5106_v33  ;;  %v5792_v11 = vld [vmem:[#allocation8 + $0x10] sm:$0xff]  }
 0x2e7   : > { %v4994_v55 = vpop.f32.mrf.mxu1  ;;  %5503 = vmatmul.mubr.bf16.gmra.mxu1 %v9615_v35  ;;  %v5109_v37 = vpop.f32.mrf.mxu0  ;;  %5568 = vmatprep.subr.bf16.mxu1 %v5792_v11 }
 0x2e8   : > { %v8281_v27 = vadd.f32 %v5105_v59, %v4993_v57  ;;  %5506 = vmatprep.mubr.bf16.mxu1 %v9617_v0  ;;  %5569 = vmatpush3.bf16.msra.mxu1 %v5792_v11 }
 0x2e9   : > { %v4995_v26 = vpop.f32.mrf.mxu1  ;;  %v5110_v38 = vpop.f32.mrf.mxu0 }
 0x2ea   : > { %v4996_v20 = vadd.f32 %v4995_v26, %v4994_v55  ;;  %v5111_v22 = vadd.f32 %v5110_v38, %v5109_v37  ;;  %v5794_v38 = vld [vmem:[#allocation8 + $0x8] sm:$0xff]  }
 0x2eb   : > { %v4997_v49 = vpop.f32.mrf.mxu1  ;;  %v5112_v25 = vpop.f32.mrf.mxu0  ;;  %5570 = vmatprep.subr.bf16.mxu1 %v5794_v38 }
 0x2ec   : > { %v8288_v52 = vadd.f32 %v5108_v46, %v4996_v20  ;;  %5571 = vmatpush3.bf16.msra.mxu1 %v5794_v38 }
 0x2ed   : > { %v4998_v7 = vpop.f32.mrf.mxu1  ;;  %v5113_v28 = vpop.f32.mrf.mxu0 }
 0x2ee   : > { %v4999_v9 = vadd.f32 %v4998_v7, %v4997_v49  ;;  %v5114_v30 = vadd.f32 %v5113_v28, %v5112_v25  ;;  %v5793_v49 = vld [vmem:[#allocation10] sm:$0xff]  }
 0x2ef   : > { %v5000_v40 = vpop.f32.mrf.mxu1  ;;  %5507 = vmatmul.mubr.bf16.gmra.mxu1 %v2469_v14  ;;  %v5115_v59 = vpop.f32.mrf.mxu0  ;;  %5524 = vmatprep.subr.bf16.mxu0 %v5793_v49 }
 0x2f0   : > { %v8290_v12 = vadd.f32 %v5111_v22, %v4999_v9  ;;  %5525 = vmatpush3.bf16.msra.mxu0 %v5793_v49 }
 0x2f1   : > { %v5001_v63 = vpop.f32.mrf.mxu1  ;;  %v5116_v31 = vpop.f32.mrf.mxu0 }
 0x2f2   : > { %v5002_v17 = vadd.f32 %v5001_v63, %v5000_v40  ;;  %v5117_v57 = vadd.f32 %v5116_v31, %v5115_v59  ;;  %v5796_v59 = vld [vmem:[%s6278_s20] sm:$0xff] }
 0x2f3   : > { %v5003_v47 = vpop.f32.mrf.mxu1  ;;  %v5246_v56 = vpop.f32.mrf.mxu0 }
 0x2f4   : > { %v8292_v33 = vadd.f32 %v5114_v30, %v5002_v17  ;;  %v8314_v17 = vld [vmem:[%s8866_s10] ss:$0 sm:$0xff] }
 0x2f5   : > { %v5004_v55 = vpop.f32.mrf.mxu1  ;;  %v5247_v46 = vpop.f32.mrf.mxu0 }
 0x2f6   : > { %v5005_v35 = vadd.f32 %v5004_v55, %v5003_v47  ;;  %v5248_v0 = vadd.f32 %v5247_v46, %v5246_v56  ;;  %v5798_v47 = vld [vmem:[%s6278_s20 + $0x8] sm:$0xff] }
 0x2f7   : > { %v5134_v4 = vpop.f32.mrf.mxu1  ;;  %v5249_v1 = vpop.f32.mrf.mxu0  ;;  %v3969_v31 = vmul.f32 %v5798_v47, %v8314_v17  ;;  %v5800_v47 = vld [vmem:[%s6278_s20 + $0x20] sm:$0xff] }
 0x2f8   : > { %v8294_v13 = vadd.f32 %v5117_v57, %v5005_v35 }
 0x2f9   : > { %v5135_v5 = vpop.f32.mrf.mxu1  ;;  %v5250_v26 = vpop.f32.mrf.mxu0 }
 0x2fa   : > { %9620 = vst [vmem:[#allocation96_spill] sm:$0xff] %v8294_v13  ;;  %v5136_v42 = vadd.f32 %v5135_v5, %v5134_v4  ;;  %v5251_v14 = vadd.f32 %v5250_v26, %v5249_v1  ;;  %v5795_v4 = vld [vmem:[#allocation8] sm:$0xff]   ;;  %v5805_v13 = vld [vmem:[%s6278_s20 + $0x48] sm:$0xff] }
 0x2fb   : > { %v5137_v10 = vpop.f32.mrf.mxu1  ;;  %v8297_v48 = vpop.f32.mrf.mxu0  ;;  %5572 = vmatprep.subr.bf16.mxu1 %v5795_v4  ;;  %v8332_v1 = vld [vmem:[%s8867_s11] ss:$0 sm:$0xff] }
 0x2fc   : > { %v3403_v37 = vadd.f32 %v5136_v42, %v8130_v36  ;;  %v4008_v42 = vadd.f32 %v8332_v1, %v3969_v31  ;;  %5573 = vmatpush3.bf16.msra.mxu1 %v5795_v4  ;;  %v3972_v31 = vmul.f32 %v5800_v47, %v8314_v17 }
 0x2fd   : > { %v5138_v24 = vpop.f32.mrf.mxu1  ;;  %v8301_v25 = vpop.f32.mrf.mxu0 }
 0x2fe   : > { %v5139_v20 = vadd.f32 %v5138_v24, %v5137_v10  ;;  %v8299_v22 = vadd.f32 %v5248_v0, %v3403_v37 }
 0x2ff   : > { %v5140_v7 = vpop.f32.mrf.mxu1  ;;  %v8304_v36 = vpop.f32.mrf.mxu0 }
 0x300   : > { %v3406_v9 = vadd.f32 %v5139_v20, %v8137_v34  ;;  %v3968_v34 = vmul.f32 %v8314_v17, %v5796_v59  ;;  %v9621_v59 = vld [vmem:[#allocation19_spill] sm:$0xff] }
 0x301   : > { %v5141_v40 = vpop.f32.mrf.mxu1  ;;  %v8308_v63 = vpop.f32.mrf.mxu0 }
 0x302   : > { %v5142_v28 = vadd.f32 %v5141_v40, %v5140_v7  ;;  %v8306_v30 = vadd.f32 %v5251_v14, %v3406_v9 }
 0x303   : > { %v5143_v11 = vpop.f32.mrf.mxu1  ;;  %v8322_v56 = vpop.f32.mrf.mxu0 }
 0x304   : > { %v8320_v57 = vadd.f32 %v5142_v28, %v8142_v58  ;;  %v4007_v58 = vadd.f32 %v8332_v1, %v3968_v34 }
 0x305   : > { %v5144_v55 = vpop.f32.mrf.mxu1  ;;  %v8324_v0 = vpop.f32.mrf.mxu0 }
 0x306   : > { %v5145_v35 = vadd.f32 %v5144_v55, %v5143_v11  ;;  %v4039_v24 = vmax.f32 %v4007_v58, 0.0 }
 0x307   : > { %v5146_v46 = vpop.f32.mrf.mxu1  ;;  %v8336_v26 = vpop.f32.mrf.mxu0 }
 0x308   : > { %v8327_v5 = vadd.f32 %v5145_v35, %v8149_v15  ;;  %v4040_v15 = vmax.f32 %v4008_v42, 0.0  ;;  %v5802_v35 = vld [vmem:[%s6278_s20 + $0x30] sm:$0xff] }
 0x309   : > { %v5147_v10 = vpop.f32.mrf.mxu1  ;;  %v8338_v49 = vpop.f32.mrf.mxu0  ;;  %v3974_v4 = vmul.f32 %v5802_v35, %v8314_v17 }
 0x30a   : > { %v5148_v37 = vadd.f32 %v5147_v10, %v5146_v46  ;;  %v4071_v7 = vpack.c.bf16 %v4040_v15, %v4039_v24  ;;  %v5803_v46 = vld [vmem:[%s6278_s20 + $0x38] sm:$0xff]  ;;  %v4011_v24 = vadd.f32 %v8332_v1, %v3972_v31 }
 0x30b   : > { %v5149_v20 = vpop.f32.mrf.mxu1  ;;  %v8343_v9 = vpop.f32.mrf.mxu0  ;;  %v3975_v58 = vmul.f32 %v5803_v46, %v8314_v17 }
 0x30c   : > { %v8341_v38 = vadd.f32 %v5148_v37, %v8154_v60  ;;  %5526 = vmatprep.mubr.bf16.mxu0 %v4071_v7  ;;  %v5801_v60 = vld [vmem:[%s6278_s20 + $0x28] sm:$0xff] }
 0x30d   : > { %v5150_v14 = vpop.f32.mrf.mxu1  ;;  %v8345_v11 = vpop.f32.mrf.mxu0  ;;  %5527 = vmatmul.mubr.bf16.vlgmr.msra.gmra.mxu0 %v9621_v59  ;;  %v3973_v55 = vmul.f32 %v5801_v60, %v8314_v17  ;;  %v4014_v31 = vadd.f32 %v8332_v1, %v3975_v58 }
 0x30e   : > { %v5151_v40 = vadd.f32 %v5150_v14, %v5149_v20  ;;  %v4043_v14 = vmax.f32 %v4011_v24, 0.0  ;;  %v5804_v24 = vld [vmem:[%s6278_s20 + $0x40] sm:$0xff] }
 0x30f   : > { %v5152_v28 = vpop.f32.mrf.mxu1  ;;  %v8359_v10 = vpop.f32.mrf.mxu0 }
 0x310   : > { %v8349_v34 = vadd.f32 %v5151_v40, %v8161_v19  ;;  %v4012_v19 = vadd.f32 %v8332_v1, %v3973_v55 }
 0x311   : > { %v5153_v42 = vpop.f32.mrf.mxu1  ;;  %v8363_v20 = vpop.f32.mrf.mxu0 }
 0x312   : > { %v5154_v37 = vadd.f32 %v5153_v42, %v5152_v28  ;;  %v4044_v40 = vmax.f32 %v4012_v19, 0.0  ;;  %v4013_v28 = vadd.f32 %v8332_v1, %v3974_v4  ;;  %v3976_v19 = vmul.f32 %v5804_v24, %v8314_v17 }
 0x313   : > { %v5155_v15 = vpop.f32.mrf.mxu1  ;;  %v8368_v47 = vpop.f32.mrf.mxu0  ;;  %v3977_v4 = vmul.f32 %v5805_v13, %v8314_v17 }
 0x314   : > { %v8366_v7 = vadd.f32 %v5154_v37, %v8166_v54  ;;  %9622 = vst [vmem:[#allocation102_spill] sm:$0xff] %v8368_v47  ;;  %v4073_v55 = vpack.c.bf16 %v4044_v40, %v4043_v14  ;;  %v4045_v42 = vmax.f32 %v4013_v28, 0.0  ;;  %v4046_v54 = vmax.f32 %v4014_v31, 0.0  ;;  %v5806_v47 = vld [vmem:[%s6278_s20 + $0x50] sm:$0xff] }
 0x315   : > { %v5156_v59 = vpop.f32.mrf.mxu1  ;;  %v8372_v46 = vpop.f32.mrf.mxu0  ;;  %v3978_v58 = vmul.f32 %v5806_v47, %v8314_v17 }
 0x316   : > { %v5157_v60 = vadd.f32 %v5156_v59, %v5155_v15  ;;  %9623 = vst [vmem:[#allocation55_spill] sm:$0xff] %v8372_v46  ;;  %5530 = vmatprep.mubr.bf16.mxu0 %v4073_v55  ;;  %v5807_v15 = vld [vmem:[%s6278_s20 + $0x58] sm:$0xff]  ;;  %v4074_v28 = vpack.c.bf16 %v4046_v54, %v4045_v42 }
 0x317   : > { %v5158_v35 = vpop.f32.mrf.mxu1  ;;  %v3979_v14 = vmul.f32 %v5807_v15, %v8314_v17  ;;  %v8385_v59 = vpop.f32.mrf.mxu0 }
 0x318   : > { %v8375_v37 = vadd.f32 %v5157_v60, %v8173_v41  ;;  %9624 = vst [vmem:[#allocation103_spill] sm:$0xff] %v8385_v59  ;;  %v4015_v41 = vadd.f32 %v8332_v1, %v3976_v19  ;;  %v4016_v60 = vadd.f32 %v8332_v1, %v3977_v4  ;;  %5531 = vmatmul.mubr.bf16.gmra.mxu0 %v4074_v28 }
 0x319   : > { %v5159_v40 = vpop.f32.mrf.mxu1  ;;  %v8389_v24 = vpop.f32.mrf.mxu0  ;;  %v4018_v42 = vadd.f32 %v8332_v1, %v3979_v14 }
 0x31a   : > { %v5160_v31 = vadd.f32 %v5159_v40, %v5158_v35  ;;  %9625 = vst [vmem:[#allocation27_spill] sm:$0xff] %v8389_v24  ;;  %v4047_v47 = vmax.f32 %v4015_v41, 0.0  ;;  %v4048_v15 = vmax.f32 %v4016_v60, 0.0  ;;  %v4017_v35 = vadd.f32 %v8332_v1, %v3978_v58  ;;  %v5808_v41 = vld [vmem:[%s6278_s20 + $0x60] sm:$0xff]  ;;  %v5809_v24 = vld [vmem:[%s6278_s20 + $0x68] sm:$0xff] }
 0x31b   : > { %v5161_v55 = vpop.f32.mrf.mxu1  ;;  %v8394_v59 = vpop.f32.mrf.mxu0  ;;  %v3980_v60 = vmul.f32 %v5808_v41, %v8314_v17  ;;  %v3981_v58 = vmul.f32 %v5809_v24, %v8314_v17 }
 0x31c   : > { %v8392_v13 = vadd.f32 %v5160_v31, %v8178_v50  ;;  %v4075_v19 = vpack.c.bf16 %v4048_v15, %v4047_v47  ;;  %v4049_v28 = vmax.f32 %v4017_v35, 0.0  ;;  %v4050_v50 = vmax.f32 %v4018_v42, 0.0 }
 0x31d   : > { %v5162_v46 = vpop.f32.mrf.mxu1  ;;  %v8398_v40 = vpop.f32.mrf.mxu0 }
 0x31e   : > { %9626 = vst [vmem:[#allocation131_spill] sm:$0xff] %v8392_v13  ;;  %v5163_v54 = vadd.f32 %v5162_v46, %v5161_v55  ;;  %5534 = vmatprep.mubr.bf16.mxu0 %v4075_v19  ;;  %v5810_v13 = vld [vmem:[%s6278_s20 + $0x70] sm:$0xff]  ;;  %v5811_v46 = vld [vmem:[%s6278_s20 + $0x78] sm:$0xff]  ;;  %v4076_v35 = vpack.c.bf16 %v4050_v50, %v4049_v28 }
 0x31f   : > { %v5164_v4 = vpop.f32.mrf.mxu1  ;;  %v3982_v14 = vmul.f32 %v5810_v13, %v8314_v17  ;;  %v3983_v55 = vmul.f32 %v5811_v46, %v8314_v17  ;;  %v8411_v15 = vpop.f32.mrf.mxu0 }
 0x320   : > { %v8401_v31 = vadd.f32 %v5163_v54, %v8185_v6  ;;  %9628 = vst [vmem:[#allocation101_spill] sm:$0xff] %v8411_v15  ;;  %v4019_v6 = vadd.f32 %v8332_v1, %v3980_v60  ;;  %v4020_v54 = vadd.f32 %v8332_v1, %v3981_v58  ;;  %5535 = vmatmul.mubr.bf16.gmra.mxu0 %v4076_v35 }
 0x321   : > { %v5165_v47 = vpop.f32.mrf.mxu1  ;;  %v8415_v41 = vpop.f32.mrf.mxu0  ;;  %v4022_v28 = vadd.f32 %v8332_v1, %v3983_v55 }
 0x322   : > { %9627 = vst [vmem:[#allocation104_spill] sm:$0xff] %v8401_v31  ;;  %v5166_v42 = vadd.f32 %v5165_v47, %v5164_v4  ;;  %9629 = vst [vmem:[#allocation91_spill] sm:$0xff] %v8415_v41  ;;  %v4051_v13 = vmax.f32 %v4019_v6, 0.0  ;;  %v4052_v46 = vmax.f32 %v4020_v54, 0.0  ;;  %v4021_v4 = vadd.f32 %v8332_v1, %v3982_v14  ;;  %v5812_v6 = vld [vmem:[%s6278_s20 + $0x80] sm:$0xff]  ;;  %v5814_v41 = vld [vmem:[%s6278_s20 + $0x90] sm:$0xff] }
 0x323   : > { %v5167_v19 = vpop.f32.mrf.mxu1  ;;  %v8420_v15 = vpop.f32.mrf.mxu0  ;;  %v3984_v54 = vmul.f32 %v5812_v6, %v8314_v17  ;;  %v3986_v55 = vmul.f32 %v5814_v41, %v8314_v17 }
 0x324   : > { %v8418_v24 = vadd.f32 %v5166_v42, %v8190_v39  ;;  %9630 = vst [vmem:[#allocation29_spill] sm:$0xff] %v8420_v15  ;;  %v4077_v60 = vpack.c.bf16 %v4052_v46, %v4051_v13  ;;  %v4053_v35 = vmax.f32 %v4021_v4, 0.0  ;;  %v4054_v39 = vmax.f32 %v4022_v28, 0.0  ;;  %v5813_v15 = vld [vmem:[%s6278_s20 + $0x88] sm:$0xff] }
 0x325   : > { %v5168_v31 = vpop.f32.mrf.mxu1  ;;  %v8424_v47 = vpop.f32.mrf.mxu0  ;;  %v3985_v14 = vmul.f32 %v5813_v15, %v8314_v17 }
 0x326   : > { %v5169_v50 = vadd.f32 %v5168_v31, %v5167_v19  ;;  %9631 = vst [vmem:[#allocation86_spill] sm:$0xff] %v8424_v47  ;;  %5538 = vmatprep.mubr.bf16.mxu0 %v4077_v60  ;;  %v5815_v31 = vld [vmem:[%s6278_s20 + $0x98] sm:$0xff]  ;;  %v4078_v4 = vpack.c.bf16 %v4054_v39, %v4053_v35 }
 0x327   : > { %v5170_v58 = vpop.f32.mrf.mxu1  ;;  %v3987_v19 = vmul.f32 %v5815_v31, %v8314_v17  ;;  %v8437_v46 = vpop.f32.mrf.mxu0 }
 0x328   : > { %v8427_v42 = vadd.f32 %v5169_v50, %v8199_v51  ;;  %9632 = vst [vmem:[#allocation89_spill] sm:$0xff] %v8437_v46  ;;  %v4023_v51 = vadd.f32 %v8332_v1, %v3984_v54  ;;  %v4024_v50 = vadd.f32 %v8332_v1, %v3985_v14  ;;  %5539 = vmatmul.mubr.bf16.gmra.mxu0 %v4078_v4 }
 0x329   : > { %v5171_v13 = vpop.f32.mrf.mxu1  ;;  %v8441_v6 = vpop.f32.mrf.mxu0  ;;  %v4026_v35 = vadd.f32 %v8332_v1, %v3987_v19 }
 0x32a   : > { %v5172_v28 = vadd.f32 %v5171_v13, %v5170_v58  ;;  %9633 = vst [vmem:[#allocation31_spill] sm:$0xff] %v8441_v6  ;;  %v4055_v41 = vmax.f32 %v4023_v51, 0.0  ;;  %v4056_v31 = vmax.f32 %v4024_v50, 0.0  ;;  %v4025_v58 = vadd.f32 %v8332_v1, %v3986_v55  ;;  %v5816_v51 = vld [vmem:[%s6278_s20 + $0xa0] sm:$0xff]  ;;  %v5817_v6 = vld [vmem:[%s6278_s20 + $0xa8] sm:$0xff] }
 0x32b   : > { %v5173_v60 = vpop.f32.mrf.mxu1  ;;  %v8446_v46 = vpop.f32.mrf.mxu0  ;;  %v3988_v50 = vmul.f32 %v5816_v51, %v8314_v17  ;;  %v3989_v55 = vmul.f32 %v5817_v6, %v8314_v17 }
 0x32c   : > { %v8444_v15 = vadd.f32 %v5172_v28, %v8206_v18  ;;  %v4079_v54 = vpack.c.bf16 %v4056_v31, %v4055_v41  ;;  %v4057_v4 = vmax.f32 %v4025_v58, 0.0  ;;  %v4058_v18 = vmax.f32 %v4026_v35, 0.0 }
 0x32d   : > { %v5174_v47 = vpop.f32.mrf.mxu1  ;;  %v8450_v13 = vpop.f32.mrf.mxu0 }
 0x32e   : > { %9634 = vst [vmem:[#allocation33_spill] sm:$0xff] %v8444_v15  ;;  %v5175_v39 = vadd.f32 %v5174_v47, %v5173_v60  ;;  %5542 = vmatprep.mubr.bf16.mxu0 %v4079_v54  ;;  %v5818_v15 = vld [vmem:[%s6278_s20 + $0xb0] sm:$0xff]  ;;  %v5819_v47 = vld [vmem:[%s6278_s20 + $0xb8] sm:$0xff]  ;;  %v4080_v58 = vpack.c.bf16 %v4058_v18, %v4057_v4 }
 0x32f   : > { %v5176_v14 = vpop.f32.mrf.mxu1  ;;  %v3990_v19 = vmul.f32 %v5818_v15, %v8314_v17  ;;  %v3991_v60 = vmul.f32 %v5819_v47, %v8314_v17  ;;  %v8463_v31 = vpop.f32.mrf.mxu0 }
 0x330   : > { %v8453_v28 = vadd.f32 %v5175_v39, %v8213_v29  ;;  %9636 = vst [vmem:[#allocation90_spill] sm:$0xff] %v8463_v31  ;;  %v4027_v29 = vadd.f32 %v8332_v1, %v3988_v50  ;;  %v4028_v39 = vadd.f32 %v8332_v1, %v3989_v55  ;;  %5543 = vmatmul.mubr.bf16.gmra.mxu0 %v4080_v58 }
 0x331   : > { %v5177_v41 = vpop.f32.mrf.mxu1  ;;  %v8467_v51 = vpop.f32.mrf.mxu0  ;;  %v4030_v4 = vadd.f32 %v8332_v1, %v3991_v60  ;;  %v5822_v60 = vld [vmem:[%s6278_s20 + $0xd0] sm:$0xff] }
 0x332   : > { %9635 = vst [vmem:[#allocation87_spill] sm:$0xff] %v8453_v28  ;;  %v5178_v35 = vadd.f32 %v5177_v41, %v5176_v14  ;;  %9637 = vst [vmem:[#allocation93_spill] sm:$0xff] %v8467_v51  ;;  %v4059_v15 = vmax.f32 %v4027_v29, 0.0  ;;  %v4060_v47 = vmax.f32 %v4028_v39, 0.0  ;;  %v4029_v14 = vadd.f32 %v8332_v1, %v3990_v19  ;;  %v5820_v29 = vld [vmem:[%s6278_s20 + $0xc0] sm:$0xff] }
 0x333   : > { %v5179_v54 = vpop.f32.mrf.mxu1  ;;  %v8472_v31 = vpop.f32.mrf.mxu0  ;;  %v4062_v58 = vmax.f32 %v4030_v4, 0.0  ;;  %v3992_v39 = vmul.f32 %v5820_v29, %v8314_v17  ;;  %v5824_v4 = vld [vmem:[%s6278_s20 + $0xf0] sm:$0xff] }
 0x334   : > { %v8470_v6 = vadd.f32 %v5178_v35, %v8217_v45  ;;  %9639 = vst [vmem:[#allocation70_spill] sm:$0xff] %v8472_v31  ;;  %v4081_v50 = vpack.c.bf16 %v4060_v47, %v4059_v15  ;;  %v4061_v45 = vmax.f32 %v4029_v14, 0.0  ;;  %v5821_v31 = vld [vmem:[%s6278_s20 + $0xc8] sm:$0xff] }
 0x335   : > { %v5180_v28 = vpop.f32.mrf.mxu1  ;;  %v8476_v41 = vpop.f32.mrf.mxu0  ;;  %v3993_v19 = vmul.f32 %v5821_v31, %v8314_v17  ;;  %v4031_v29 = vadd.f32 %v8332_v1, %v3992_v39 }
 0x336   : > { %9638 = vst [vmem:[#allocation95_spill] sm:$0xff] %v8470_v6  ;;  %v5181_v18 = vadd.f32 %v5180_v28, %v5179_v54  ;;  %9640 = vst [vmem:[#allocation73_spill] sm:$0xff] %v8476_v41  ;;  %5546 = vmatprep.mubr.bf16.mxu0 %v4081_v50  ;;  %v3994_v28 = vmul.f32 %v5822_v60, %v8314_v17  ;;  %v5823_v54 = vld [vmem:[%s6278_s20 + $0xd8] sm:$0xff]  ;;  %v4082_v14 = vpack.c.bf16 %v4062_v58, %v4061_v45 }
 0x337   : > { %v5182_v55 = vpop.f32.mrf.mxu1  ;;  %v3995_v15 = vmul.f32 %v5823_v54, %v8314_v17  ;;  %v8491_v50 = vpop.f32.mrf.mxu0  ;;  %v4032_v31 = vadd.f32 %v8332_v1, %v3993_v19  ;;  %v5825_v60 = vld [vmem:[%s6278_s20 + $0xf8] sm:$0xff]  ;;  %v4063_v45 = vmax.f32 %v4031_v29, 0.0 }
 0x338   : > { %v8479_v35 = vadd.f32 %v5181_v18, %v8223_v21  ;;  %v3998_v21 = vmul.f32 %v5824_v4, %v8314_v17  ;;  %9642 = vst [vmem:[#allocation97_spill] sm:$0xff] %v8491_v50  ;;  %5547 = vmatmul.mubr.bf16.gmra.mxu0 %v4082_v14  ;;  %v5826_v4 = vld [vmem:[%s6278_s20 + $0xe0] sm:$0xff]  ;;  %v5827_v50 = vld [vmem:[%s6278_s20 + $0xe8] sm:$0xff] }
 0x339   : > { %v5183_v47 = vpop.f32.mrf.mxu1  ;;  %v4064_v58 = vmax.f32 %v4032_v31, 0.0  ;;  %v3996_v39 = vmul.f32 %v5826_v4, %v8314_v17  ;;  %v3997_v19 = vmul.f32 %v5827_v50, %v8314_v17  ;;  %v8506_v14 = vpop.f32.mrf.mxu0 }
 0x33a   : > { %9641 = vst [vmem:[#allocation94_spill] sm:$0xff] %v8479_v35  ;;  %v5184_v18 = vadd.f32 %v5183_v47, %v5182_v55  ;;  %v3999_v35 = vmul.f32 %v5825_v60, %v8314_v17  ;;  %v4033_v55 = vadd.f32 %v8332_v1, %v3994_v28  ;;  %v4034_v47 = vadd.f32 %v8332_v1, %v3995_v15 }
 0x33b   : > { %v5185_v41 = vpop.f32.mrf.mxu1  ;;  %9644 = vst [vmem:[#allocation98_spill] sm:$0xff] %v8506_v14  ;;  %v4083_v60 = vpack.c.bf16 %v4064_v58, %v4063_v45  ;;  %v4036_v28 = vadd.f32 %v8332_v1, %v3997_v19  ;;  %v8515_v45 = vpop.f32.mrf.mxu0 }
 0x33c   : > { %v8498_v54 = vadd.f32 %v5184_v18, %v8225_v62  ;;  %v4037_v62 = vadd.f32 %v8332_v1, %v3998_v21  ;;  %v4065_v29 = vmax.f32 %v4033_v55, 0.0  ;;  %v4066_v31 = vmax.f32 %v4034_v47, 0.0 }
 0x33d   : > { %v5186_v51 = vpop.f32.mrf.mxu1  ;;  %5550 = vmatprep.mubr.bf16.mxu0 %v4083_v60  ;;  %v4038_v4 = vadd.f32 %v8332_v1, %v3999_v35  ;;  %v8520_v19 = vpop.f32.mrf.mxu0 }
 0x33e   : > { %9643 = vst [vmem:[#allocation99_spill] sm:$0xff] %v8498_v54  ;;  %v5187_v6 = vadd.f32 %v5186_v51, %v5185_v41  ;;  %v4035_v54 = vadd.f32 %v8332_v1, %v3996_v39  ;;  %v4069_v17 = vmax.f32 %v4037_v62, 0.0  ;;  %v4084_v14 = vpack.c.bf16 %v4066_v31, %v4065_v29 }
 0x33f   : > { %v5188_v18 = vpop.f32.mrf.mxu1  ;;  %v4068_v41 = vmax.f32 %v4036_v28, 0.0  ;;  %v4070_v58 = vmax.f32 %v4038_v4, 0.0  ;;  %v8525_v62 = vpop.f32.mrf.mxu0 }
 0x340   : > { %v8512_v15 = vadd.f32 %v5187_v6, %v8230_v16  ;;  %v4067_v51 = vmax.f32 %v4035_v54, 0.0  ;;  %5551 = vmatmul.mubr.bf16.gmra.mxu0 %v4084_v14 }
 0x341   : > { %v5189_v50 = vpop.f32.mrf.mxu1  ;;  %v4086_v16 = vpack.c.bf16 %v4070_v58, %v4069_v17  ;;  %v8530_v31 = vpop.f32.mrf.mxu0 }
 0x342   : > { %v5190_v21 = vadd.f32 %v5189_v50, %v5188_v18  ;;  %v4085_v47 = vpack.c.bf16 %v4068_v41, %v4067_v51 }
 0x343   : > { %v5191_v55 = vpop.f32.mrf.mxu1 }
 0x344   : > { %v8518_v39 = vadd.f32 %v5190_v21, %v8235_v3  ;;  %5554 = vmatprep.mubr.bf16.mxu0 %v4085_v47 }
 0x345   : > { %v5192_v6 = vpop.f32.mrf.mxu1 }
 0x346   : > { %v5193_v1 = vadd.f32 %v5192_v6, %v5191_v55 }
 0x347   : > { %v5194_v35 = vpop.f32.mrf.mxu1 }
 0x348   : > { %v8523_v54 = vadd.f32 %v5193_v1, %v8240_v61  ;;  %5555 = vmatmul.mubr.bf16.gmra.mxu0 %v4086_v16  ;;  %v8535_v61 = vpop.f32.mrf.mxu0 }
 0x349   : > { %v5195_v60 = vpop.f32.mrf.mxu1 }
 0x34a   : > { %v5196_v18 = vadd.f32 %v5195_v60, %v5194_v35  ;;  %v8540_v55 = vpop.f32.mrf.mxu0 }
 0x34b   : > { %v5197_v29 = vpop.f32.mrf.mxu1 }
 0x34c   : > { %v8528_v14 = vadd.f32 %v5196_v18, %v8245_v43  ;;  %v8545_v1 = vpop.f32.mrf.mxu0 }
 0x34d   : > { %v5198_v3 = vpop.f32.mrf.mxu1 }
 0x34e   : > { %v5199_v28 = vadd.f32 %v5198_v3, %v5197_v29  ;;  %v8550_v29 = vpop.f32.mrf.mxu0 }
 0x34f   : > { %v5200_v4 = vpop.f32.mrf.mxu1 }
 0x350   : > { %v8533_v17 = vadd.f32 %v5199_v28, %v8250_v44 }
 0x351   : > { %v5201_v50 = vpop.f32.mrf.mxu1 }
 0x352   : > { %v5202_v51 = vadd.f32 %v5201_v50, %v5200_v4  ;;  %v8555_v50 = vpop.f32.mrf.mxu0 }
 0x353   : > { %v5203_v41 = vpop.f32.mrf.mxu1 }
 0x354   : > { %v8538_v21 = vadd.f32 %v5202_v51, %v8255_v53 }
 0x355   : > { %v5204_v58 = vpop.f32.mrf.mxu1 }
 0x356   : > { %v5205_v43 = vadd.f32 %v5204_v58, %v5203_v41 }
 0x357   : > { %v5206_v47 = vpop.f32.mrf.mxu1 }
 0x358   : > { %v8543_v16 = vadd.f32 %v5205_v43, %v8260_v32  ;;  %v8560_v43 = vpop.f32.mrf.mxu0 }
 0x359   : > { %v5207_v6 = vpop.f32.mrf.mxu1 }
 0x35a   : > { %v5208_v44 = vadd.f32 %v5207_v6, %v5206_v47 }
 0x35b   : > { %v5209_v35 = vpop.f32.mrf.mxu1 }
 0x35c   : > { %v8548_v60 = vadd.f32 %v5208_v44, %v8265_v2 }
 0x35d   : > { %v5210_v18 = vpop.f32.mrf.mxu1 }
 0x35e   : > { %v5211_v53 = vadd.f32 %v5210_v18, %v5209_v35  ;;  %v8565_v35 = vpop.f32.mrf.mxu0 }
 0x35f   : > { %v5212_v3 = vpop.f32.mrf.mxu1 }
 0x360   : > { %v8553_v28 = vadd.f32 %v5211_v53, %v8270_v8 }
 0x361   : > { %v5213_v4 = vpop.f32.mrf.mxu1 }
 0x362   : > { %9645 = vst [vmem:[#allocation100_spill] sm:$0xff] %v8553_v28  ;;  %v5214_v32 = vadd.f32 %v5213_v4, %v5212_v3  ;;  %v8570_v4 = vpop.f32.mrf.mxu0 }
 0x363   : > { %v5215_v51 = vpop.f32.mrf.mxu1 }
 0x364   : > { %v8558_v41 = vadd.f32 %v5214_v32, %v8275_v23 }
 0x365   : > { %v5216_v58 = vpop.f32.mrf.mxu1 }
 0x366   : > { %v5217_v2 = vadd.f32 %v5216_v58, %v5215_v51  ;;  %v8575_v58 = vpop.f32.mrf.mxu0 }
 0x367   : > { %v5218_v47 = vpop.f32.mrf.mxu1 }
 0x368   : > { %v8563_v6 = vadd.f32 %v5217_v2, %v8281_v27 }
 0x369   : > { %v5219_v44 = vpop.f32.mrf.mxu1 }
 0x36a   : > { %v5220_v8 = vadd.f32 %v5219_v44, %v5218_v47  ;;  %v5254_v47 = vadd.f32 %v8301_v25, %v8297_v48 }
 0x36b   : > { %v5221_v18 = vpop.f32.mrf.mxu1 }
 0x36c   : > { %v8568_v53 = vadd.f32 %v5220_v8, %v8288_v52  ;;  %v8586_v8 = vpop.f32.mrf.mxu0 }
 0x36d   : > { %v5222_v3 = vpop.f32.mrf.mxu1 }
 0x36e   : > { %9646 = vst [vmem:[#allocation105_spill] sm:$0xff] %v8568_v53  ;;  %v5223_v23 = vadd.f32 %v5222_v3, %v5221_v18  ;;  %v3572_v18 = vadd.f32 %v5254_v47, %v8320_v57  ;;  %v8592_v3 = vld [vmem:[%s8863_s7] ss:$0 sm:$0xff]  ;;  %v8596_v25 = vpop.f32.mrf.mxu0 }
 0x36f   : > { %v5224_v32 = vpop.f32.mrf.mxu1  ;;  %v8604_v57 = vld [vmem:[%s8864_s8] ss:$0 sm:$0xff] }
 0x370   : > { %v8573_v28 = vadd.f32 %v5223_v23, %v8290_v12  ;;  %v5257_v23 = vadd.f32 %v8308_v63, %v8304_v36 }
 0x371   : > { %v5225_v51 = vpop.f32.mrf.mxu1 }
 0x372   : > { %9647 = vst [vmem:[#allocation107_spill] sm:$0xff] %v8573_v28  ;;  %v5226_v27 = vadd.f32 %v5225_v51, %v5224_v32  ;;  %v5266_v28 = vadd.f32 %v8345_v11, %v8343_v9 }
 0x373   : > { %v8577_v2 = vpop.f32.mrf.mxu1 }
 0x374   : > { %v8582_v52 = vadd.f32 %v5226_v27, %v8292_v33  ;;  %v3575_v27 = vadd.f32 %v5257_v23, %v8327_v5 }
 0x375   : > { %v8584_v44 = vpop.f32.mrf.mxu1 }
 0x377   : > { %v5480_v12 = vpop.f32.mrf.mxu1 }
 0x378   : > { %v3733_v32 = vadd.f32 %v5480_v12, %v3572_v18  ;;  %v5260_v18 = vadd.f32 %v8324_v0, %v8322_v56 }
 0x379   : > { %v3724_v48 = vpop.f32.mrf.mxu1 }
 0x37a   : > { %v3860_v33 = vmul.f32 %v8592_v3, %v3733_v32  ;;  %v3725_v51 = vadd.f32 %v3724_v48, %v8299_v22  ;;  %v8611_v32 = vpop.f32.mrf.mxu0  ;;  %v3588_v48 = vadd.f32 %v5266_v28, %v8366_v7  ;;  %v3580_v9 = vadd.f32 %v5260_v18, %v8341_v38 }
 0x37b   : > { %v5481_v47 = vpop.f32.mrf.mxu1 }
 0x37c   : > { %v3858_v36 = vmul.f32 %v8592_v3, %v3725_v51  ;;  %v3736_v63 = vadd.f32 %v5481_v47, %v3575_v27  ;;  %v3899_v22 = vadd.f32 %v8604_v57, %v3860_v33  ;;  %v5263_v27 = vadd.f32 %v8338_v49, %v8336_v26 }
 0x37d   : > { %v3727_v12 = vpop.f32.mrf.mxu1  ;;  %v5269_v33 = vadd.f32 %v8363_v20, %v8359_v10  ;;  %v5278_v26 = vadd.f32 %v8398_v40, %v8394_v59 }
 0x37e   : > { %v3861_v5 = vmul.f32 %v8592_v3, %v3736_v63  ;;  %v3728_v23 = vadd.f32 %v3727_v12, %v8306_v30  ;;  %v3897_v11 = vadd.f32 %v8604_v57, %v3858_v36  ;;  %v8625_v30 = vpop.f32.mrf.mxu0  ;;  %v3931_v7 = vmax.f32 %v3899_v22, 0.0 }
 0x37f   : > { %v5484_v53 = vpop.f32.mrf.mxu1  ;;  %v3591_v18 = vadd.f32 %v5269_v33, %v8375_v37  ;;  %v3604_v37 = vadd.f32 %v5278_v26, %v8418_v24 }
 0x380   : > { %v3900_v51 = vadd.f32 %v8604_v57, %v3861_v5  ;;  %v3859_v56 = vmul.f32 %v8592_v3, %v3728_v23  ;;  %v3749_v0 = vadd.f32 %v5484_v53, %v3588_v48  ;;  %v3583_v53 = vadd.f32 %v5263_v27, %v8349_v34  ;;  %v9648_v48 = vld [vmem:[#allocation102_spill] sm:$0xff]  ;;  %v9651_v27 = vld [vmem:[#allocation91_spill] sm:$0xff] }
 0x381   : > { %v3740_v47 = vpop.f32.mrf.mxu1  ;;  %v3929_v49 = vmax.f32 %v3897_v11, 0.0  ;;  %v9650_v11 = vld [vmem:[#allocation101_spill] sm:$0xff] }
 0x382   : > { %v3932_v28 = vmax.f32 %v3900_v51, 0.0  ;;  %v3898_v38 = vadd.f32 %v8604_v57, %v3859_v56  ;;  %v3741_v63 = vadd.f32 %v3740_v47, %v3580_v9  ;;  %v3864_v36 = vmul.f32 %v8592_v3, %v3749_v0  ;;  %v9649_v51 = vld [vmem:[#allocation55_spill] sm:$0xff]  ;;  %v8636_v56 = vpop.f32.mrf.mxu0 }
 0x383   : > { %v5485_v12 = vpop.f32.mrf.mxu1  ;;  %v5272_v9 = vadd.f32 %v9649_v51, %v9648_v48  ;;  %v5281_v47 = vadd.f32 %v9651_v27, %v9650_v11  ;;  %v9656_v11 = vld [vmem:[#allocation29_spill] sm:$0xff]  ;;  %v9657_v27 = vld [vmem:[#allocation86_spill] sm:$0xff] }
 0x384   : > { %v4313_v10 = vpack.c.bf16 %v3932_v28, %v3931_v7  ;;  %v3930_v20 = vmax.f32 %v3898_v38, 0.0  ;;  %v3862_v5 = vmul.f32 %v8592_v3, %v3741_v63  ;;  %v3752_v22 = vadd.f32 %v5485_v12, %v3591_v18  ;;  %v9652_v38 = vld [vmem:[#allocation131_spill] sm:$0xff] }
 0x385   : > { %v3743_v23 = vpop.f32.mrf.mxu1  ;;  %v3903_v34 = vadd.f32 %v8604_v57, %v3864_v36  ;;  %v3596_v63 = vadd.f32 %v5272_v9, %v9652_v38  ;;  %v9653_v18 = vld [vmem:[#allocation103_spill] sm:$0xff]  ;;  %v3607_v48 = vadd.f32 %v5281_v47, %v8427_v42 }
 0x386   : > { %v3744_v0 = vadd.f32 %v3743_v23, %v3583_v53  ;;  %v4312_v33 = vpack.c.bf16 %v3930_v20, %v3929_v49  ;;  %v3865_v59 = vmul.f32 %v8592_v3, %v3752_v22  ;;  %v9654_v12 = vld [vmem:[#allocation27_spill] sm:$0xff]  ;;  %v3901_v24 = vadd.f32 %v8604_v57, %v3862_v5  ;;  %v8649_v49 = vpop.f32.mrf.mxu0 }
 0x387   : > { %v5488_v40 = vpop.f32.mrf.mxu1  ;;  %v5275_v53 = vadd.f32 %v9654_v12, %v9653_v18  ;;  %v3935_v51 = vmax.f32 %v3903_v34, 0.0  ;;  %v5290_v5 = vadd.f32 %v8450_v13, %v8446_v46  ;;  %v9658_v12 = vld [vmem:[#allocation95_spill] sm:$0xff] }
 0x388   : > { %v3863_v7 = vmul.f32 %v8592_v3, %v3744_v0  ;;  %v3765_v28 = vadd.f32 %v5488_v40, %v3604_v37  ;;  %5574 = vmatprep.mubr.bf16.mxu1 %v4312_v33  ;;  %v3904_v26 = vadd.f32 %v8604_v57, %v3865_v59  ;;  %v9655_v37 = vld [vmem:[#allocation104_spill] sm:$0xff]  ;;  %v3933_v38 = vmax.f32 %v3901_v24, 0.0  ;;  %v8660_v18 = vpop.f32.mrf.mxu0 }
 0x389   : > { %v3756_v36 = vpop.f32.mrf.mxu1  ;;  %5575 = vmatmul.mubr.bf16.vlgmr.msra.gmra.mxu1 %v4313_v10  ;;  %v3599_v33 = vadd.f32 %v5275_v53, %v9655_v37  ;;  %v3620_v53 = vadd.f32 %v5290_v5, %v9658_v12  ;;  %v9663_v37 = vld [vmem:[#allocation93_spill] sm:$0xff] }
 0x38a   : > { %v3902_v20 = vadd.f32 %v8604_v57, %v3863_v7  ;;  %v3868_v22 = vmul.f32 %v8592_v3, %v3765_v28  ;;  %v3757_v23 = vadd.f32 %v3756_v36, %v3596_v63  ;;  %v3936_v9 = vmax.f32 %v3904_v26, 0.0  ;;  %v9659_v26 = vld [vmem:[#allocation33_spill] sm:$0xff]  ;;  %v8673_v5 = vpop.f32.mrf.mxu0 }
 0x38b   : > { %v5489_v0 = vpop.f32.mrf.mxu1  ;;  %v5284_v7 = vadd.f32 %v9657_v27, %v9656_v11 }
 0x38c   : > { %v3934_v59 = vmax.f32 %v3902_v20, 0.0  ;;  %v3866_v10 = vmul.f32 %v8592_v3, %v3757_v23  ;;  %v3768_v40 = vadd.f32 %v5489_v0, %v3607_v48  ;;  %v4315_v28 = vpack.c.bf16 %v3936_v9, %v3935_v51  ;;  %v9660_v51 = vld [vmem:[#allocation89_spill] sm:$0xff]  ;;  %v9661_v9 = vld [vmem:[#allocation31_spill] sm:$0xff] }
 0x38d   : > { %v3759_v63 = vpop.f32.mrf.mxu1  ;;  %v3907_v42 = vadd.f32 %v8604_v57, %v3868_v22  ;;  %v3612_v36 = vadd.f32 %v5284_v7, %v9659_v26  ;;  %v5287_v0 = vadd.f32 %v9661_v9, %v9660_v51  ;;  %v9662_v22 = vld [vmem:[#allocation90_spill] sm:$0xff]  ;;  %v8684_v9 = vpop.f32.mrf.mxu0 }
 0x38e   : > { %v3869_v34 = vmul.f32 %v8592_v3, %v3768_v40  ;;  %v3760_v47 = vadd.f32 %v3759_v63, %v3599_v33  ;;  %v4314_v13 = vpack.c.bf16 %v3934_v59, %v3933_v38  ;;  %v3905_v20 = vadd.f32 %v8604_v57, %v3866_v10  ;;  %v9664_v38 = vld [vmem:[#allocation94_spill] sm:$0xff] }
 0x38f   : > { %v5492_v46 = vpop.f32.mrf.mxu1  ;;  %v5293_v40 = vadd.f32 %v9663_v37, %v9662_v22  ;;  %v3939_v59 = vmax.f32 %v3907_v42, 0.0 }
 0x390   : > { %v3908_v23 = vadd.f32 %v8604_v57, %v3869_v34  ;;  %v3867_v24 = vmul.f32 %v8592_v3, %v3760_v47  ;;  %v3781_v48 = vadd.f32 %v5492_v46, %v3620_v53  ;;  %5578 = vmatprep.mubr.bf16.mxu1 %v4314_v13  ;;  %v9665_v47 = vld [vmem:[#allocation87_spill] sm:$0xff]  ;;  %v5302_v53 = vadd.f32 %v8520_v19, %v8515_v45 }
 0x391   : > { %v3772_v33 = vpop.f32.mrf.mxu1  ;;  %5579 = vmatmul.mubr.bf16.gmra.mxu1 %v4315_v28  ;;  %v3623_v63 = vadd.f32 %v5293_v40, %v9664_v38  ;;  %v3615_v12 = vadd.f32 %v5287_v0, %v9665_v47  ;;  %v3937_v46 = vmax.f32 %v3905_v20, 0.0  ;;  %v5305_v20 = vadd.f32 %v8530_v31, %v8525_v62 }
 0x392   : > { %v3940_v11 = vmax.f32 %v3908_v23, 0.0  ;;  %v3906_v27 = vadd.f32 %v8604_v57, %v3867_v24  ;;  %v3773_v10 = vadd.f32 %v3772_v33, %v3612_v36  ;;  %v3872_v7 = vmul.f32 %v8592_v3, %v3781_v48  ;;  %v9666_v24 = vld [vmem:[#allocation70_spill] sm:$0xff]  ;;  %v9667_v36 = vld [vmem:[#allocation73_spill] sm:$0xff] }
 0x393   : > { %v5493_v34 = vpop.f32.mrf.mxu1  ;;  %v5296_v28 = vadd.f32 %v9667_v36, %v9666_v24  ;;  %v3636_v22 = vadd.f32 %v5302_v53, %v8518_v39 }
 0x394   : > { %v4317_v13 = vpack.c.bf16 %v3940_v11, %v3939_v59  ;;  %v3938_v26 = vmax.f32 %v3906_v27, 0.0  ;;  %v3870_v42 = vmul.f32 %v8592_v3, %v3773_v10  ;;  %v3784_v23 = vadd.f32 %v5493_v34, %v3623_v63  ;;  %v9668_v59 = vld [vmem:[#allocation99_spill] sm:$0xff]  ;;  %v9669_v27 = vld [vmem:[#allocation97_spill] sm:$0xff]  ;;  %v9670_v10 = vld [vmem:[#allocation98_spill] sm:$0xff]  ;;  %v8697_v34 = vpop.f32.mrf.mxu0 }
 0x395   : > { %v3775_v51 = vpop.f32.mrf.mxu1  ;;  %v3911_v0 = vadd.f32 %v8604_v57, %v3872_v7  ;;  %v3628_v11 = vadd.f32 %v5296_v28, %v9668_v59  ;;  %v5299_v38 = vadd.f32 %v9670_v10, %v9669_v27  ;;  %v5308_v28 = vadd.f32 %v8540_v55, %v8535_v61 }
 0x396   : > { %v3776_v48 = vadd.f32 %v3775_v51, %v3615_v12  ;;  %v4316_v37 = vpack.c.bf16 %v3938_v26, %v3937_v46  ;;  %v3873_v45 = vmul.f32 %v8592_v3, %v3784_v23  ;;  %v3909_v39 = vadd.f32 %v8604_v57, %v3870_v42 }
 0x397   : > { %v5496_v19 = vpop.f32.mrf.mxu1  ;;  %v3639_v12 = vadd.f32 %v5305_v20, %v8523_v54  ;;  %v3943_v53 = vmax.f32 %v3911_v0, 0.0  ;;  %v3631_v23 = vadd.f32 %v5299_v38, %v8512_v15  ;;  %v5314_v42 = vadd.f32 %v8560_v43, %v8555_v50 }
 0x398   : > { %v3871_v40 = vmul.f32 %v8592_v3, %v3776_v48  ;;  %v3797_v33 = vadd.f32 %v5496_v19, %v3636_v22  ;;  %5582 = vmatprep.mubr.bf16.mxu1 %v4316_v37  ;;  %v3912_v63 = vadd.f32 %v8604_v57, %v3873_v45  ;;  %v3941_v48 = vmax.f32 %v3909_v39, 0.0  ;;  %v8708_v37 = vpop.f32.mrf.mxu0 }
 0x399   : > { %v3788_v7 = vpop.f32.mrf.mxu1  ;;  %5583 = vmatmul.mubr.bf16.gmra.mxu1 %v4317_v13  ;;  %v3652_v45 = vadd.f32 %v5314_v42, %v8538_v21  ;;  %v3644_v19 = vadd.f32 %v5308_v28, %v8528_v14  ;;  %v5317_v59 = vadd.f32 %v8570_v4, %v8565_v35 }
 0x39a   : > { %v3910_v47 = vadd.f32 %v8604_v57, %v3871_v40  ;;  %v3876_v62 = vmul.f32 %v8592_v3, %v3797_v33  ;;  %v3789_v31 = vadd.f32 %v3788_v7, %v3628_v11  ;;  %v3944_v46 = vmax.f32 %v3912_v63, 0.0  ;;  %v5336_v21 = vpop.f32.mrf.mxu0 }
 0x39b   : > { %v5497_v26 = vpop.f32.mrf.mxu1  ;;  %v5311_v33 = vadd.f32 %v8550_v29, %v8545_v1  ;;  %v3655_v63 = vadd.f32 %v5317_v59, %v8543_v16  ;;  %v5326_v1 = vadd.f32 %v8636_v56, %v8625_v30  ;;  %v5329_v56 = vadd.f32 %v8660_v18, %v8649_v49 }
 0x39c   : > { %v3942_v51 = vmax.f32 %v3910_v47, 0.0  ;;  %v3874_v24 = vmul.f32 %v8592_v3, %v3789_v31  ;;  %v3800_v36 = vadd.f32 %v5497_v26, %v3639_v12  ;;  %v4319_v22 = vpack.c.bf16 %v3944_v46, %v3943_v53  ;;  %v5337_v46 = vpop.f32.mrf.mxu0 }
 0x39d   : > { %v3791_v13 = vpop.f32.mrf.mxu1  ;;  %v3915_v54 = vadd.f32 %v8604_v57, %v3876_v62  ;;  %v3647_v47 = vadd.f32 %v5311_v33, %v8533_v17  ;;  %v5320_v53 = vadd.f32 %v8586_v8, %v8575_v58  ;;  %v3668_v16 = vadd.f32 %v5326_v1, %v8558_v41 }
 0x39e   : > { %v3877_v0 = vmul.f32 %v8592_v3, %v3800_v36  ;;  %v3792_v15 = vadd.f32 %v3791_v13, %v3631_v23  ;;  %v4318_v43 = vpack.c.bf16 %v3942_v51, %v3941_v48  ;;  %v3913_v20 = vadd.f32 %v8604_v57, %v3874_v24  ;;  %v5339_v48 = vpop.f32.mrf.mxu0 }
 0x39f   : > { %v5500_v50 = vpop.f32.mrf.mxu1  ;;  %v3947_v27 = vmax.f32 %v3915_v54, 0.0  ;;  %v3660_v36 = vadd.f32 %v5320_v53, %v8548_v60  ;;  %v5323_v58 = vadd.f32 %v8611_v32, %v8596_v25  ;;  %v3671_v18 = vadd.f32 %v5329_v56, %v8563_v6  ;;  %v9671_v32 = vld [vmem:[#allocation100_spill] sm:$0xff]  ;;  %v9674_v53 = vld [vmem:[#allocation107_spill] sm:$0xff] }
 0x3a0   : > { %v3916_v61 = vadd.f32 %v8604_v57, %v3877_v0  ;;  %v3875_v55 = vmul.f32 %v8592_v3, %v3792_v15  ;;  %v3813_v40 = vadd.f32 %v5500_v50, %v3652_v45  ;;  %5586 = vmatprep.mubr.bf16.mxu1 %v4318_v43  ;;  %v3945_v29 = vmax.f32 %v3913_v20, 0.0  ;;  %v5340_v6 = vpop.f32.mrf.mxu0 }
 0x3a1   : > { %v3804_v11 = vpop.f32.mrf.mxu1  ;;  %5587 = vmatmul.mubr.bf16.gmra.mxu1 %v4319_v22  ;;  %v5229_v60 = vadd.f32 %v8584_v44, %v8577_v2  ;;  %v3663_v15 = vadd.f32 %v5323_v58, %v9671_v32  ;;  %v5338_v45 = vadd.f32 %v5337_v46, %v5336_v21  ;;  %v5332_v20 = vadd.f32 %v8684_v9, %v8673_v5 }
 0x3a2   : > { %v3948_v10 = vmax.f32 %v3916_v61, 0.0  ;;  %v3914_v14 = vadd.f32 %v8604_v57, %v3875_v55  ;;  %v3805_v38 = vadd.f32 %v3804_v11, %v3644_v19  ;;  %v3880_v39 = vmul.f32 %v8592_v3, %v3813_v40  ;;  %v9672_v11 = vld [vmem:[#allocation96_spill] sm:$0xff] }
 0x3a3   : > { %v5501_v7 = vpop.f32.mrf.mxu1  ;;  %v3684_v59 = vadd.f32 %v5338_v45, %v8582_v52  ;;  %v3526_v21 = vadd.f32 %v5229_v60, %v9672_v11 }
 0x3a4   : > { %v4321_v35 = vpack.c.bf16 %v3948_v10, %v3947_v27  ;;  %v3946_v4 = vmax.f32 %v3914_v14, 0.0  ;;  %v3878_v62 = vmul.f32 %v8592_v3, %v3805_v38  ;;  %v3816_v31 = vadd.f32 %v5501_v7, %v3655_v63  ;;  %v9673_v14 = vld [vmem:[#allocation105_spill] sm:$0xff] }
 0x3a5   : > { %v3807_v12 = vpop.f32.mrf.mxu1  ;;  %v3919_v17 = vadd.f32 %v8604_v57, %v3880_v39  ;;  %v3676_v38 = vadd.f32 %v5332_v20, %v9673_v14  ;;  %v5335_v7 = vadd.f32 %v8708_v37, %v8697_v34 }
 0x3a6   : > { %v3808_v26 = vadd.f32 %v3807_v12, %v3647_v47  ;;  %v4320_v23 = vpack.c.bf16 %v3946_v4, %v3945_v29  ;;  %v3881_v42 = vmul.f32 %v8592_v3, %v3816_v31  ;;  %v3917_v41 = vadd.f32 %v8604_v57, %v3878_v62 }
 0x3a7   : > { %v5504_v30 = vpop.f32.mrf.mxu1  ;;  %v3951_v54 = vmax.f32 %v3919_v17, 0.0  ;;  %v5341_v47 = vadd.f32 %v5340_v6, %v5339_v48  ;;  %v3679_v46 = vadd.f32 %v5335_v7, %v9674_v53 }
 0x3a8   : > { %v3879_v51 = vmul.f32 %v8592_v3, %v3808_v26  ;;  %v3829_v24 = vadd.f32 %v5504_v30, %v3668_v16  ;;  %5590 = vmatprep.mubr.bf16.mxu1 %v4320_v23  ;;  %v3920_v8 = vadd.f32 %v8604_v57, %v3881_v42  ;;  %v3949_v61 = vmax.f32 %v3917_v41, 0.0 }
 0x3a9   : > { %v3820_v28 = vpop.f32.mrf.mxu1  ;;  %5591 = vmatmul.mubr.bf16.gmra.mxu1 %v4321_v35  ;;  %v3687_v31 = vadd.f32 %v5341_v47, %v3526_v21 }
 0x3aa   : > { %v3918_v22 = vadd.f32 %v8604_v57, %v3879_v51  ;;  %v3884_v13 = vmul.f32 %v8592_v3, %v3829_v24  ;;  %v3821_v49 = vadd.f32 %v3820_v28, %v3660_v36  ;;  %v3952_v0 = vmax.f32 %v3920_v8, 0.0 }
 0x3ab   : > { %v5505_v25 = vpop.f32.mrf.mxu1 }
 0x3ac   : > { %v3950_v50 = vmax.f32 %v3918_v22, 0.0  ;;  %v3882_v43 = vmul.f32 %v8592_v3, %v3821_v49  ;;  %v3832_v19 = vadd.f32 %v5505_v25, %v3671_v18  ;;  %v4323_v55 = vpack.c.bf16 %v3952_v0, %v3951_v54 }
 0x3ad   : > { %v3823_v40 = vpop.f32.mrf.mxu1  ;;  %v3923_v33 = vadd.f32 %v8604_v57, %v3884_v13 }
 0x3ae   : > { %v3885_v2 = vmul.f32 %v8592_v3, %v3832_v19  ;;  %v3824_v44 = vadd.f32 %v3823_v40, %v3663_v15  ;;  %v4322_v10 = vpack.c.bf16 %v3950_v50, %v3949_v61  ;;  %v3921_v39 = vadd.f32 %v8604_v57, %v3882_v43 }
 0x3af   : > { %v5508_v27 = vpop.f32.mrf.mxu1  ;;  %v3955_v52 = vmax.f32 %v3923_v33, 0.0 }
 0x3b0   : > { %v3924_v5 = vadd.f32 %v8604_v57, %v3885_v2  ;;  %v3883_v9 = vmul.f32 %v8592_v3, %v3824_v44  ;;  %v3845_v63 = vadd.f32 %v5508_v27, %v3684_v59  ;;  %5594 = vmatprep.mubr.bf16.mxu1 %v4322_v10  ;;  %v3953_v26 = vmax.f32 %v3921_v39, 0.0 }
 0x3b1   : > { %v3836_v1 = vpop.f32.mrf.mxu1  ;;  %5595 = vmatmul.mubr.bf16.gmra.mxu1 %v4323_v55 }
 0x3b2   : > { %v3956_v29 = vmax.f32 %v3924_v5, 0.0  ;;  %v3922_v35 = vadd.f32 %v8604_v57, %v3883_v9  ;;  %v3837_v4 = vadd.f32 %v3836_v1, %v3676_v38  ;;  %v3888_v62 = vmul.f32 %v8592_v3, %v3845_v63 }
 0x3b3   : > { %v5509_v12 = vpop.f32.mrf.mxu1 }
 0x3b4   : > { %v4325_v16 = vpack.c.bf16 %v3956_v29, %v3955_v52  ;;  %v3954_v23 = vmax.f32 %v3922_v35, 0.0  ;;  %v3886_v34 = vmul.f32 %v8592_v3, %v3837_v4  ;;  %v3848_v37 = vadd.f32 %v5509_v12, %v3687_v31 }
 0x3b5   : > { %v3839_v17 = vpop.f32.mrf.mxu1  ;;  %v3927_v56 = vadd.f32 %v8604_v57, %v3888_v62 }
 0x3b6   : > { %v3840_v42 = vadd.f32 %v3839_v17, %v3679_v46  ;;  %v4324_v30 = vpack.c.bf16 %v3954_v23, %v3953_v26  ;;  %v3889_v51 = vmul.f32 %v8592_v3, %v3848_v37  ;;  %v3925_v24 = vadd.f32 %v8604_v57, %v3886_v34 }
 0x3b7   : > { %v3959_v8 = vmax.f32 %v3927_v56, 0.0 }
 0x3b8   : > { %v3887_v36 = vmul.f32 %v8592_v3, %v3840_v42  ;;  %5598 = vmatprep.mubr.bf16.mxu1 %v4324_v30  ;;  %v3928_v58 = vadd.f32 %v8604_v57, %v3889_v51  ;;  %v3957_v48 = vmax.f32 %v3925_v24, 0.0 }
 0x3b9   : > { %5599 = vmatmul.mubr.bf16.gmra.mxu1 %v4325_v16 }
 0x3ba   : > { %v3926_v41 = vadd.f32 %v8604_v57, %v3887_v36  ;;  %v3960_v28 = vmax.f32 %v3928_v58, 0.0 }
 0x3bc   : > { %v3958_v22 = vmax.f32 %v3926_v41, 0.0  ;;  %v4327_v13 = vpack.c.bf16 %v3960_v28, %v3959_v8 }
 0x3be   : > { %v4326_v49 = vpack.c.bf16 %v3958_v22, %v3957_v48 }
 0x3c0   : > { %5602 = vmatprep.mubr.bf16.mxu1 %v4326_v49 }
 0x3c1   : > { %5603 = vmatmul.mubr.bf16.gmra.mxu1 %v4327_v13 }
 0x3cd   : > { %v5528_v18 = vpop.f32.mrf.mxu0 }
 0x3cf   : > { %v4185_v60 = vpop.f32.mrf.mxu0 }
 0x3d1   : > { %v5529_v54 = vpop.f32.mrf.mxu0 }
 0x3d3   : > { %v4188_v0 = vpop.f32.mrf.mxu0 }
 0x3d8   : > { %v5532_v3 = vpop.f32.mrf.mxu0 }
 0x3da   : > { %v4201_v25 = vpop.f32.mrf.mxu0 }
 0x3dc   : > { %v5533_v32 = vpop.f32.mrf.mxu0 }
 0x3de   : > { %v4204_v15 = vpop.f32.mrf.mxu0 }
 0x3e0   : > { %v5536_v45 = vpop.f32.mrf.mxu0 }
 0x3e2   : > { %v4217_v57 = vpop.f32.mrf.mxu0 }
 0x3e4   : > { %v5537_v50 = vpop.f32.mrf.mxu0 }
 0x3e6   : > { %v4220_v43 = vpop.f32.mrf.mxu0 }
 0x3e8   : > { %v5540_v19 = vpop.f32.mrf.mxu0 }
 0x3ea   : > { %v4233_v20 = vpop.f32.mrf.mxu0 }
 0x3ec   : > { %v5541_v61 = vpop.f32.mrf.mxu0 }
 0x3ee   : > { %v4236_v55 = vpop.f32.mrf.mxu0 }
 0x3f0   : > { %v5544_v44 = vpop.f32.mrf.mxu0 }
 0x3f2   : > { %v4249_v10 = vpop.f32.mrf.mxu0 }
 0x3f4   : > { %v5545_v5 = vpop.f32.mrf.mxu0 }
 0x3f6   : > { %v4252_v1 = vpop.f32.mrf.mxu0 }
 0x3f8   : > { %v5548_v62 = vpop.f32.mrf.mxu0 }
 0x3fa   : > { %v4265_v26 = vpop.f32.mrf.mxu0 }
 0x3fc   : > { %v5549_v17 = vpop.f32.mrf.mxu0 }
 0x3fe   : > { %v4268_v24 = vpop.f32.mrf.mxu0 }
 0x400   : > { %v5552_v28 = vpop.f32.mrf.mxu0 }
 0x449   : > { %v5576_v40 = vpop.f32.mrf.mxu1 }
 0x44a   : > { %v4435_v6 = vadd.f32 %v5576_v40, %v5528_v18  ;;  %v4281_v18 = vpop.f32.mrf.mxu0 }
 0x44b   : > { %v4426_v33 = vpop.f32.mrf.mxu1 }
 0x44c   : > { %4555 = vst [vmem:[%s8772_s22 + $0x10] sm:$0xff] %v4435_v6  ;;  %v4427_v2 = vadd.f32 %v4426_v33, %v4185_v60 }
 0x44d   : > { %v5577_v59 = vpop.f32.mrf.mxu1 }
 0x44e   : > { %4553 = vst [vmem:[%s8772_s22] sm:$0xff] %v4427_v2  ;;  %v4438_v11 = vadd.f32 %v5577_v59, %v5529_v54 }
 0x44f   : > { %v4429_v21 = vpop.f32.mrf.mxu1 }
 0x450   : > { %4556 = vst [vmem:[%s8772_s22 + $0x18] sm:$0xff] %v4438_v11  ;;  %v4430_v27 = vadd.f32 %v4429_v21, %v4188_v0 }
 0x451   : > { %v5580_v14 = vpop.f32.mrf.mxu1 }
 0x452   : > { %4554 = vst [vmem:[%s8772_s22 + $0x8] sm:$0xff] %v4430_v27  ;;  %v4451_v38 = vadd.f32 %v5580_v14, %v5532_v3 }
 0x453   : > { %v4442_v39 = vpop.f32.mrf.mxu1 }
 0x454   : > { %4559 = vst [vmem:[%s8772_s22 + $0x30] sm:$0xff] %v4451_v38  ;;  %v4443_v9 = vadd.f32 %v4442_v39, %v4201_v25  ;;  %v5553_v25 = vpop.f32.mrf.mxu0 }
 0x455   : > { %v5581_v63 = vpop.f32.mrf.mxu1 }
 0x456   : > { %4557 = vst [vmem:[%s8772_s22 + $0x20] sm:$0xff] %v4443_v9  ;;  %v4454_v7 = vadd.f32 %v5581_v63, %v5533_v32 }
 0x457   : > { %v4445_v47 = vpop.f32.mrf.mxu1 }
 0x458   : > { %4560 = vst [vmem:[%s8772_s22 + $0x38] sm:$0xff] %v4454_v7  ;;  %v4446_v52 = vadd.f32 %v4445_v47, %v4204_v15 }
 0x459   : > { %v5584_v29 = vpop.f32.mrf.mxu1 }
 0x45a   : > { %4558 = vst [vmem:[%s8772_s22 + $0x28] sm:$0xff] %v4446_v52  ;;  %v4467_v35 = vadd.f32 %v5584_v29, %v5536_v45 }
 0x45b   : > { %v4458_v4 = vpop.f32.mrf.mxu1 }
 0x45c   : > { %4563 = vst [vmem:[%s8772_s22 + $0x50] sm:$0xff] %v4467_v35  ;;  %v4459_v31 = vadd.f32 %v4458_v4, %v4217_v57 }
 0x45d   : > { %v5585_v12 = vpop.f32.mrf.mxu1 }
 0x45e   : > { %4561 = vst [vmem:[%s8772_s22 + $0x40] sm:$0xff] %v4459_v31  ;;  %v4470_v53 = vadd.f32 %v5585_v12, %v5537_v50  ;;  %v4284_v50 = vpop.f32.mrf.mxu0 }
 0x45f   : > { %v4461_v46 = vpop.f32.mrf.mxu1 }
 0x460   : > { %4564 = vst [vmem:[%s8772_s22 + $0x58] sm:$0xff] %v4470_v53  ;;  %v4462_v16 = vadd.f32 %v4461_v46, %v4220_v43 }
 0x461   : > { %v5588_v23 = vpop.f32.mrf.mxu1 }
 0x462   : > { %4562 = vst [vmem:[%s8772_s22 + $0x48] sm:$0xff] %v4462_v16  ;;  %v4483_v34 = vadd.f32 %v5588_v23, %v5540_v19 }
 0x463   : > { %v4474_v37 = vpop.f32.mrf.mxu1 }
 0x464   : > { %4567 = vst [vmem:[%s8772_s22 + $0x70] sm:$0xff] %v4483_v34  ;;  %v4475_v42 = vadd.f32 %v4474_v37, %v4233_v20 }
 0x465   : > { %v5589_v30 = vpop.f32.mrf.mxu1 }
 0x466   : > { %4565 = vst [vmem:[%s8772_s22 + $0x60] sm:$0xff] %v4475_v42  ;;  %v4486_v56 = vadd.f32 %v5589_v30, %v5541_v61  ;;  %v5556_v61 = vpop.f32.mrf.mxu0 }
 0x467   : > { %v4477_v51 = vpop.f32.mrf.mxu1 }
 0x468   : > { %4568 = vst [vmem:[%s8772_s22 + $0x78] sm:$0xff] %v4486_v56  ;;  %v4478_v36 = vadd.f32 %v4477_v51, %v4236_v55  ;;  %v4297_v2 = vpop.f32.mrf.mxu0 }
 0x469   : > { %v5592_v58 = vpop.f32.mrf.mxu1 }
 0x46a   : > { %4566 = vst [vmem:[%s8772_s22 + $0x68] sm:$0xff] %v4478_v36  ;;  %v4499_v41 = vadd.f32 %v5592_v58, %v5544_v44  ;;  %v5557_v27 = vpop.f32.mrf.mxu0 }
 0x46b   : > { %v4490_v8 = vpop.f32.mrf.mxu1 }
 0x46c   : > { %4571 = vst [vmem:[%s8772_s22 + $0x90] sm:$0xff] %v4499_v41  ;;  %v4491_v48 = vadd.f32 %v4490_v8, %v4249_v10 }
 0x46d   : > { %v5593_v22 = vpop.f32.mrf.mxu1 }
 0x46e   : > { %4569 = vst [vmem:[%s8772_s22 + $0x80] sm:$0xff] %v4491_v48  ;;  %v4502_v13 = vadd.f32 %v5593_v22, %v5545_v5  ;;  %v4300_v5 = vpop.f32.mrf.mxu0 }
 0x46f   : > { %v4493_v49 = vpop.f32.mrf.mxu1 }
 0x470   : > { %4572 = vst [vmem:[%s8772_s22 + $0x98] sm:$0xff] %v4502_v13  ;;  %v4494_v60 = vadd.f32 %v4493_v49, %v4252_v1 }
 0x471   : > { %v5596_v54 = vpop.f32.mrf.mxu1 }
 0x472   : > { %4570 = vst [vmem:[%s8772_s22 + $0x88] sm:$0xff] %v4494_v60  ;;  %v4515_v0 = vadd.f32 %v5596_v54, %v5548_v62 }
 0x473   : > { %v4506_v3 = vpop.f32.mrf.mxu1 }
 0x474   : > { %4575 = vst [vmem:[%s8772_s22 + $0xb0] sm:$0xff] %v4515_v0  ;;  %v4507_v32 = vadd.f32 %v4506_v3, %v4265_v26 }
 0x475   : > { %v5597_v15 = vpop.f32.mrf.mxu1 }
 0x476   : > { %4573 = vst [vmem:[%s8772_s22 + $0xa0] sm:$0xff] %v4507_v32  ;;  %v4518_v45 = vadd.f32 %v5597_v15, %v5549_v17 }
 0x477   : > { %v4509_v57 = vpop.f32.mrf.mxu1 }
 0x478   : > { %4576 = vst [vmem:[%s8772_s22 + $0xb8] sm:$0xff] %v4518_v45  ;;  %v4510_v43 = vadd.f32 %v4509_v57, %v4268_v24 }
 0x479   : > { %v5600_v19 = vpop.f32.mrf.mxu1 }
 0x47a   : > { %4574 = vst [vmem:[%s8772_s22 + $0xa8] sm:$0xff] %v4510_v43  ;;  %v4531_v20 = vadd.f32 %v5600_v19, %v5552_v28 }
 0x47b   : > { %v4522_v55 = vpop.f32.mrf.mxu1 }
 0x47c   : > { %4579 = vst [vmem:[%s8772_s22 + $0xd0] sm:$0xff] %v4531_v20  ;;  %v4523_v40 = vadd.f32 %v4522_v55, %v4281_v18 }
 0x47d   : > { %v5601_v6 = vpop.f32.mrf.mxu1 }
 0x47e   : > { %4577 = vst [vmem:[%s8772_s22 + $0xc0] sm:$0xff] %v4523_v40  ;;  %v4534_v33 = vadd.f32 %v5601_v6, %v5553_v25 }
 0x47f   : > { %v4525_v44 = vpop.f32.mrf.mxu1 }
 0x480   : > { %4580 = vst [vmem:[%s8772_s22 + $0xd8] sm:$0xff] %v4534_v33  ;;  %v4526_v59 = vadd.f32 %v4525_v44, %v4284_v50 }
 0x481   : > { %v5604_v11 = vpop.f32.mrf.mxu1 }
 0x482   : > { %4578 = vst [vmem:[%s8772_s22 + $0xc8] sm:$0xff] %v4526_v59  ;;  %v4547_v21 = vadd.f32 %v5604_v11, %v5556_v61 }
 0x483   : > { %v4538_v10 = vpop.f32.mrf.mxu1 }
 0x484   : > { %4583 = vst [vmem:[%s8772_s22 + $0xf0] sm:$0xff] %v4547_v21  ;;  %v4539_v14 = vadd.f32 %v4538_v10, %v4297_v2 }
 0x485   : > { %v5605_v38 = vpop.f32.mrf.mxu1 }
 0x486   : > { %4581 = vst [vmem:[%s8772_s22 + $0xe0] sm:$0xff] %v4539_v14  ;;  %v4550_v39 = vadd.f32 %v5605_v38, %v5557_v27 }
 0x487   : > { %v4541_v9 = vpop.f32.mrf.mxu1 }
 0x488   : > { %4584 = vst [vmem:[%s8772_s22 + $0xf8] sm:$0xff] %v4550_v39  ;;  %v4542_v63 = vadd.f32 %v4541_v9, %v4300_v5 }
 0x48a   : > { %4582 = vst [vmem:[%s8772_s22 + $0xe8] sm:$0xff] %v4542_v63 }
 0x48b   : > { %5973 = shalt.err (!%p5970_p5)
}
 0x48c   : > { %s5974_s20 = scalar_lea.hbm %s8809_s23, 4096  ;;  %s5978_s25 = scalar_lea.hbm %s8869_s13, 8192 }
 0x48d   : > { %p5975_p3 = scmp.ne.s32.totalorder %s8809_s23, %s5974_s20  ;;  %p5979_p8 = scmp.lt.s32.totalorder %s8809_s23, %s8869_s13 }
 0x48e   : > { %p5980_p9 = scmp.lt.s32.totalorder %s5978_s25, %s5974_s20 }
 0x48f   : > { %p5976_p4 = pnand %p5975_p3, %p9675_p12 }
 0x490   : > { %p5981_p2 = por %p5980_p9, %p5979_p8 }
 0x491   : > { %p5977_p6 = pneg %p5976_p4 }
 0x493   : > { %p5982_p10 = pnand %p5981_p2, %p5977_p6 }
 0x495   : > { %5985 = shalt.err (!%p5982_p10)
}
 0x496   : > { %s6045_s9 = smov 128   ;;  %s6046_s17 = smov 8  }
 0x497   : > { %5624 = dma.vmem_to_hbm [thread:$0]  (%p9675_p12), %s8811_s30, 4096, %s8809_s23, %s4586_s29, %s6045_s9, %s6045_s9, %s6046_s17  }
 0x498 PF: > { %s9676_s3 = sld [smem:[#allocation16_spill]]  ;;  %p9679_p1 = scmp.ge.s32.totalorder %s6032_s28, 2 }
 0x499   : > { %s9677_s6 = sld [smem:[#allocation17_spill]] }
 0x49e   : > { %s4614_s14 = sand.u32 1, %s9676_s3  }
 0x49f   : > { %p9678_p7 = scmp.ne.s32.totalorder %s9677_s6, 0  ;;  %s4615_s16 = scalar_lea.sflag [#allocation4], %s4614_s14 }
 0x4a1   : > { %p5644_p13 = pnand %p9679_p1, %p9678_p7 }
 0x4a3   : > { %p5645_p0 = pneg %p5644_p13 }
 0x4a5   : > { %6015 = dma.done.wait (%p5645_p0), %s4615_s16, 4096  }
 0x4a6   : > { %6017 = vsyncadd (%p5645_p0), %s4615_s16, 4294963200  ;;  %s9680_s20 = sld [smem:[#allocation18_spill]]  ;;  %p28_p11 = scmp.ge.s32.totalorder %s6217_s18, 4  }
 0x4a7   : > { %s9681_s25 = smov %s6024_s26  ;;  %s9682_s26 = smov %s6028_s27 }
 0x4a8   : > { %s9684_s28 = smov %s6217_s18  ;;  %30 = sbr.rel (!%p28_p11) target bundleno = 12 (0xc), region = 133 }
 0x4ac   : > { %s9683_s27 = smov %s9680_s20 }
 0x4ad   :  { %4620 = vsyncpa [#allocation3], 1 }
 0x4ae   :  { %4622 = vsyncpa [#allocation3 + $0x1], 1 }
 0x4af   :  { %4623 = vsyncpa [#allocation6], 1 }
 0x4b0   :  { %4624 = vsyncpa [#allocation9], 1 }
 0x4b1   :  { %4625 = vsyncpa [#allocation4], 1 }
 0x4b2   :  { %4627 = vsyncpa [#allocation4 + $0x1], 1 }

</bundles_post_ra>
